<compile_context>
chip_gen: v6e
topology: v6e:2x2x1
jax: 0.10.0
libtpu: 0.0.40
codegen_flags: <defaults>
</compile_context>

<pallas_src>
import math
from functools import partial

import jax
import jax.numpy as jnp
from jax.experimental import pallas as pl
from jax.experimental.pallas import tpu as pltpu


def _round_up(n, m):
    return ((n + m - 1) // m) * m


# --------------------------- tiled decoder matmul -----------------------------

def _matmul_kernel(x_ref, w_ref, b_ref, o_ref, acc_ref):
    @pl.when(pl.program_id(2) == 0)
    def _():
        acc_ref[...] = jnp.zeros_like(acc_ref)

    acc_ref[...] += jnp.dot(x_ref[...], w_ref[...],
                            preferred_element_type=jnp.float32)

    @pl.when(pl.program_id(2) == pl.num_programs(2) - 1)
    def _():
        o_ref[...] = (acc_ref[...] + b_ref[...]).astype(o_ref.dtype)


def _pick_k_tile(n, cap=512):
    """n is a multiple of 128; return the largest tile <= cap dividing n."""
    t = min(n, cap)
    while n % t:
        t -= 128
    return t


def linear_padded(x, w, b):
    """x: (M, K) bf16 (K lane-aligned), w: (K, N) bf16 pre-padded, b: (1, N) f32.
    Returns the PADDED (Mp, N) f32 result; the caller slices once at the end."""
    M, K = x.shape
    Kw, N = w.shape
    assert K == Kw and K % 128 == 0 and N % 128 == 0

    # M tiling: 16-row alignment (bf16 sublane pack), tiles up to 512.
    if M <= 512:
        Mp = _round_up(M, 16)
        tm = Mp
    else:
        Mp = _round_up(M, 512)
        tm = 512
    tk = _pick_k_tile(K)
    tn = _pick_k_tile(N)

    if Mp != M:
        x = jnp.pad(x, ((0, Mp - M), (0, 0)))

    grid = (Mp // tm, N // tn, K // tk)
    out = pl.pallas_call(
        _matmul_kernel,
        out_shape=jax.ShapeDtypeStruct((Mp, N), jnp.float32),
        grid=grid,
        in_specs=[
            pl.BlockSpec((tm, tk), lambda i, j, k: (i, k)),
            pl.BlockSpec((tk, tn), lambda i, j, k: (k, j)),
            pl.BlockSpec((1, tn), lambda i, j, k: (0, j)),
        ],
        out_specs=pl.BlockSpec((tm, tn), lambda i, j, k: (i, j)),
        scratch_shapes=[pltpu.VMEM((tm, tn), jnp.float32)],
        compiler_params=pltpu.CompilerParams(
            dimension_semantics=("parallel", "parallel", "arbitrary"),
            vmem_limit_bytes=64 * 1024 * 1024,
        ),
    )(x, w, b)
    return out


# ----------------------- fused per-layer LSTM kernel ---------------------------

def _lstm_layer_kernel(x_ref, b_ref, wih_hbm, whh_hbm,          # inputs
                       out_ref, hN_ref, cN_ref,                  # outputs
                       h_st, c_st, wih_st, whh_st, sems,         # scratch
                       *, t_blk, b_blk, hid):
    """One grid step == one (batch block, time block).

    Per step: stage weights once (tb==0), compute x@W_ih for the whole time
    block with one MXU matmul, then run the T_BLK-step recurrence with h/c
    kept in VMEM/vregs.  Final h/c written only on the last time block.
    """
    tb = pl.program_id(1)

    @pl.when(tb == 0)
    def _():
        # Single-buffered weight staging: one DMA per batch block, no
        # double-buffer footprint for the resident weights (v7x VMEM-friendly).
        cp_i = pltpu.make_async_copy(wih_hbm, wih_st, sems.at[0])
        cp_h = pltpu.make_async_copy(whh_hbm, whh_st, sems.at[1])
        cp_i.start()
        cp_h.start()
        cp_i.wait()
        cp_h.wait()
        h_st[...] = jnp.zeros_like(h_st)     # hidden=None -> zero init (PyTorch)
        c_st[...] = jnp.zeros_like(c_st)

    # (a) input->hidden for the whole time block: one matmul over T_BLK*B rows.
    d_in = x_ref.shape[-1]
    xb = x_ref[...].reshape(t_blk * b_blk, d_in)                      # bf16
    gx = jnp.dot(xb, wih_st[...], preferred_element_type=jnp.float32)
    gx = gx + b_ref[...]                                              # (T*B, 4H) f32

    def _sig(v):  # sigmoid via tanh: 1 EUP push instead of exp + reciprocal
        return 0.5 * (jnp.tanh(0.5 * v) + 1.0)

    # (b) sequential recurrence inside the block (statically unrolled).
    h = h_st[...]
    c = c_st[...]
    w_hh = whh_st[...]
    for t in range(t_blk):
        gates = gx[t * b_blk:(t + 1) * b_blk] + jnp.dot(
            h.astype(jnp.bfloat16), w_hh, preferred_element_type=jnp.float32)
        i = _sig(gates[:, 0 * hid:1 * hid])
        f = _sig(gates[:, 1 * hid:2 * hid])
        g = jnp.tanh(gates[:, 2 * hid:3 * hid])
        o = _sig(gates[:, 3 * hid:4 * hid])
        c = f * c + i * g
        h = o * jnp.tanh(c)
        out_ref[t] = h.astype(out_ref.dtype)

    h_st[...] = h
    c_st[...] = c

    @pl.when(tb == pl.num_programs(1) - 1)
    def _():
        hN_ref[...] = h
        cN_ref[...] = c


def _pick_time_block(S, cap=8):
    for t in range(min(cap, S), 0, -1):
        if S % t == 0:
            return t
    return 1


def lstm_layer(x, w_ih, w_hh, bias, Hp):
    """x: (S, Bp, Din) bf16 (Din, Hp multiples of 128, Bp multiple of 16).
    Returns (out (S,Bp,Hp) bf16, h_n (Bp,Hp) f32, c_n (Bp,Hp) f32)."""
    S, Bp, Din = x.shape
    t_blk = _pick_time_block(S)
    # Split the batch across a leading "parallel" grid axis when it is big
    # enough (lets v7x's two TensorCores run independent half-batch recurrences).
    nb = 2 if (Bp % 32 == 0) else 1
    b_blk = Bp // nb
    grid = (nb, S // t_blk)

    out, h_n, c_n = pl.pallas_call(
        partial(_lstm_layer_kernel, t_blk=t_blk, b_blk=b_blk, hid=Hp),
        grid=grid,
        in_specs=[
            pl.BlockSpec((t_blk, b_blk, Din), lambda bb, tb: (tb, bb, 0)),
            pl.BlockSpec((1, 4 * Hp), lambda bb, tb: (0, 0)),
            pl.BlockSpec(memory_space=pl.ANY),    # W_ih stays in HBM, staged once
            pl.BlockSpec(memory_space=pl.ANY),    # W_hh stays in HBM, staged once
        ],
        out_specs=(
            pl.BlockSpec((t_blk, b_blk, Hp), lambda bb, tb: (tb, bb, 0)),
            pl.BlockSpec((b_blk, Hp), lambda bb, tb: (bb, 0)),
            pl.BlockSpec((b_blk, Hp), lambda bb, tb: (bb, 0)),
        ),
        out_shape=(
            jax.ShapeDtypeStruct((S, Bp, Hp), jnp.bfloat16),   # per-step h (bf16 slab)
            jax.ShapeDtypeStruct((Bp, Hp), jnp.float32),       # final h
            jax.ShapeDtypeStruct((Bp, Hp), jnp.float32),       # final c
        ),
        scratch_shapes=[
            pltpu.VMEM((b_blk, Hp), jnp.float32),              # h state
            pltpu.VMEM((b_blk, Hp), jnp.float32),              # c state
            pltpu.VMEM((Din, 4 * Hp), jnp.bfloat16),           # W_ih (single buffer)
            pltpu.VMEM((Hp, 4 * Hp), jnp.bfloat16),            # W_hh (single buffer)
            pltpu.SemaphoreType.DMA((2,)),
        ],
        compiler_params=pltpu.CompilerParams(
            dimension_semantics=("parallel", "arbitrary"),
            vmem_limit_bytes=64 * 1024 * 1024,
        ),
    )(x, bias, w_ih, w_hh)
    return out, h_n, c_n


# ------------------------------ params / glue ---------------------------------

def init_params(key, nvoc, dim, hidden, num_layers):
    """PyTorch-equivalent (unpadded, f32) parameters."""
    keys = jax.random.split(key, 2 + num_layers)
    u = lambda k, shape, a: jax.random.uniform(k, shape, jnp.float32, -a, a)
    stdv = 1.0 / math.sqrt(hidden)                       # PyTorch LSTM default init
    params = {
        "emb": u(keys[0], (nvoc, dim), 0.1),             # nn.Embedding weight
        "dec_w": u(keys[1], (hidden, nvoc), 0.1),        # decoder.weight^T: (in, out)
        "dec_b": jnp.zeros((nvoc,), jnp.float32),        # decoder.bias.zero_()
        "layers": [],
    }
    for l in range(num_layers):
        k = jax.random.split(keys[2 + l], 4)
        in_dim = dim if l == 0 else hidden
        params["layers"].append(dict(
            w_ih=u(k[0], (in_dim, 4 * hidden), stdv),    # transposed vs PyTorch
            w_hh=u(k[1], (hidden, 4 * hidden), stdv),
            b_ih=u(k[2], (4 * hidden,), stdv),
            b_hh=u(k[3], (4 * hidden,), stdv),
        ))
    return params


def prepare_params(params, nvoc, dim, hidden):
    """Pad + cast weights ONCE: per-gate H->Hp padding, lane-aligned dims, bf16."""
    Dp = _round_up(dim, 128)
    Hp = _round_up(hidden, 128)
    Np = _round_up(nvoc, 128)

    def pad_gate_cols(w, rows_pad):
        # (rows, 4H) -> (rows_pad, 4Hp), padding each of the i/f/g/o chunks.
        rows = w.shape[0]
        w4 = w.reshape(rows, 4, hidden)
        w4 = jnp.pad(w4, ((0, rows_pad - rows), (0, 0), (0, Hp - hidden)))
        return w4.reshape(rows_pad, 4 * Hp)

    def pad_gate_bias(b):
        b4 = b.reshape(4, hidden)
        b4 = jnp.pad(b4, ((0, 0), (0, Hp - hidden)))
        return b4.reshape(1, 4 * Hp)

    prep = {
        "emb": jnp.pad(params["emb"], ((0, 0), (0, Dp - dim))).astype(jnp.bfloat16),
        "dec_w": jnp.pad(params["dec_w"],
                         ((0, Hp - hidden), (0, Np - nvoc))).astype(jnp.bfloat16),
        "dec_b": jnp.pad(params["dec_b"], ((0, Np - nvoc),)).reshape(1, Np)
                 .astype(jnp.float32),
        "layers": [],
    }
    for l, layer in enumerate(params["layers"]):
        in_pad = Dp if l == 0 else Hp
        prep["layers"].append(dict(
            w_ih=pad_gate_cols(layer["w_ih"], in_pad).astype(jnp.bfloat16),
            w_hh=pad_gate_cols(layer["w_hh"], Hp).astype(jnp.bfloat16),
            b=pad_gate_bias(layer["b_ih"] + layer["b_hh"]).astype(jnp.float32),
        ))
    return prep, (Dp, Hp, Np)


def lm_lstm_forward(prep, tokens, *, nvoc, hidden, Hp, Np):
    S, B = tokens.shape
    Bp = _round_up(max(B, 16), 16)        # bf16 sublane pack

    # (1) embedding lookup; drop(emb) -> identity in eval mode
    # TODO(synk): data-dependent embedding gather kept in JAX (a Pallas version
    #             would need a manual-DMA gather kernel).
    x = jnp.take(prep["emb"], tokens, axis=0)                 # (S, B, Dp) bf16
    if Bp != B:
        x = jnp.pad(x, ((0, 0), (0, Bp - B), (0, 0)))

    # (2) stacked LSTM layers (inter-layer dropout identity in eval)
    h_fin, c_fin = [], []
    for layer in prep["layers"]:
        x, h_n, c_n = lstm_layer(x, layer["w_ih"], layer["w_hh"], layer["b"], Hp)
        h_fin.append(h_n[:B, :hidden])
        c_fin.append(c_n[:B, :hidden])

    # (3) final drop -> identity; decoder on flattened (S*Bp, Hp) bf16 slab
    dec = linear_padded(x.reshape(S * Bp, Hp), prep["dec_w"], prep["dec_b"])
    dec = dec[:S * Bp].reshape(S, Bp, Np)[:, :B, :nvoc]       # slice ONCE at the end

    hidden_state = (jnp.stack(h_fin, axis=0),                 # (num_layers, B, H)
                    jnp.stack(c_fin, axis=0))
    return dec, hidden_state


# ----------------------------------- main --------------------------------------

if __name__ == "__main__":
    nvoc, dim, hidden, num_layers = 50, 32, 32, 2
    S, B = 8, 2

    key = jax.random.PRNGKey(0)
    pkey, tkey = jax.random.split(key)
    params = init_params(pkey, nvoc, dim, hidden, num_layers)
    prep, (Dp, Hp, Np) = prepare_params(params, nvoc, dim, hidden)
    tokens = jax.random.randint(tkey, (S, B), 0, nvoc, dtype=jnp.int32)

    fwd = jax.jit(lambda p, t: lm_lstm_forward(p, t, nvoc=nvoc, hidden=hidden,
                                               Hp=Hp, Np=Np))
    decoded, (h_n, c_n) = fwd(prep, tokens)
    decoded = jax.block_until_ready(decoded)
    h_n = jax.block_until_ready(h_n)
    c_n = jax.block_until_ready(c_n)

    assert decoded.shape == (S, B, nvoc), decoded.shape
    assert h_n.shape == (num_layers, B, hidden), h_n.shape
    assert c_n.shape == (num_layers, B, hidden), c_n.shape
    assert bool(jnp.all(jnp.isfinite(decoded)))
    assert bool(jnp.all(jnp.isfinite(h_n))) and bool(jnp.all(jnp.isfinite(c_n)))
    print("KERNEL_OK")
</pallas_src>

<mosaic_0001>
module attributes {stable_mosaic.version = 11 : i64} {
  func.func @_lstm_layer_kernel(%arg0: i32, %arg1: i32, %arg2: memref<8x16x128xbf16, #tpu.memory_space<vmem>>, %arg3: memref<1x512xf32, #tpu.memory_space<vmem>>, %arg4: memref<128x512xbf16, #tpu.memory_space<any>>, %arg5: memref<128x512xbf16, #tpu.memory_space<any>>, %arg6: memref<8x16x128xbf16, #tpu.memory_space<vmem>>, %arg7: memref<16x128xf32, #tpu.memory_space<vmem>>, %arg8: memref<16x128xf32, #tpu.memory_space<vmem>>, %arg9: memref<16x128xf32, #tpu.memory_space<vmem>>, %arg10: memref<16x128xf32, #tpu.memory_space<vmem>>, %arg11: memref<128x512xbf16, #tpu.memory_space<vmem>>, %arg12: memref<128x512xbf16, #tpu.memory_space<vmem>>, %arg13: memref<2x!tpu.dma_semaphore, #tpu.memory_space<semaphore_mem>>) attributes {dimension_semantics = [#tpu.dimension_semantics<parallel>, #tpu.dimension_semantics<arbitrary>], iteration_bounds = array<i64: 1, 1>, scalar_prefetch = 0 : i64, scratch_operands = 5 : i64, tpu.core_type = #tpu.core_type<tc>, window_params = [{transform_indices = @transform_0, window_bounds = array<i64: 8, 16, 128>}, {pipeline_mode = #tpu.pipeline_mode<synchronous>, transform_indices = @transform_1, window_bounds = array<i64: 1, 512>}, {}, {}, {transform_indices = @transform_4, window_bounds = array<i64: 8, 16, 128>}, {transform_indices = @transform_5, window_bounds = array<i64: 16, 128>}, {transform_indices = @transform_6, window_bounds = array<i64: 16, 128>}]} {
    %c0_i32 = arith.constant 0 : i32
    %0 = arith.cmpi eq, %arg1, %c0_i32 : i32
    %1 = arith.extui %0 : i1 to i32
    %c0_i32_0 = arith.constant 0 : i32
    %2 = arith.cmpi ne, %1, %c0_i32_0 : i32
    scf.if %2 {
      %c0_i32_116 = arith.constant 0 : i32
      %330 = tpu.memref_slice %arg13[%c0_i32_116] : memref<2x!tpu.dma_semaphore, #tpu.memory_space<semaphore_mem>> -> memref<1x!tpu.dma_semaphore, #tpu.memory_space<semaphore_mem>>
      %331 = tpu.memref_squeeze %330 : memref<1x!tpu.dma_semaphore, #tpu.memory_space<semaphore_mem>> -> memref<!tpu.dma_semaphore, #tpu.memory_space<semaphore_mem>>
      tpu.enqueue_dma source(%arg4 : memref<128x512xbf16, #tpu.memory_space<any>>) target(%arg11 : memref<128x512xbf16, #tpu.memory_space<vmem>>) target_semaphore(%331 : memref<!tpu.dma_semaphore, #tpu.memory_space<semaphore_mem>>)
      %c1_i32 = arith.constant 1 : i32
      %332 = tpu.memref_slice %arg13[%c1_i32] : memref<2x!tpu.dma_semaphore, #tpu.memory_space<semaphore_mem>> -> memref<1x!tpu.dma_semaphore, #tpu.memory_space<semaphore_mem>>
      %333 = tpu.memref_squeeze %332 : memref<1x!tpu.dma_semaphore, #tpu.memory_space<semaphore_mem>> -> memref<!tpu.dma_semaphore, #tpu.memory_space<semaphore_mem>>
      tpu.enqueue_dma source(%arg5 : memref<128x512xbf16, #tpu.memory_space<any>>) target(%arg12 : memref<128x512xbf16, #tpu.memory_space<vmem>>) target_semaphore(%333 : memref<!tpu.dma_semaphore, #tpu.memory_space<semaphore_mem>>)
      %c0_i32_117 = arith.constant 0 : i32
      %334 = tpu.memref_slice %arg13[%c0_i32_117] : memref<2x!tpu.dma_semaphore, #tpu.memory_space<semaphore_mem>> -> memref<1x!tpu.dma_semaphore, #tpu.memory_space<semaphore_mem>>
      %335 = tpu.memref_squeeze %334 : memref<1x!tpu.dma_semaphore, #tpu.memory_space<semaphore_mem>> -> memref<!tpu.dma_semaphore, #tpu.memory_space<semaphore_mem>>
      tpu.wait_dma2 semaphore(%335 : memref<!tpu.dma_semaphore, #tpu.memory_space<semaphore_mem>>) src(%arg4 : memref<128x512xbf16, #tpu.memory_space<any>>) dst(%arg11 : memref<128x512xbf16, #tpu.memory_space<vmem>>)
      %c1_i32_118 = arith.constant 1 : i32
      %336 = tpu.memref_slice %arg13[%c1_i32_118] : memref<2x!tpu.dma_semaphore, #tpu.memory_space<semaphore_mem>> -> memref<1x!tpu.dma_semaphore, #tpu.memory_space<semaphore_mem>>
      %337 = tpu.memref_squeeze %336 : memref<1x!tpu.dma_semaphore, #tpu.memory_space<semaphore_mem>> -> memref<!tpu.dma_semaphore, #tpu.memory_space<semaphore_mem>>
      tpu.wait_dma2 semaphore(%337 : memref<!tpu.dma_semaphore, #tpu.memory_space<semaphore_mem>>) src(%arg5 : memref<128x512xbf16, #tpu.memory_space<any>>) dst(%arg12 : memref<128x512xbf16, #tpu.memory_space<vmem>>)
      %cst_119 = arith.constant 0.000000e+00 : f32
      %338 = vector.broadcast %cst_119 : f32 to vector<16x128xf32>
      %c0_120 = arith.constant 0 : index
      %c0_121 = arith.constant 0 : index
      %339 = vector.load %arg9[%c0_120, %c0_121] : memref<16x128xf32, #tpu.memory_space<vmem>>, vector<16x128xf32>
      tpu.vector_store %arg9[%c0_120, %c0_121], %338 {strides = array<i32>} : memref<16x128xf32, #tpu.memory_space<vmem>>, vector<16x128xf32>,
      %cst_122 = arith.constant 0.000000e+00 : f32
      %340 = vector.broadcast %cst_122 : f32 to vector<16x128xf32>
      %c0_123 = arith.constant 0 : index
      %c0_124 = arith.constant 0 : index
      %341 = vector.load %arg10[%c0_123, %c0_124] : memref<16x128xf32, #tpu.memory_space<vmem>>, vector<16x128xf32>
      tpu.vector_store %arg10[%c0_123, %c0_124], %340 {strides = array<i32>} : memref<16x128xf32, #tpu.memory_space<vmem>>, vector<16x128xf32>,
    } else {
    }
    %c0 = arith.constant 0 : index
    %c0_1 = arith.constant 0 : index
    %c0_2 = arith.constant 0 : index
    %3 = vector.load %arg2[%c0, %c0_1, %c0_2] : memref<8x16x128xbf16, #tpu.memory_space<vmem>>, vector<8x16x128xbf16>
    %4 = vector.shape_cast %3 : vector<8x16x128xbf16> to vector<128x128xbf16>
    %c0_3 = arith.constant 0 : index
    %c0_4 = arith.constant 0 : index
    %5 = vector.load %arg11[%c0_3, %c0_4] : memref<128x512xbf16, #tpu.memory_space<vmem>>, vector<128x512xbf16>
    %cst = arith.constant dense<0.000000e+00> : vector<128x512xf32>
    %6 = tpu.matmul %4, %5, %cst {dimension_numbers = #tpu.dot_dimension_numbers<[1], [0], [0], [1], [0, 0, 1, 1], [], []>} : vector<128x128xbf16>, vector<128x512xbf16>, vector<128x512xf32> -> vector<128x512xf32>
    %c0_5 = arith.constant 0 : index
    %c0_6 = arith.constant 0 : index
    %7 = vector.load %arg3[%c0_5, %c0_6] : memref<1x512xf32, #tpu.memory_space<vmem>>, vector<1x512xf32>
    %8 = vector.broadcast %7 : vector<1x512xf32> to vector<128x512xf32>
    %9 = arith.addf %6, %8 : vector<128x512xf32>
    %c0_7 = arith.constant 0 : index
    %c0_8 = arith.constant 0 : index
    %10 = vector.load %arg9[%c0_7, %c0_8] : memref<16x128xf32, #tpu.memory_space<vmem>>, vector<16x128xf32>
    %c0_9 = arith.constant 0 : index
    %c0_10 = arith.constant 0 : index
    %11 = vector.load %arg10[%c0_9, %c0_10] : memref<16x128xf32, #tpu.memory_space<vmem>>, vector<16x128xf32>
    %c0_11 = arith.constant 0 : index
    %c0_12 = arith.constant 0 : index
    %12 = vector.load %arg12[%c0_11, %c0_12] : memref<128x512xbf16, #tpu.memory_space<vmem>>, vector<128x512xbf16>
    %13 = vector.extract_strided_slice %9 {offsets = [0, 0], sizes = [16, 512], strides = [1, 1]} : vector<128x512xf32> to vector<16x512xf32>
    %14 = arith.truncf %10 : vector<16x128xf32> to vector<16x128xbf16>
    %cst_13 = arith.constant dense<0.000000e+00> : vector<16x512xf32>
    %15 = tpu.matmul %14, %12, %cst_13 {dimension_numbers = #tpu.dot_dimension_numbers<[1], [0], [0], [1], [0, 0, 1, 1], [], []>} : vector<16x128xbf16>, vector<128x512xbf16>, vector<16x512xf32> -> vector<16x512xf32>
    %16 = arith.addf %13, %15 : vector<16x512xf32>
    %17 = vector.extract_strided_slice %16 {offsets = [0, 0], sizes = [16, 128], strides = [1, 1]} : vector<16x512xf32> to vector<16x128xf32>
    %cst_14 = arith.constant 5.000000e-01 : f32
    %18 = vector.broadcast %cst_14 : f32 to vector<16x128xf32>
    %19 = arith.mulf %18, %17 : vector<16x128xf32>
    %20 = math.tanh %19 : vector<16x128xf32>
    %cst_15 = arith.constant 1.000000e+00 : f32
    %21 = vector.broadcast %cst_15 : f32 to vector<16x128xf32>
    %22 = arith.addf %20, %21 : vector<16x128xf32>
    %cst_16 = arith.constant 5.000000e-01 : f32
    %23 = vector.broadcast %cst_16 : f32 to vector<16x128xf32>
    %24 = arith.mulf %23, %22 : vector<16x128xf32>
    %25 = vector.extract_strided_slice %16 {offsets = [0, 128], sizes = [16, 128], strides = [1, 1]} : vector<16x512xf32> to vector<16x128xf32>
    %cst_17 = arith.constant 5.000000e-01 : f32
    %26 = vector.broadcast %cst_17 : f32 to vector<16x128xf32>
    %27 = arith.mulf %26, %25 : vector<16x128xf32>
    %28 = math.tanh %27 : vector<16x128xf32>
    %cst_18 = arith.constant 1.000000e+00 : f32
    %29 = vector.broadcast %cst_18 : f32 to vector<16x128xf32>
    %30 = arith.addf %28, %29 : vector<16x128xf32>
    %cst_19 = arith.constant 5.000000e-01 : f32
    %31 = vector.broadcast %cst_19 : f32 to vector<16x128xf32>
    %32 = arith.mulf %31, %30 : vector<16x128xf32>
    %33 = vector.extract_strided_slice %16 {offsets = [0, 256], sizes = [16, 128], strides = [1, 1]} : vector<16x512xf32> to vector<16x128xf32>
    %34 = math.tanh %33 : vector<16x128xf32>
    %35 = vector.extract_strided_slice %16 {offsets = [0, 384], sizes = [16, 128], strides = [1, 1]} : vector<16x512xf32> to vector<16x128xf32>
    %cst_20 = arith.constant 5.000000e-01 : f32
    %36 = vector.broadcast %cst_20 : f32 to vector<16x128xf32>
    %37 = arith.mulf %36, %35 : vector<16x128xf32>
    %38 = math.tanh %37 : vector<16x128xf32>
    %cst_21 = arith.constant 1.000000e+00 : f32
    %39 = vector.broadcast %cst_21 : f32 to vector<16x128xf32>
    %40 = arith.addf %38, %39 : vector<16x128xf32>
    %cst_22 = arith.constant 5.000000e-01 : f32
    %41 = vector.broadcast %cst_22 : f32 to vector<16x128xf32>
    %42 = arith.mulf %41, %40 : vector<16x128xf32>
    %43 = arith.mulf %32, %11 : vector<16x128xf32>
    %44 = arith.mulf %24, %34 : vector<16x128xf32>
    %45 = arith.addf %43, %44 : vector<16x128xf32>
    %46 = math.tanh %45 : vector<16x128xf32>
    %47 = arith.mulf %42, %46 : vector<16x128xf32>
    %48 = arith.truncf %47 : vector<16x128xf32> to vector<16x128xbf16>
    %c0_23 = arith.constant 0 : index
    %c0_24 = arith.constant 0 : index
    %c0_25 = arith.constant 0 : index
    %49 = vector.load %arg6[%c0_23, %c0_24, %c0_25] : memref<8x16x128xbf16, #tpu.memory_space<vmem>>, vector<1x16x128xbf16>
    %50 = vector.shape_cast %49 : vector<1x16x128xbf16> to vector<16x128xbf16>
    %51 = vector.shape_cast %48 : vector<16x128xbf16> to vector<1x16x128xbf16>
    tpu.vector_store %arg6[%c0_23, %c0_24, %c0_25], %51 {strides = array<i32>} : memref<8x16x128xbf16, #tpu.memory_space<vmem>>, vector<1x16x128xbf16>,
    %52 = vector.extract_strided_slice %9 {offsets = [16, 0], sizes = [16, 512], strides = [1, 1]} : vector<128x512xf32> to vector<16x512xf32>
    %53 = arith.truncf %47 : vector<16x128xf32> to vector<16x128xbf16>
    %cst_26 = arith.constant dense<0.000000e+00> : vector<16x512xf32>
    %54 = tpu.matmul %53, %12, %cst_26 {dimension_numbers = #tpu.dot_dimension_numbers<[1], [0], [0], [1], [0, 0, 1, 1], [], []>} : vector<16x128xbf16>, vector<128x512xbf16>, vector<16x512xf32> -> vector<16x512xf32>
    %55 = arith.addf %52, %54 : vector<16x512xf32>
    %56 = vector.extract_strided_slice %55 {offsets = [0, 0], sizes = [16, 128], strides = [1, 1]} : vector<16x512xf32> to vector<16x128xf32>
    %cst_27 = arith.constant 5.000000e-01 : f32
    %57 = vector.broadcast %cst_27 : f32 to vector<16x128xf32>
    %58 = arith.mulf %57, %56 : vector<16x128xf32>
    %59 = math.tanh %58 : vector<16x128xf32>
    %cst_28 = arith.constant 1.000000e+00 : f32
    %60 = vector.broadcast %cst_28 : f32 to vector<16x128xf32>
    %61 = arith.addf %59, %60 : vector<16x128xf32>
    %cst_29 = arith.constant 5.000000e-01 : f32
    %62 = vector.broadcast %cst_29 : f32 to vector<16x128xf32>
    %63 = arith.mulf %62, %61 : vector<16x128xf32>
    %64 = vector.extract_strided_slice %55 {offsets = [0, 128], sizes = [16, 128], strides = [1, 1]} : vector<16x512xf32> to vector<16x128xf32>
    %cst_30 = arith.constant 5.000000e-01 : f32
    %65 = vector.broadcast %cst_30 : f32 to vector<16x128xf32>
    %66 = arith.mulf %65, %64 : vector<16x128xf32>
    %67 = math.tanh %66 : vector<16x128xf32>
    %cst_31 = arith.constant 1.000000e+00 : f32
    %68 = vector.broadcast %cst_31 : f32 to vector<16x128xf32>
    %69 = arith.addf %67, %68 : vector<16x128xf32>
    %cst_32 = arith.constant 5.000000e-01 : f32
    %70 = vector.broadcast %cst_32 : f32 to vector<16x128xf32>
    %71 = arith.mulf %70, %69 : vector<16x128xf32>
    %72 = vector.extract_strided_slice %55 {offsets = [0, 256], sizes = [16, 128], strides = [1, 1]} : vector<16x512xf32> to vector<16x128xf32>
    %73 = math.tanh %72 : vector<16x128xf32>
    %74 = vector.extract_strided_slice %55 {offsets = [0, 384], sizes = [16, 128], strides = [1, 1]} : vector<16x512xf32> to vector<16x128xf32>
    %cst_33 = arith.constant 5.000000e-01 : f32
    %75 = vector.broadcast %cst_33 : f32 to vector<16x128xf32>
    %76 = arith.mulf %75, %74 : vector<16x128xf32>
    %77 = math.tanh %76 : vector<16x128xf32>
    %cst_34 = arith.constant 1.000000e+00 : f32
    %78 = vector.broadcast %cst_34 : f32 to vector<16x128xf32>
    %79 = arith.addf %77, %78 : vector<16x128xf32>
    %cst_35 = arith.constant 5.000000e-01 : f32
    %80 = vector.broadcast %cst_35 : f32 to vector<16x128xf32>
    %81 = arith.mulf %80, %79 : vector<16x128xf32>
    %82 = arith.mulf %71, %45 : vector<16x128xf32>
    %83 = arith.mulf %63, %73 : vector<16x128xf32>
    %84 = arith.addf %82, %83 : vector<16x128xf32>
    %85 = math.tanh %84 : vector<16x128xf32>
    %86 = arith.mulf %81, %85 : vector<16x128xf32>
    %87 = arith.truncf %86 : vector<16x128xf32> to vector<16x128xbf16>
    %c1 = arith.constant 1 : index
    %c0_36 = arith.constant 0 : index
    %c0_37 = arith.constant 0 : index
    %88 = vector.load %arg6[%c1, %c0_36, %c0_37] : memref<8x16x128xbf16, #tpu.memory_space<vmem>>, vector<1x16x128xbf16>
    %89 = vector.shape_cast %88 : vector<1x16x128xbf16> to vector<16x128xbf16>
    %90 = vector.shape_cast %87 : vector<16x128xbf16> to vector<1x16x128xbf16>
    tpu.vector_store %arg6[%c1, %c0_36, %c0_37], %90 {strides = array<i32>} : memref<8x16x128xbf16, #tpu.memory_space<vmem>>, vector<1x16x128xbf16>,
    %91 = vector.extract_strided_slice %9 {offsets = [32, 0], sizes = [16, 512], strides = [1, 1]} : vector<128x512xf32> to vector<16x512xf32>
    %92 = arith.truncf %86 : vector<16x128xf32> to vector<16x128xbf16>
    %cst_38 = arith.constant dense<0.000000e+00> : vector<16x512xf32>
    %93 = tpu.matmul %92, %12, %cst_38 {dimension_numbers = #tpu.dot_dimension_numbers<[1], [0], [0], [1], [0, 0, 1, 1], [], []>} : vector<16x128xbf16>, vector<128x512xbf16>, vector<16x512xf32> -> vector<16x512xf32>
    %94 = arith.addf %91, %93 : vector<16x512xf32>
    %95 = vector.extract_strided_slice %94 {offsets = [0, 0], sizes = [16, 128], strides = [1, 1]} : vector<16x512xf32> to vector<16x128xf32>
    %cst_39 = arith.constant 5.000000e-01 : f32
    %96 = vector.broadcast %cst_39 : f32 to vector<16x128xf32>
    %97 = arith.mulf %96, %95 : vector<16x128xf32>
    %98 = math.tanh %97 : vector<16x128xf32>
    %cst_40 = arith.constant 1.000000e+00 : f32
    %99 = vector.broadcast %cst_40 : f32 to vector<16x128xf32>
    %100 = arith.addf %98, %99 : vector<16x128xf32>
    %cst_41 = arith.constant 5.000000e-01 : f32
    %101 = vector.broadcast %cst_41 : f32 to vector<16x128xf32>
    %102 = arith.mulf %101, %100 : vector<16x128xf32>
    %103 = vector.extract_strided_slice %94 {offsets = [0, 128], sizes = [16, 128], strides = [1, 1]} : vector<16x512xf32> to vector<16x128xf32>
    %cst_42 = arith.constant 5.000000e-01 : f32
    %104 = vector.broadcast %cst_42 : f32 to vector<16x128xf32>
    %105 = arith.mulf %104, %103 : vector<16x128xf32>
    %106 = math.tanh %105 : vector<16x128xf32>
    %cst_43 = arith.constant 1.000000e+00 : f32
    %107 = vector.broadcast %cst_43 : f32 to vector<16x128xf32>
    %108 = arith.addf %106, %107 : vector<16x128xf32>
    %cst_44 = arith.constant 5.000000e-01 : f32
    %109 = vector.broadcast %cst_44 : f32 to vector<16x128xf32>
    %110 = arith.mulf %109, %108 : vector<16x128xf32>
    %111 = vector.extract_strided_slice %94 {offsets = [0, 256], sizes = [16, 128], strides = [1, 1]} : vector<16x512xf32> to vector<16x128xf32>
    %112 = math.tanh %111 : vector<16x128xf32>
    %113 = vector.extract_strided_slice %94 {offsets = [0, 384], sizes = [16, 128], strides = [1, 1]} : vector<16x512xf32> to vector<16x128xf32>
    %cst_45 = arith.constant 5.000000e-01 : f32
    %114 = vector.broadcast %cst_45 : f32 to vector<16x128xf32>
    %115 = arith.mulf %114, %113 : vector<16x128xf32>
    %116 = math.tanh %115 : vector<16x128xf32>
    %cst_46 = arith.constant 1.000000e+00 : f32
    %117 = vector.broadcast %cst_46 : f32 to vector<16x128xf32>
    %118 = arith.addf %116, %117 : vector<16x128xf32>
    %cst_47 = arith.constant 5.000000e-01 : f32
    %119 = vector.broadcast %cst_47 : f32 to vector<16x128xf32>
    %120 = arith.mulf %119, %118 : vector<16x128xf32>
    %121 = arith.mulf %110, %84 : vector<16x128xf32>
    %122 = arith.mulf %102, %112 : vector<16x128xf32>
    %123 = arith.addf %121, %122 : vector<16x128xf32>
    %124 = math.tanh %123 : vector<16x128xf32>
    %125 = arith.mulf %120, %124 : vector<16x128xf32>
    %126 = arith.truncf %125 : vector<16x128xf32> to vector<16x128xbf16>
    %c2 = arith.constant 2 : index
    %c0_48 = arith.constant 0 : index
    %c0_49 = arith.constant 0 : index
    %127 = vector.load %arg6[%c2, %c0_48, %c0_49] : memref<8x16x128xbf16, #tpu.memory_space<vmem>>, vector<1x16x128xbf16>
    %128 = vector.shape_cast %127 : vector<1x16x128xbf16> to vector<16x128xbf16>
    %129 = vector.shape_cast %126 : vector<16x128xbf16> to vector<1x16x128xbf16>
    tpu.vector_store %arg6[%c2, %c0_48, %c0_49], %129 {strides = array<i32>} : memref<8x16x128xbf16, #tpu.memory_space<vmem>>, vector<1x16x128xbf16>,
    %130 = vector.extract_strided_slice %9 {offsets = [48, 0], sizes = [16, 512], strides = [1, 1]} : vector<128x512xf32> to vector<16x512xf32>
    %131 = arith.truncf %125 : vector<16x128xf32> to vector<16x128xbf16>
    %cst_50 = arith.constant dense<0.000000e+00> : vector<16x512xf32>
    %132 = tpu.matmul %131, %12, %cst_50 {dimension_numbers = #tpu.dot_dimension_numbers<[1], [0], [0], [1], [0, 0, 1, 1], [], []>} : vector<16x128xbf16>, vector<128x512xbf16>, vector<16x512xf32> -> vector<16x512xf32>
    %133 = arith.addf %130, %132 : vector<16x512xf32>
    %134 = vector.extract_strided_slice %133 {offsets = [0, 0], sizes = [16, 128], strides = [1, 1]} : vector<16x512xf32> to vector<16x128xf32>
    %cst_51 = arith.constant 5.000000e-01 : f32
    %135 = vector.broadcast %cst_51 : f32 to vector<16x128xf32>
    %136 = arith.mulf %135, %134 : vector<16x128xf32>
    %137 = math.tanh %136 : vector<16x128xf32>
    %cst_52 = arith.constant 1.000000e+00 : f32
    %138 = vector.broadcast %cst_52 : f32 to vector<16x128xf32>
    %139 = arith.addf %137, %138 : vector<16x128xf32>
    %cst_53 = arith.constant 5.000000e-01 : f32
    %140 = vector.broadcast %cst_53 : f32 to vector<16x128xf32>
    %141 = arith.mulf %140, %139 : vector<16x128xf32>
    %142 = vector.extract_strided_slice %133 {offsets = [0, 128], sizes = [16, 128], strides = [1, 1]} : vector<16x512xf32> to vector<16x128xf32>
    %cst_54 = arith.constant 5.000000e-01 : f32
    %143 = vector.broadcast %cst_54 : f32 to vector<16x128xf32>
    %144 = arith.mulf %143, %142 : vector<16x128xf32>
    %145 = math.tanh %144 : vector<16x128xf32>
    %cst_55 = arith.constant 1.000000e+00 : f32
    %146 = vector.broadcast %cst_55 : f32 to vector<16x128xf32>
    %147 = arith.addf %145, %146 : vector<16x128xf32>
    %cst_56 = arith.constant 5.000000e-01 : f32
    %148 = vector.broadcast %cst_56 : f32 to vector<16x128xf32>
    %149 = arith.mulf %148, %147 : vector<16x128xf32>
    %150 = vector.extract_strided_slice %133 {offsets = [0, 256], sizes = [16, 128], strides = [1, 1]} : vector<16x512xf32> to vector<16x128xf32>
    %151 = math.tanh %150 : vector<16x128xf32>
    %152 = vector.extract_strided_slice %133 {offsets = [0, 384], sizes = [16, 128], strides = [1, 1]} : vector<16x512xf32> to vector<16x128xf32>
    %cst_57 = arith.constant 5.000000e-01 : f32
    %153 = vector.broadcast %cst_57 : f32 to vector<16x128xf32>
    %154 = arith.mulf %153, %152 : vector<16x128xf32>
    %155 = math.tanh %154 : vector<16x128xf32>
    %cst_58 = arith.constant 1.000000e+00 : f32
    %156 = vector.broadcast %cst_58 : f32 to vector<16x128xf32>
    %157 = arith.addf %155, %156 : vector<16x128xf32>
    %cst_59 = arith.constant 5.000000e-01 : f32
    %158 = vector.broadcast %cst_59 : f32 to vector<16x128xf32>
    %159 = arith.mulf %158, %157 : vector<16x128xf32>
    %160 = arith.mulf %149, %123 : vector<16x128xf32>
    %161 = arith.mulf %141, %151 : vector<16x128xf32>
    %162 = arith.addf %160, %161 : vector<16x128xf32>
    %163 = math.tanh %162 : vector<16x128xf32>
    %164 = arith.mulf %159, %163 : vector<16x128xf32>
    %165 = arith.truncf %164 : vector<16x128xf32> to vector<16x128xbf16>
    %c3 = arith.constant 3 : index
    %c0_60 = arith.constant 0 : index
    %c0_61 = arith.constant 0 : index
    %166 = vector.load %arg6[%c3, %c0_60, %c0_61] : memref<8x16x128xbf16, #tpu.memory_space<vmem>>, vector<1x16x128xbf16>
    %167 = vector.shape_cast %166 : vector<1x16x128xbf16> to vector<16x128xbf16>
    %168 = vector.shape_cast %165 : vector<16x128xbf16> to vector<1x16x128xbf16>
    tpu.vector_store %arg6[%c3, %c0_60, %c0_61], %168 {strides = array<i32>} : memref<8x16x128xbf16, #tpu.memory_space<vmem>>, vector<1x16x128xbf16>,
    %169 = vector.extract_strided_slice %9 {offsets = [64, 0], sizes = [16, 512], strides = [1, 1]} : vector<128x512xf32> to vector<16x512xf32>
    %170 = arith.truncf %164 : vector<16x128xf32> to vector<16x128xbf16>
    %cst_62 = arith.constant dense<0.000000e+00> : vector<16x512xf32>
    %171 = tpu.matmul %170, %12, %cst_62 {dimension_numbers = #tpu.dot_dimension_numbers<[1], [0], [0], [1], [0, 0, 1, 1], [], []>} : vector<16x128xbf16>, vector<128x512xbf16>, vector<16x512xf32> -> vector<16x512xf32>
    %172 = arith.addf %169, %171 : vector<16x512xf32>
    %173 = vector.extract_strided_slice %172 {offsets = [0, 0], sizes = [16, 128], strides = [1, 1]} : vector<16x512xf32> to vector<16x128xf32>
    %cst_63 = arith.constant 5.000000e-01 : f32
    %174 = vector.broadcast %cst_63 : f32 to vector<16x128xf32>
    %175 = arith.mulf %174, %173 : vector<16x128xf32>
    %176 = math.tanh %175 : vector<16x128xf32>
    %cst_64 = arith.constant 1.000000e+00 : f32
    %177 = vector.broadcast %cst_64 : f32 to vector<16x128xf32>
    %178 = arith.addf %176, %177 : vector<16x128xf32>
    %cst_65 = arith.constant 5.000000e-01 : f32
    %179 = vector.broadcast %cst_65 : f32 to vector<16x128xf32>
    %180 = arith.mulf %179, %178 : vector<16x128xf32>
    %181 = vector.extract_strided_slice %172 {offsets = [0, 128], sizes = [16, 128], strides = [1, 1]} : vector<16x512xf32> to vector<16x128xf32>
    %cst_66 = arith.constant 5.000000e-01 : f32
    %182 = vector.broadcast %cst_66 : f32 to vector<16x128xf32>
    %183 = arith.mulf %182, %181 : vector<16x128xf32>
    %184 = math.tanh %183 : vector<16x128xf32>
    %cst_67 = arith.constant 1.000000e+00 : f32
    %185 = vector.broadcast %cst_67 : f32 to vector<16x128xf32>
    %186 = arith.addf %184, %185 : vector<16x128xf32>
    %cst_68 = arith.constant 5.000000e-01 : f32
    %187 = vector.broadcast %cst_68 : f32 to vector<16x128xf32>
    %188 = arith.mulf %187, %186 : vector<16x128xf32>
    %189 = vector.extract_strided_slice %172 {offsets = [0, 256], sizes = [16, 128], strides = [1, 1]} : vector<16x512xf32> to vector<16x128xf32>
    %190 = math.tanh %189 : vector<16x128xf32>
    %191 = vector.extract_strided_slice %172 {offsets = [0, 384], sizes = [16, 128], strides = [1, 1]} : vector<16x512xf32> to vector<16x128xf32>
    %cst_69 = arith.constant 5.000000e-01 : f32
    %192 = vector.broadcast %cst_69 : f32 to vector<16x128xf32>
    %193 = arith.mulf %192, %191 : vector<16x128xf32>
    %194 = math.tanh %193 : vector<16x128xf32>
    %cst_70 = arith.constant 1.000000e+00 : f32
    %195 = vector.broadcast %cst_70 : f32 to vector<16x128xf32>
    %196 = arith.addf %194, %195 : vector<16x128xf32>
    %cst_71 = arith.constant 5.000000e-01 : f32
    %197 = vector.broadcast %cst_71 : f32 to vector<16x128xf32>
    %198 = arith.mulf %197, %196 : vector<16x128xf32>
    %199 = arith.mulf %188, %162 : vector<16x128xf32>
    %200 = arith.mulf %180, %190 : vector<16x128xf32>
    %201 = arith.addf %199, %200 : vector<16x128xf32>
    %202 = math.tanh %201 : vector<16x128xf32>
    %203 = arith.mulf %198, %202 : vector<16x128xf32>
    %204 = arith.truncf %203 : vector<16x128xf32> to vector<16x128xbf16>
    %c4 = arith.constant 4 : index
    %c0_72 = arith.constant 0 : index
    %c0_73 = arith.constant 0 : index
    %205 = vector.load %arg6[%c4, %c0_72, %c0_73] : memref<8x16x128xbf16, #tpu.memory_space<vmem>>, vector<1x16x128xbf16>
    %206 = vector.shape_cast %205 : vector<1x16x128xbf16> to vector<16x128xbf16>
    %207 = vector.shape_cast %204 : vector<16x128xbf16> to vector<1x16x128xbf16>
    tpu.vector_store %arg6[%c4, %c0_72, %c0_73], %207 {strides = array<i32>} : memref<8x16x128xbf16, #tpu.memory_space<vmem>>, vector<1x16x128xbf16>,
    %208 = vector.extract_strided_slice %9 {offsets = [80, 0], sizes = [16, 512], strides = [1, 1]} : vector<128x512xf32> to vector<16x512xf32>
    %209 = arith.truncf %203 : vector<16x128xf32> to vector<16x128xbf16>
    %cst_74 = arith.constant dense<0.000000e+00> : vector<16x512xf32>
    %210 = tpu.matmul %209, %12, %cst_74 {dimension_numbers = #tpu.dot_dimension_numbers<[1], [0], [0], [1], [0, 0, 1, 1], [], []>} : vector<16x128xbf16>, vector<128x512xbf16>, vector<16x512xf32> -> vector<16x512xf32>
    %211 = arith.addf %208, %210 : vector<16x512xf32>
    %212 = vector.extract_strided_slice %211 {offsets = [0, 0], sizes = [16, 128], strides = [1, 1]} : vector<16x512xf32> to vector<16x128xf32>
    %cst_75 = arith.constant 5.000000e-01 : f32
    %213 = vector.broadcast %cst_75 : f32 to vector<16x128xf32>
    %214 = arith.mulf %213, %212 : vector<16x128xf32>
    %215 = math.tanh %214 : vector<16x128xf32>
    %cst_76 = arith.constant 1.000000e+00 : f32
    %216 = vector.broadcast %cst_76 : f32 to vector<16x128xf32>
    %217 = arith.addf %215, %216 : vector<16x128xf32>
    %cst_77 = arith.constant 5.000000e-01 : f32
    %218 = vector.broadcast %cst_77 : f32 to vector<16x128xf32>
    %219 = arith.mulf %218, %217 : vector<16x128xf32>
    %220 = vector.extract_strided_slice %211 {offsets = [0, 128], sizes = [16, 128], strides = [1, 1]} : vector<16x512xf32> to vector<16x128xf32>
    %cst_78 = arith.constant 5.000000e-01 : f32
    %221 = vector.broadcast %cst_78 : f32 to vector<16x128xf32>
    %222 = arith.mulf %221, %220 : vector<16x128xf32>
    %223 = math.tanh %222 : vector<16x128xf32>
    %cst_79 = arith.constant 1.000000e+00 : f32
    %224 = vector.broadcast %cst_79 : f32 to vector<16x128xf32>
    %225 = arith.addf %223, %224 : vector<16x128xf32>
    %cst_80 = arith.constant 5.000000e-01 : f32
    %226 = vector.broadcast %cst_80 : f32 to vector<16x128xf32>
    %227 = arith.mulf %226, %225 : vector<16x128xf32>
    %228 = vector.extract_strided_slice %211 {offsets = [0, 256], sizes = [16, 128], strides = [1, 1]} : vector<16x512xf32> to vector<16x128xf32>
    %229 = math.tanh %228 : vector<16x128xf32>
    %230 = vector.extract_strided_slice %211 {offsets = [0, 384], sizes = [16, 128], strides = [1, 1]} : vector<16x512xf32> to vector<16x128xf32>
    %cst_81 = arith.constant 5.000000e-01 : f32
    %231 = vector.broadcast %cst_81 : f32 to vector<16x128xf32>
    %232 = arith.mulf %231, %230 : vector<16x128xf32>
    %233 = math.tanh %232 : vector<16x128xf32>
    %cst_82 = arith.constant 1.000000e+00 : f32
    %234 = vector.broadcast %cst_82 : f32 to vector<16x128xf32>
    %235 = arith.addf %233, %234 : vector<16x128xf32>
    %cst_83 = arith.constant 5.000000e-01 : f32
    %236 = vector.broadcast %cst_83 : f32 to vector<16x128xf32>
    %237 = arith.mulf %236, %235 : vector<16x128xf32>
    %238 = arith.mulf %227, %201 : vector<16x128xf32>
    %239 = arith.mulf %219, %229 : vector<16x128xf32>
    %240 = arith.addf %238, %239 : vector<16x128xf32>
    %241 = math.tanh %240 : vector<16x128xf32>
    %242 = arith.mulf %237, %241 : vector<16x128xf32>
    %243 = arith.truncf %242 : vector<16x128xf32> to vector<16x128xbf16>
    %c5 = arith.constant 5 : index
    %c0_84 = arith.constant 0 : index
    %c0_85 = arith.constant 0 : index
    %244 = vector.load %arg6[%c5, %c0_84, %c0_85] : memref<8x16x128xbf16, #tpu.memory_space<vmem>>, vector<1x16x128xbf16>
    %245 = vector.shape_cast %244 : vector<1x16x128xbf16> to vector<16x128xbf16>
    %246 = vector.shape_cast %243 : vector<16x128xbf16> to vector<1x16x128xbf16>
    tpu.vector_store %arg6[%c5, %c0_84, %c0_85], %246 {strides = array<i32>} : memref<8x16x128xbf16, #tpu.memory_space<vmem>>, vector<1x16x128xbf16>,
    %247 = vector.extract_strided_slice %9 {offsets = [96, 0], sizes = [16, 512], strides = [1, 1]} : vector<128x512xf32> to vector<16x512xf32>
    %248 = arith.truncf %242 : vector<16x128xf32> to vector<16x128xbf16>
    %cst_86 = arith.constant dense<0.000000e+00> : vector<16x512xf32>
    %249 = tpu.matmul %248, %12, %cst_86 {dimension_numbers = #tpu.dot_dimension_numbers<[1], [0], [0], [1], [0, 0, 1, 1], [], []>} : vector<16x128xbf16>, vector<128x512xbf16>, vector<16x512xf32> -> vector<16x512xf32>
    %250 = arith.addf %247, %249 : vector<16x512xf32>
    %251 = vector.extract_strided_slice %250 {offsets = [0, 0], sizes = [16, 128], strides = [1, 1]} : vector<16x512xf32> to vector<16x128xf32>
    %cst_87 = arith.constant 5.000000e-01 : f32
    %252 = vector.broadcast %cst_87 : f32 to vector<16x128xf32>
    %253 = arith.mulf %252, %251 : vector<16x128xf32>
    %254 = math.tanh %253 : vector<16x128xf32>
    %cst_88 = arith.constant 1.000000e+00 : f32
    %255 = vector.broadcast %cst_88 : f32 to vector<16x128xf32>
    %256 = arith.addf %254, %255 : vector<16x128xf32>
    %cst_89 = arith.constant 5.000000e-01 : f32
    %257 = vector.broadcast %cst_89 : f32 to vector<16x128xf32>
    %258 = arith.mulf %257, %256 : vector<16x128xf32>
    %259 = vector.extract_strided_slice %250 {offsets = [0, 128], sizes = [16, 128], strides = [1, 1]} : vector<16x512xf32> to vector<16x128xf32>
    %cst_90 = arith.constant 5.000000e-01 : f32
    %260 = vector.broadcast %cst_90 : f32 to vector<16x128xf32>
    %261 = arith.mulf %260, %259 : vector<16x128xf32>
    %262 = math.tanh %261 : vector<16x128xf32>
    %cst_91 = arith.constant 1.000000e+00 : f32
    %263 = vector.broadcast %cst_91 : f32 to vector<16x128xf32>
    %264 = arith.addf %262, %263 : vector<16x128xf32>
    %cst_92 = arith.constant 5.000000e-01 : f32
    %265 = vector.broadcast %cst_92 : f32 to vector<16x128xf32>
    %266 = arith.mulf %265, %264 : vector<16x128xf32>
    %267 = vector.extract_strided_slice %250 {offsets = [0, 256], sizes = [16, 128], strides = [1, 1]} : vector<16x512xf32> to vector<16x128xf32>
    %268 = math.tanh %267 : vector<16x128xf32>
    %269 = vector.extract_strided_slice %250 {offsets = [0, 384], sizes = [16, 128], strides = [1, 1]} : vector<16x512xf32> to vector<16x128xf32>
    %cst_93 = arith.constant 5.000000e-01 : f32
    %270 = vector.broadcast %cst_93 : f32 to vector<16x128xf32>
    %271 = arith.mulf %270, %269 : vector<16x128xf32>
    %272 = math.tanh %271 : vector<16x128xf32>
    %cst_94 = arith.constant 1.000000e+00 : f32
    %273 = vector.broadcast %cst_94 : f32 to vector<16x128xf32>
    %274 = arith.addf %272, %273 : vector<16x128xf32>
    %cst_95 = arith.constant 5.000000e-01 : f32
    %275 = vector.broadcast %cst_95 : f32 to vector<16x128xf32>
    %276 = arith.mulf %275, %274 : vector<16x128xf32>
    %277 = arith.mulf %266, %240 : vector<16x128xf32>
    %278 = arith.mulf %258, %268 : vector<16x128xf32>
    %279 = arith.addf %277, %278 : vector<16x128xf32>
    %280 = math.tanh %279 : vector<16x128xf32>
    %281 = arith.mulf %276, %280 : vector<16x128xf32>
    %282 = arith.truncf %281 : vector<16x128xf32> to vector<16x128xbf16>
    %c6 = arith.constant 6 : index
    %c0_96 = arith.constant 0 : index
    %c0_97 = arith.constant 0 : index
    %283 = vector.load %arg6[%c6, %c0_96, %c0_97] : memref<8x16x128xbf16, #tpu.memory_space<vmem>>, vector<1x16x128xbf16>
    %284 = vector.shape_cast %283 : vector<1x16x128xbf16> to vector<16x128xbf16>
    %285 = vector.shape_cast %282 : vector<16x128xbf16> to vector<1x16x128xbf16>
    tpu.vector_store %arg6[%c6, %c0_96, %c0_97], %285 {strides = array<i32>} : memref<8x16x128xbf16, #tpu.memory_space<vmem>>, vector<1x16x128xbf16>,
    %286 = vector.extract_strided_slice %9 {offsets = [112, 0], sizes = [16, 512], strides = [1, 1]} : vector<128x512xf32> to vector<16x512xf32>
    %287 = arith.truncf %281 : vector<16x128xf32> to vector<16x128xbf16>
    %cst_98 = arith.constant dense<0.000000e+00> : vector<16x512xf32>
    %288 = tpu.matmul %287, %12, %cst_98 {dimension_numbers = #tpu.dot_dimension_numbers<[1], [0], [0], [1], [0, 0, 1, 1], [], []>} : vector<16x128xbf16>, vector<128x512xbf16>, vector<16x512xf32> -> vector<16x512xf32>
    %289 = arith.addf %286, %288 : vector<16x512xf32>
    %290 = vector.extract_strided_slice %289 {offsets = [0, 0], sizes = [16, 128], strides = [1, 1]} : vector<16x512xf32> to vector<16x128xf32>
    %cst_99 = arith.constant 5.000000e-01 : f32
    %291 = vector.broadcast %cst_99 : f32 to vector<16x128xf32>
    %292 = arith.mulf %291, %290 : vector<16x128xf32>
    %293 = math.tanh %292 : vector<16x128xf32>
    %cst_100 = arith.constant 1.000000e+00 : f32
    %294 = vector.broadcast %cst_100 : f32 to vector<16x128xf32>
    %295 = arith.addf %293, %294 : vector<16x128xf32>
    %cst_101 = arith.constant 5.000000e-01 : f32
    %296 = vector.broadcast %cst_101 : f32 to vector<16x128xf32>
    %297 = arith.mulf %296, %295 : vector<16x128xf32>
    %298 = vector.extract_strided_slice %289 {offsets = [0, 128], sizes = [16, 128], strides = [1, 1]} : vector<16x512xf32> to vector<16x128xf32>
    %cst_102 = arith.constant 5.000000e-01 : f32
    %299 = vector.broadcast %cst_102 : f32 to vector<16x128xf32>
    %300 = arith.mulf %299, %298 : vector<16x128xf32>
    %301 = math.tanh %300 : vector<16x128xf32>
    %cst_103 = arith.constant 1.000000e+00 : f32
    %302 = vector.broadcast %cst_103 : f32 to vector<16x128xf32>
    %303 = arith.addf %301, %302 : vector<16x128xf32>
    %cst_104 = arith.constant 5.000000e-01 : f32
    %304 = vector.broadcast %cst_104 : f32 to vector<16x128xf32>
    %305 = arith.mulf %304, %303 : vector<16x128xf32>
    %306 = vector.extract_strided_slice %289 {offsets = [0, 256], sizes = [16, 128], strides = [1, 1]} : vector<16x512xf32> to vector<16x128xf32>
    %307 = math.tanh %306 : vector<16x128xf32>
    %308 = vector.extract_strided_slice %289 {offsets = [0, 384], sizes = [16, 128], strides = [1, 1]} : vector<16x512xf32> to vector<16x128xf32>
    %cst_105 = arith.constant 5.000000e-01 : f32
    %309 = vector.broadcast %cst_105 : f32 to vector<16x128xf32>
    %310 = arith.mulf %309, %308 : vector<16x128xf32>
    %311 = math.tanh %310 : vector<16x128xf32>
    %cst_106 = arith.constant 1.000000e+00 : f32
    %312 = vector.broadcast %cst_106 : f32 to vector<16x128xf32>
    %313 = arith.addf %311, %312 : vector<16x128xf32>
    %cst_107 = arith.constant 5.000000e-01 : f32
    %314 = vector.broadcast %cst_107 : f32 to vector<16x128xf32>
    %315 = arith.mulf %314, %313 : vector<16x128xf32>
    %316 = arith.mulf %305, %279 : vector<16x128xf32>
    %317 = arith.mulf %297, %307 : vector<16x128xf32>
    %318 = arith.addf %316, %317 : vector<16x128xf32>
    %319 = math.tanh %318 : vector<16x128xf32>
    %320 = arith.mulf %315, %319 : vector<16x128xf32>
    %321 = arith.truncf %320 : vector<16x128xf32> to vector<16x128xbf16>
    %c7 = arith.constant 7 : index
    %c0_108 = arith.constant 0 : index
    %c0_109 = arith.constant 0 : index
    %322 = vector.load %arg6[%c7, %c0_108, %c0_109] : memref<8x16x128xbf16, #tpu.memory_space<vmem>>, vector<1x16x128xbf16>
    %323 = vector.shape_cast %322 : vector<1x16x128xbf16> to vector<16x128xbf16>
    %324 = vector.shape_cast %321 : vector<16x128xbf16> to vector<1x16x128xbf16>
    tpu.vector_store %arg6[%c7, %c0_108, %c0_109], %324 {strides = array<i32>} : memref<8x16x128xbf16, #tpu.memory_space<vmem>>, vector<1x16x128xbf16>,
    %c0_110 = arith.constant 0 : index
    %c0_111 = arith.constant 0 : index
    %325 = vector.load %arg9[%c0_110, %c0_111] : memref<16x128xf32, #tpu.memory_space<vmem>>, vector<16x128xf32>
    tpu.vector_store %arg9[%c0_110, %c0_111], %320 {strides = array<i32>} : memref<16x128xf32, #tpu.memory_space<vmem>>, vector<16x128xf32>,
    %c0_112 = arith.constant 0 : index
    %c0_113 = arith.constant 0 : index
    %326 = vector.load %arg10[%c0_112, %c0_113] : memref<16x128xf32, #tpu.memory_space<vmem>>, vector<16x128xf32>
    tpu.vector_store %arg10[%c0_112, %c0_113], %318 {strides = array<i32>} : memref<16x128xf32, #tpu.memory_space<vmem>>, vector<16x128xf32>,
    %c0_i32_114 = arith.constant 0 : i32
    %327 = arith.cmpi eq, %arg1, %c0_i32_114 : i32
    %328 = arith.extui %327 : i1 to i32
    %c0_i32_115 = arith.constant 0 : i32
    %329 = arith.cmpi ne, %328, %c0_i32_115 : i32
    scf.if %329 {
      %c0_116 = arith.constant 0 : index
      %c0_117 = arith.constant 0 : index
      %330 = vector.load %arg7[%c0_116, %c0_117] : memref<16x128xf32, #tpu.memory_space<vmem>>, vector<16x128xf32>
      tpu.vector_store %arg7[%c0_116, %c0_117], %320 {strides = array<i32>} : memref<16x128xf32, #tpu.memory_space<vmem>>, vector<16x128xf32>,
      %c0_118 = arith.constant 0 : index
      %c0_119 = arith.constant 0 : index
      %331 = vector.load %arg8[%c0_118, %c0_119] : memref<16x128xf32, #tpu.memory_space<vmem>>, vector<16x128xf32>
      tpu.vector_store %arg8[%c0_118, %c0_119], %318 {strides = array<i32>} : memref<16x128xf32, #tpu.memory_space<vmem>>, vector<16x128xf32>,
    } else {
    }
    return
  }
  func.func @transform_0(%arg0: i32, %arg1: i32) -> (i32, i32, i32) {
    %c0_i32 = arith.constant 0 : i32
    %c0_i32_0 = arith.constant 0 : i32
    return %arg1, %arg0, %c0_i32 : i32, i32, i32
  }
  func.func @transform_1(%arg0: i32, %arg1: i32) -> (i32, i32) {
    %c0_i32 = arith.constant 0 : i32
    %c0_i32_0 = arith.constant 0 : i32
    %c0_i32_1 = arith.constant 0 : i32
    return %c0_i32, %c0_i32_0 : i32, i32
  }
  func.func @transform_4(%arg0: i32, %arg1: i32) -> (i32, i32, i32) {
    %c0_i32 = arith.constant 0 : i32
    %c0_i32_0 = arith.constant 0 : i32
    return %arg1, %arg0, %c0_i32 : i32, i32, i32
  }
  func.func @transform_5(%arg0: i32, %arg1: i32) -> (i32, i32) {
    %c0_i32 = arith.constant 0 : i32
    %c0_i32_0 = arith.constant 0 : i32
    return %arg0, %c0_i32 : i32, i32
  }
  func.func @transform_6(%arg0: i32, %arg1: i32) -> (i32, i32) {
    %c0_i32 = arith.constant 0 : i32
    %c0_i32_0 = arith.constant 0 : i32
    return %arg0, %c0_i32 : i32, i32
  }
}

module attributes {stable_mosaic.version = 11 : i64} {
  func.func @_matmul_kernel(%arg0: i32, %arg1: i32, %arg2: i32, %arg3: memref<128x128xbf16, #tpu.memory_space<vmem>>, %arg4: memref<128x128xbf16, #tpu.memory_space<vmem>>, %arg5: memref<1x128xf32, #tpu.memory_space<vmem>>, %arg6: memref<128x128xf32, #tpu.memory_space<vmem>>, %arg7: memref<128x128xf32, #tpu.memory_space<vmem>>) attributes {dimension_semantics = [#tpu.dimension_semantics<parallel>, #tpu.dimension_semantics<parallel>, #tpu.dimension_semantics<arbitrary>], iteration_bounds = array<i64: 1, 1, 1>, scalar_prefetch = 0 : i64, scratch_operands = 1 : i64, tpu.core_type = #tpu.core_type<tc>, window_params = [{transform_indices = @transform_0, window_bounds = array<i64: 128, 128>}, {transform_indices = @transform_1, window_bounds = array<i64: 128, 128>}, {transform_indices = @transform_2, window_bounds = array<i64: 1, 128>}, {transform_indices = @transform_3, window_bounds = array<i64: 128, 128>}]} {
    %c0_i32 = arith.constant 0 : i32
    %0 = arith.cmpi eq, %arg2, %c0_i32 : i32
    %1 = arith.extui %0 : i1 to i32
    %c0_i32_0 = arith.constant 0 : i32
    %2 = arith.cmpi ne, %1, %c0_i32_0 : i32
    scf.if %2 {
      %cst_10 = arith.constant 0.000000e+00 : f32
      %12 = vector.broadcast %cst_10 : f32 to vector<128x128xf32>
      %c0_11 = arith.constant 0 : index
      %c0_12 = arith.constant 0 : index
      %13 = vector.load %arg7[%c0_11, %c0_12] : memref<128x128xf32, #tpu.memory_space<vmem>>, vector<128x128xf32>
      tpu.vector_store %arg7[%c0_11, %c0_12], %12 {strides = array<i32>} : memref<128x128xf32, #tpu.memory_space<vmem>>, vector<128x128xf32>,
    } else {
    }
    %c0 = arith.constant 0 : index
    %c0_1 = arith.constant 0 : index
    %3 = vector.load %arg7[%c0, %c0_1] : memref<128x128xf32, #tpu.memory_space<vmem>>, vector<128x128xf32>
    %c0_2 = arith.constant 0 : index
    %c0_3 = arith.constant 0 : index
    %4 = vector.load %arg3[%c0_2, %c0_3] : memref<128x128xbf16, #tpu.memory_space<vmem>>, vector<128x128xbf16>
    %c0_4 = arith.constant 0 : index
    %c0_5 = arith.constant 0 : index
    %5 = vector.load %arg4[%c0_4, %c0_5] : memref<128x128xbf16, #tpu.memory_space<vmem>>, vector<128x128xbf16>
    %cst = arith.constant dense<0.000000e+00> : vector<128x128xf32>
    %6 = tpu.matmul %4, %5, %cst {dimension_numbers = #tpu.dot_dimension_numbers<[1], [0], [0], [1], [0, 0, 1, 1], [], []>} : vector<128x128xbf16>, vector<128x128xbf16>, vector<128x128xf32> -> vector<128x128xf32>
    %7 = arith.addf %3, %6 : vector<128x128xf32>
    %c0_6 = arith.constant 0 : index
    %c0_7 = arith.constant 0 : index
    %8 = vector.load %arg7[%c0_6, %c0_7] : memref<128x128xf32, #tpu.memory_space<vmem>>, vector<128x128xf32>
    tpu.vector_store %arg7[%c0_6, %c0_7], %7 {strides = array<i32>} : memref<128x128xf32, #tpu.memory_space<vmem>>, vector<128x128xf32>,
    %c0_i32_8 = arith.constant 0 : i32
    %9 = arith.cmpi eq, %arg2, %c0_i32_8 : i32
    %10 = arith.extui %9 : i1 to i32
    %c0_i32_9 = arith.constant 0 : i32
    %11 = arith.cmpi ne, %10, %c0_i32_9 : i32
    scf.if %11 {
      %c0_10 = arith.constant 0 : index
      %c0_11 = arith.constant 0 : index
      %12 = vector.load %arg7[%c0_10, %c0_11] : memref<128x128xf32, #tpu.memory_space<vmem>>, vector<128x128xf32>
      %c0_12 = arith.constant 0 : index
      %c0_13 = arith.constant 0 : index
      %13 = vector.load %arg5[%c0_12, %c0_13] : memref<1x128xf32, #tpu.memory_space<vmem>>, vector<1x128xf32>
      %14 = vector.broadcast %13 : vector<1x128xf32> to vector<128x128xf32>
      %15 = arith.addf %12, %14 : vector<128x128xf32>
      %c0_14 = arith.constant 0 : index
      %c0_15 = arith.constant 0 : index
      %16 = vector.load %arg6[%c0_14, %c0_15] : memref<128x128xf32, #tpu.memory_space<vmem>>, vector<128x128xf32>
      tpu.vector_store %arg6[%c0_14, %c0_15], %15 {strides = array<i32>} : memref<128x128xf32, #tpu.memory_space<vmem>>, vector<128x128xf32>,
    } else {
    }
    return
  }
  func.func @transform_0(%arg0: i32, %arg1: i32, %arg2: i32) -> (i32, i32) {
    %c0_i32 = arith.constant 0 : i32
    return %arg0, %arg2 : i32, i32
  }
  func.func @transform_1(%arg0: i32, %arg1: i32, %arg2: i32) -> (i32, i32) {
    %c0_i32 = arith.constant 0 : i32
    return %arg2, %arg1 : i32, i32
  }
  func.func @transform_2(%arg0: i32, %arg1: i32, %arg2: i32) -> (i32, i32) {
    %c0_i32 = arith.constant 0 : i32
    %c0_i32_0 = arith.constant 0 : i32
    return %c0_i32, %arg1 : i32, i32
  }
  func.func @transform_3(%arg0: i32, %arg1: i32, %arg2: i32) -> (i32, i32) {
    %c0_i32 = arith.constant 0 : i32
    return %arg0, %arg1 : i32, i32
  }
}

module attributes {stable_mosaic.version = 11 : i64} {
  func.func @_lstm_layer_kernel(%arg0: i32, %arg1: i32, %arg2: memref<8x16x128xbf16, #tpu.memory_space<vmem>>, %arg3: memref<1x512xf32, #tpu.memory_space<vmem>>, %arg4: memref<128x512xbf16, #tpu.memory_space<any>>, %arg5: memref<128x512xbf16, #tpu.memory_space<any>>, %arg6: memref<8x16x128xbf16, #tpu.memory_space<vmem>>, %arg7: memref<16x128xf32, #tpu.memory_space<vmem>>, %arg8: memref<16x128xf32, #tpu.memory_space<vmem>>, %arg9: memref<16x128xf32, #tpu.memory_space<vmem>>, %arg10: memref<16x128xf32, #tpu.memory_space<vmem>>, %arg11: memref<128x512xbf16, #tpu.memory_space<vmem>>, %arg12: memref<128x512xbf16, #tpu.memory_space<vmem>>, %arg13: memref<2x!tpu.dma_semaphore, #tpu.memory_space<semaphore_mem>>) attributes {dimension_semantics = [#tpu.dimension_semantics<parallel>, #tpu.dimension_semantics<arbitrary>], iteration_bounds = array<i64: 1, 1>, scalar_prefetch = 0 : i64, scratch_operands = 5 : i64, tpu.core_type = #tpu.core_type<tc>, window_params = [{transform_indices = @transform_0, window_bounds = array<i64: 8, 16, 128>}, {pipeline_mode = #tpu.pipeline_mode<synchronous>, transform_indices = @transform_1, window_bounds = array<i64: 1, 512>}, {}, {}, {transform_indices = @transform_4, window_bounds = array<i64: 8, 16, 128>}, {transform_indices = @transform_5, window_bounds = array<i64: 16, 128>}, {transform_indices = @transform_6, window_bounds = array<i64: 16, 128>}]} {
    %c0_i32 = arith.constant 0 : i32
    %0 = arith.cmpi eq, %arg1, %c0_i32 : i32
    %1 = arith.extui %0 : i1 to i32
    %c0_i32_0 = arith.constant 0 : i32
    %2 = arith.cmpi ne, %1, %c0_i32_0 : i32
    scf.if %2 {
      %c0_i32_116 = arith.constant 0 : i32
      %330 = tpu.memref_slice %arg13[%c0_i32_116] : memref<2x!tpu.dma_semaphore, #tpu.memory_space<semaphore_mem>> -> memref<1x!tpu.dma_semaphore, #tpu.memory_space<semaphore_mem>>
      %331 = tpu.memref_squeeze %330 : memref<1x!tpu.dma_semaphore, #tpu.memory_space<semaphore_mem>> -> memref<!tpu.dma_semaphore, #tpu.memory_space<semaphore_mem>>
      tpu.enqueue_dma source(%arg4 : memref<128x512xbf16, #tpu.memory_space<any>>) target(%arg11 : memref<128x512xbf16, #tpu.memory_space<vmem>>) target_semaphore(%331 : memref<!tpu.dma_semaphore, #tpu.memory_space<semaphore_mem>>)
      %c1_i32 = arith.constant 1 : i32
      %332 = tpu.memref_slice %arg13[%c1_i32] : memref<2x!tpu.dma_semaphore, #tpu.memory_space<semaphore_mem>> -> memref<1x!tpu.dma_semaphore, #tpu.memory_space<semaphore_mem>>
      %333 = tpu.memref_squeeze %332 : memref<1x!tpu.dma_semaphore, #tpu.memory_space<semaphore_mem>> -> memref<!tpu.dma_semaphore, #tpu.memory_space<semaphore_mem>>
      tpu.enqueue_dma source(%arg5 : memref<128x512xbf16, #tpu.memory_space<any>>) target(%arg12 : memref<128x512xbf16, #tpu.memory_space<vmem>>) target_semaphore(%333 : memref<!tpu.dma_semaphore, #tpu.memory_space<semaphore_mem>>)
      %c0_i32_117 = arith.constant 0 : i32
      %334 = tpu.memref_slice %arg13[%c0_i32_117] : memref<2x!tpu.dma_semaphore, #tpu.memory_space<semaphore_mem>> -> memref<1x!tpu.dma_semaphore, #tpu.memory_space<semaphore_mem>>
      %335 = tpu.memref_squeeze %334 : memref<1x!tpu.dma_semaphore, #tpu.memory_space<semaphore_mem>> -> memref<!tpu.dma_semaphore, #tpu.memory_space<semaphore_mem>>
      tpu.wait_dma2 semaphore(%335 : memref<!tpu.dma_semaphore, #tpu.memory_space<semaphore_mem>>) src(%arg4 : memref<128x512xbf16, #tpu.memory_space<any>>) dst(%arg11 : memref<128x512xbf16, #tpu.memory_space<vmem>>)
      %c1_i32_118 = arith.constant 1 : i32
      %336 = tpu.memref_slice %arg13[%c1_i32_118] : memref<2x!tpu.dma_semaphore, #tpu.memory_space<semaphore_mem>> -> memref<1x!tpu.dma_semaphore, #tpu.memory_space<semaphore_mem>>
      %337 = tpu.memref_squeeze %336 : memref<1x!tpu.dma_semaphore, #tpu.memory_space<semaphore_mem>> -> memref<!tpu.dma_semaphore, #tpu.memory_space<semaphore_mem>>
      tpu.wait_dma2 semaphore(%337 : memref<!tpu.dma_semaphore, #tpu.memory_space<semaphore_mem>>) src(%arg5 : memref<128x512xbf16, #tpu.memory_space<any>>) dst(%arg12 : memref<128x512xbf16, #tpu.memory_space<vmem>>)
      %cst_119 = arith.constant 0.000000e+00 : f32
      %338 = vector.broadcast %cst_119 : f32 to vector<16x128xf32>
      %c0_120 = arith.constant 0 : index
      %c0_121 = arith.constant 0 : index
      %339 = vector.load %arg9[%c0_120, %c0_121] : memref<16x128xf32, #tpu.memory_space<vmem>>, vector<16x128xf32>
      tpu.vector_store %arg9[%c0_120, %c0_121], %338 {strides = array<i32>} : memref<16x128xf32, #tpu.memory_space<vmem>>, vector<16x128xf32>,
      %cst_122 = arith.constant 0.000000e+00 : f32
      %340 = vector.broadcast %cst_122 : f32 to vector<16x128xf32>
      %c0_123 = arith.constant 0 : index
      %c0_124 = arith.constant 0 : index
      %341 = vector.load %arg10[%c0_123, %c0_124] : memref<16x128xf32, #tpu.memory_space<vmem>>, vector<16x128xf32>
      tpu.vector_store %arg10[%c0_123, %c0_124], %340 {strides = array<i32>} : memref<16x128xf32, #tpu.memory_space<vmem>>, vector<16x128xf32>,
    } else {
    }
    %c0 = arith.constant 0 : index
    %c0_1 = arith.constant 0 : index
    %c0_2 = arith.constant 0 : index
    %3 = vector.load %arg2[%c0, %c0_1, %c0_2] : memref<8x16x128xbf16, #tpu.memory_space<vmem>>, vector<8x16x128xbf16>
    %4 = vector.shape_cast %3 : vector<8x16x128xbf16> to vector<128x128xbf16>
    %c0_3 = arith.constant 0 : index
    %c0_4 = arith.constant 0 : index
    %5 = vector.load %arg11[%c0_3, %c0_4] : memref<128x512xbf16, #tpu.memory_space<vmem>>, vector<128x512xbf16>
    %cst = arith.constant dense<0.000000e+00> : vector<128x512xf32>
    %6 = tpu.matmul %4, %5, %cst {dimension_numbers = #tpu.dot_dimension_numbers<[1], [0], [0], [1], [0, 0, 1, 1], [], []>} : vector<128x128xbf16>, vector<128x512xbf16>, vector<128x512xf32> -> vector<128x512xf32>
    %c0_5 = arith.constant 0 : index
    %c0_6 = arith.constant 0 : index
    %7 = vector.load %arg3[%c0_5, %c0_6] : memref<1x512xf32, #tpu.memory_space<vmem>>, vector<1x512xf32>
    %8 = vector.broadcast %7 : vector<1x512xf32> to vector<128x512xf32>
    %9 = arith.addf %6, %8 : vector<128x512xf32>
    %c0_7 = arith.constant 0 : index
    %c0_8 = arith.constant 0 : index
    %10 = vector.load %arg9[%c0_7, %c0_8] : memref<16x128xf32, #tpu.memory_space<vmem>>, vector<16x128xf32>
    %c0_9 = arith.constant 0 : index
    %c0_10 = arith.constant 0 : index
    %11 = vector.load %arg10[%c0_9, %c0_10] : memref<16x128xf32, #tpu.memory_space<vmem>>, vector<16x128xf32>
    %c0_11 = arith.constant 0 : index
    %c0_12 = arith.constant 0 : index
    %12 = vector.load %arg12[%c0_11, %c0_12] : memref<128x512xbf16, #tpu.memory_space<vmem>>, vector<128x512xbf16>
    %13 = vector.extract_strided_slice %9 {offsets = [0, 0], sizes = [16, 512], strides = [1, 1]} : vector<128x512xf32> to vector<16x512xf32>
    %14 = arith.truncf %10 : vector<16x128xf32> to vector<16x128xbf16>
    %cst_13 = arith.constant dense<0.000000e+00> : vector<16x512xf32>
    %15 = tpu.matmul %14, %12, %cst_13 {dimension_numbers = #tpu.dot_dimension_numbers<[1], [0], [0], [1], [0, 0, 1, 1], [], []>} : vector<16x128xbf16>, vector<128x512xbf16>, vector<16x512xf32> -> vector<16x512xf32>
    %16 = arith.addf %13, %15 : vector<16x512xf32>
    %17 = vector.extract_strided_slice %16 {offsets = [0, 0], sizes = [16, 128], strides = [1, 1]} : vector<16x512xf32> to vector<16x128xf32>
    %cst_14 = arith.constant 5.000000e-01 : f32
    %18 = vector.broadcast %cst_14 : f32 to vector<16x128xf32>
    %19 = arith.mulf %18, %17 : vector<16x128xf32>
    %20 = math.tanh %19 : vector<16x128xf32>
    %cst_15 = arith.constant 1.000000e+00 : f32
    %21 = vector.broadcast %cst_15 : f32 to vector<16x128xf32>
    %22 = arith.addf %20, %21 : vector<16x128xf32>
    %cst_16 = arith.constant 5.000000e-01 : f32
    %23 = vector.broadcast %cst_16 : f32 to vector<16x128xf32>
    %24 = arith.mulf %23, %22 : vector<16x128xf32>
    %25 = vector.extract_strided_slice %16 {offsets = [0, 128], sizes = [16, 128], strides = [1, 1]} : vector<16x512xf32> to vector<16x128xf32>
    %cst_17 = arith.constant 5.000000e-01 : f32
    %26 = vector.broadcast %cst_17 : f32 to vector<16x128xf32>
    %27 = arith.mulf %26, %25 : vector<16x128xf32>
    %28 = math.tanh %27 : vector<16x128xf32>
    %cst_18 = arith.constant 1.000000e+00 : f32
    %29 = vector.broadcast %cst_18 : f32 to vector<16x128xf32>
    %30 = arith.addf %28, %29 : vector<16x128xf32>
    %cst_19 = arith.constant 5.000000e-01 : f32
    %31 = vector.broadcast %cst_19 : f32 to vector<16x128xf32>
    %32 = arith.mulf %31, %30 : vector<16x128xf32>
    %33 = vector.extract_strided_slice %16 {offsets = [0, 256], sizes = [16, 128], strides = [1, 1]} : vector<16x512xf32> to vector<16x128xf32>
    %34 = math.tanh %33 : vector<16x128xf32>
    %35 = vector.extract_strided_slice %16 {offsets = [0, 384], sizes = [16, 128], strides = [1, 1]} : vector<16x512xf32> to vector<16x128xf32>
    %cst_20 = arith.constant 5.000000e-01 : f32
    %36 = vector.broadcast %cst_20 : f32 to vector<16x128xf32>
    %37 = arith.mulf %36, %35 : vector<16x128xf32>
    %38 = math.tanh %37 : vector<16x128xf32>
    %cst_21 = arith.constant 1.000000e+00 : f32
    %39 = vector.broadcast %cst_21 : f32 to vector<16x128xf32>
    %40 = arith.addf %38, %39 : vector<16x128xf32>
    %cst_22 = arith.constant 5.000000e-01 : f32
    %41 = vector.broadcast %cst_22 : f32 to vector<16x128xf32>
    %42 = arith.mulf %41, %40 : vector<16x128xf32>
    %43 = arith.mulf %32, %11 : vector<16x128xf32>
    %44 = arith.mulf %24, %34 : vector<16x128xf32>
    %45 = arith.addf %43, %44 : vector<16x128xf32>
    %46 = math.tanh %45 : vector<16x128xf32>
    %47 = arith.mulf %42, %46 : vector<16x128xf32>
    %48 = arith.truncf %47 : vector<16x128xf32> to vector<16x128xbf16>
    %c0_23 = arith.constant 0 : index
    %c0_24 = arith.constant 0 : index
    %c0_25 = arith.constant 0 : index
    %49 = vector.load %arg6[%c0_23, %c0_24, %c0_25] : memref<8x16x128xbf16, #tpu.memory_space<vmem>>, vector<1x16x128xbf16>
    %50 = vector.shape_cast %49 : vector<1x16x128xbf16> to vector<16x128xbf16>
    %51 = vector.shape_cast %48 : vector<16x128xbf16> to vector<1x16x128xbf16>
    tpu.vector_store %arg6[%c0_23, %c0_24, %c0_25], %51 {strides = array<i32>} : memref<8x16x128xbf16, #tpu.memory_space<vmem>>, vector<1x16x128xbf16>,
    %52 = vector.extract_strided_slice %9 {offsets = [16, 0], sizes = [16, 512], strides = [1, 1]} : vector<128x512xf32> to vector<16x512xf32>
    %53 = arith.truncf %47 : vector<16x128xf32> to vector<16x128xbf16>
    %cst_26 = arith.constant dense<0.000000e+00> : vector<16x512xf32>
    %54 = tpu.matmul %53, %12, %cst_26 {dimension_numbers = #tpu.dot_dimension_numbers<[1], [0], [0], [1], [0, 0, 1, 1], [], []>} : vector<16x128xbf16>, vector<128x512xbf16>, vector<16x512xf32> -> vector<16x512xf32>
    %55 = arith.addf %52, %54 : vector<16x512xf32>
    %56 = vector.extract_strided_slice %55 {offsets = [0, 0], sizes = [16, 128], strides = [1, 1]} : vector<16x512xf32> to vector<16x128xf32>
    %cst_27 = arith.constant 5.000000e-01 : f32
    %57 = vector.broadcast %cst_27 : f32 to vector<16x128xf32>
    %58 = arith.mulf %57, %56 : vector<16x128xf32>
    %59 = math.tanh %58 : vector<16x128xf32>
    %cst_28 = arith.constant 1.000000e+00 : f32
    %60 = vector.broadcast %cst_28 : f32 to vector<16x128xf32>
    %61 = arith.addf %59, %60 : vector<16x128xf32>
    %cst_29 = arith.constant 5.000000e-01 : f32
    %62 = vector.broadcast %cst_29 : f32 to vector<16x128xf32>
    %63 = arith.mulf %62, %61 : vector<16x128xf32>
    %64 = vector.extract_strided_slice %55 {offsets = [0, 128], sizes = [16, 128], strides = [1, 1]} : vector<16x512xf32> to vector<16x128xf32>
    %cst_30 = arith.constant 5.000000e-01 : f32
    %65 = vector.broadcast %cst_30 : f32 to vector<16x128xf32>
    %66 = arith.mulf %65, %64 : vector<16x128xf32>
    %67 = math.tanh %66 : vector<16x128xf32>
    %cst_31 = arith.constant 1.000000e+00 : f32
    %68 = vector.broadcast %cst_31 : f32 to vector<16x128xf32>
    %69 = arith.addf %67, %68 : vector<16x128xf32>
    %cst_32 = arith.constant 5.000000e-01 : f32
    %70 = vector.broadcast %cst_32 : f32 to vector<16x128xf32>
    %71 = arith.mulf %70, %69 : vector<16x128xf32>
    %72 = vector.extract_strided_slice %55 {offsets = [0, 256], sizes = [16, 128], strides = [1, 1]} : vector<16x512xf32> to vector<16x128xf32>
    %73 = math.tanh %72 : vector<16x128xf32>
    %74 = vector.extract_strided_slice %55 {offsets = [0, 384], sizes = [16, 128], strides = [1, 1]} : vector<16x512xf32> to vector<16x128xf32>
    %cst_33 = arith.constant 5.000000e-01 : f32
    %75 = vector.broadcast %cst_33 : f32 to vector<16x128xf32>
    %76 = arith.mulf %75, %74 : vector<16x128xf32>
    %77 = math.tanh %76 : vector<16x128xf32>
    %cst_34 = arith.constant 1.000000e+00 : f32
    %78 = vector.broadcast %cst_34 : f32 to vector<16x128xf32>
    %79 = arith.addf %77, %78 : vector<16x128xf32>
    %cst_35 = arith.constant 5.000000e-01 : f32
    %80 = vector.broadcast %cst_35 : f32 to vector<16x128xf32>
    %81 = arith.mulf %80, %79 : vector<16x128xf32>
    %82 = arith.mulf %71, %45 : vector<16x128xf32>
    %83 = arith.mulf %63, %73 : vector<16x128xf32>
    %84 = arith.addf %82, %83 : vector<16x128xf32>
    %85 = math.tanh %84 : vector<16x128xf32>
    %86 = arith.mulf %81, %85 : vector<16x128xf32>
    %87 = arith.truncf %86 : vector<16x128xf32> to vector<16x128xbf16>
    %c1 = arith.constant 1 : index
    %c0_36 = arith.constant 0 : index
    %c0_37 = arith.constant 0 : index
    %88 = vector.load %arg6[%c1, %c0_36, %c0_37] : memref<8x16x128xbf16, #tpu.memory_space<vmem>>, vector<1x16x128xbf16>
    %89 = vector.shape_cast %88 : vector<1x16x128xbf16> to vector<16x128xbf16>
    %90 = vector.shape_cast %87 : vector<16x128xbf16> to vector<1x16x128xbf16>
    tpu.vector_store %arg6[%c1, %c0_36, %c0_37], %90 {strides = array<i32>} : memref<8x16x128xbf16, #tpu.memory_space<vmem>>, vector<1x16x128xbf16>,
    %91 = vector.extract_strided_slice %9 {offsets = [32, 0], sizes = [16, 512], strides = [1, 1]} : vector<128x512xf32> to vector<16x512xf32>
    %92 = arith.truncf %86 : vector<16x128xf32> to vector<16x128xbf16>
    %cst_38 = arith.constant dense<0.000000e+00> : vector<16x512xf32>
    %93 = tpu.matmul %92, %12, %cst_38 {dimension_numbers = #tpu.dot_dimension_numbers<[1], [0], [0], [1], [0, 0, 1, 1], [], []>} : vector<16x128xbf16>, vector<128x512xbf16>, vector<16x512xf32> -> vector<16x512xf32>
    %94 = arith.addf %91, %93 : vector<16x512xf32>
    %95 = vector.extract_strided_slice %94 {offsets = [0, 0], sizes = [16, 128], strides = [1, 1]} : vector<16x512xf32> to vector<16x128xf32>
    %cst_39 = arith.constant 5.000000e-01 : f32
    %96 = vector.broadcast %cst_39 : f32 to vector<16x128xf32>
    %97 = arith.mulf %96, %95 : vector<16x128xf32>
    %98 = math.tanh %97 : vector<16x128xf32>
    %cst_40 = arith.constant 1.000000e+00 : f32
    %99 = vector.broadcast %cst_40 : f32 to vector<16x128xf32>
    %100 = arith.addf %98, %99 : vector<16x128xf32>
    %cst_41 = arith.constant 5.000000e-01 : f32
    %101 = vector.broadcast %cst_41 : f32 to vector<16x128xf32>
    %102 = arith.mulf %101, %100 : vector<16x128xf32>
    %103 = vector.extract_strided_slice %94 {offsets = [0, 128], sizes = [16, 128], strides = [1, 1]} : vector<16x512xf32> to vector<16x128xf32>
    %cst_42 = arith.constant 5.000000e-01 : f32
    %104 = vector.broadcast %cst_42 : f32 to vector<16x128xf32>
    %105 = arith.mulf %104, %103 : vector<16x128xf32>
    %106 = math.tanh %105 : vector<16x128xf32>
    %cst_43 = arith.constant 1.000000e+00 : f32
    %107 = vector.broadcast %cst_43 : f32 to vector<16x128xf32>
    %108 = arith.addf %106, %107 : vector<16x128xf32>
    %cst_44 = arith.constant 5.000000e-01 : f32
    %109 = vector.broadcast %cst_44 : f32 to vector<16x128xf32>
    %110 = arith.mulf %109, %108 : vector<16x128xf32>
    %111 = vector.extract_strided_slice %94 {offsets = [0, 256], sizes = [16, 128], strides = [1, 1]} : vector<16x512xf32> to vector<16x128xf32>
    %112 = math.tanh %111 : vector<16x128xf32>
    %113 = vector.extract_strided_slice %94 {offsets = [0, 384], sizes = [16, 128], strides = [1, 1]} : vector<16x512xf32> to vector<16x128xf32>
    %cst_45 = arith.constant 5.000000e-01 : f32
    %114 = vector.broadcast %cst_45 : f32 to vector<16x128xf32>
    %115 = arith.mulf %114, %113 : vector<16x128xf32>
    %116 = math.tanh %115 : vector<16x128xf32>
    %cst_46 = arith.constant 1.000000e+00 : f32
    %117 = vector.broadcast %cst_46 : f32 to vector<16x128xf32>
    %118 = arith.addf %116, %117 : vector<16x128xf32>
    %cst_47 = arith.constant 5.000000e-01 : f32
    %119 = vector.broadcast %cst_47 : f32 to vector<16x128xf32>
    %120 = arith.mulf %119, %118 : vector<16x128xf32>
    %121 = arith.mulf %110, %84 : vector<16x128xf32>
    %122 = arith.mulf %102, %112 : vector<16x128xf32>
    %123 = arith.addf %121, %122 : vector<16x128xf32>
    %124 = math.tanh %123 : vector<16x128xf32>
    %125 = arith.mulf %120, %124 : vector<16x128xf32>
    %126 = arith.truncf %125 : vector<16x128xf32> to vector<16x128xbf16>
    %c2 = arith.constant 2 : index
    %c0_48 = arith.constant 0 : index
    %c0_49 = arith.constant 0 : index
    %127 = vector.load %arg6[%c2, %c0_48, %c0_49] : memref<8x16x128xbf16, #tpu.memory_space<vmem>>, vector<1x16x128xbf16>
    %128 = vector.shape_cast %127 : vector<1x16x128xbf16> to vector<16x128xbf16>
    %129 = vector.shape_cast %126 : vector<16x128xbf16> to vector<1x16x128xbf16>
    tpu.vector_store %arg6[%c2, %c0_48, %c0_49], %129 {strides = array<i32>} : memref<8x16x128xbf16, #tpu.memory_space<vmem>>, vector<1x16x128xbf16>,
    %130 = vector.extract_strided_slice %9 {offsets = [48, 0], sizes = [16, 512], strides = [1, 1]} : vector<128x512xf32> to vector<16x512xf32>
    %131 = arith.truncf %125 : vector<16x128xf32> to vector<16x128xbf16>
    %cst_50 = arith.constant dense<0.000000e+00> : vector<16x512xf32>
    %132 = tpu.matmul %131, %12, %cst_50 {dimension_numbers = #tpu.dot_dimension_numbers<[1], [0], [0], [1], [0, 0, 1, 1], [], []>} : vector<16x128xbf16>, vector<128x512xbf16>, vector<16x512xf32> -> vector<16x512xf32>
    %133 = arith.addf %130, %132 : vector<16x512xf32>
    %134 = vector.extract_strided_slice %133 {offsets = [0, 0], sizes = [16, 128], strides = [1, 1]} : vector<16x512xf32> to vector<16x128xf32>
    %cst_51 = arith.constant 5.000000e-01 : f32
    %135 = vector.broadcast %cst_51 : f32 to vector<16x128xf32>
    %136 = arith.mulf %135, %134 : vector<16x128xf32>
    %137 = math.tanh %136 : vector<16x128xf32>
    %cst_52 = arith.constant 1.000000e+00 : f32
    %138 = vector.broadcast %cst_52 : f32 to vector<16x128xf32>
    %139 = arith.addf %137, %138 : vector<16x128xf32>
    %cst_53 = arith.constant 5.000000e-01 : f32
    %140 = vector.broadcast %cst_53 : f32 to vector<16x128xf32>
    %141 = arith.mulf %140, %139 : vector<16x128xf32>
    %142 = vector.extract_strided_slice %133 {offsets = [0, 128], sizes = [16, 128], strides = [1, 1]} : vector<16x512xf32> to vector<16x128xf32>
    %cst_54 = arith.constant 5.000000e-01 : f32
    %143 = vector.broadcast %cst_54 : f32 to vector<16x128xf32>
    %144 = arith.mulf %143, %142 : vector<16x128xf32>
    %145 = math.tanh %144 : vector<16x128xf32>
    %cst_55 = arith.constant 1.000000e+00 : f32
    %146 = vector.broadcast %cst_55 : f32 to vector<16x128xf32>
    %147 = arith.addf %145, %146 : vector<16x128xf32>
    %cst_56 = arith.constant 5.000000e-01 : f32
    %148 = vector.broadcast %cst_56 : f32 to vector<16x128xf32>
    %149 = arith.mulf %148, %147 : vector<16x128xf32>
    %150 = vector.extract_strided_slice %133 {offsets = [0, 256], sizes = [16, 128], strides = [1, 1]} : vector<16x512xf32> to vector<16x128xf32>
    %151 = math.tanh %150 : vector<16x128xf32>
    %152 = vector.extract_strided_slice %133 {offsets = [0, 384], sizes = [16, 128], strides = [1, 1]} : vector<16x512xf32> to vector<16x128xf32>
    %cst_57 = arith.constant 5.000000e-01 : f32
    %153 = vector.broadcast %cst_57 : f32 to vector<16x128xf32>
    %154 = arith.mulf %153, %152 : vector<16x128xf32>
    %155 = math.tanh %154 : vector<16x128xf32>
    %cst_58 = arith.constant 1.000000e+00 : f32
    %156 = vector.broadcast %cst_58 : f32 to vector<16x128xf32>
    %157 = arith.addf %155, %156 : vector<16x128xf32>
    %cst_59 = arith.constant 5.000000e-01 : f32
    %158 = vector.broadcast %cst_59 : f32 to vector<16x128xf32>
    %159 = arith.mulf %158, %157 : vector<16x128xf32>
    %160 = arith.mulf %149, %123 : vector<16x128xf32>
    %161 = arith.mulf %141, %151 : vector<16x128xf32>
    %162 = arith.addf %160, %161 : vector<16x128xf32>
    %163 = math.tanh %162 : vector<16x128xf32>
    %164 = arith.mulf %159, %163 : vector<16x128xf32>
    %165 = arith.truncf %164 : vector<16x128xf32> to vector<16x128xbf16>
    %c3 = arith.constant 3 : index
    %c0_60 = arith.constant 0 : index
    %c0_61 = arith.constant 0 : index
    %166 = vector.load %arg6[%c3, %c0_60, %c0_61] : memref<8x16x128xbf16, #tpu.memory_space<vmem>>, vector<1x16x128xbf16>
    %167 = vector.shape_cast %166 : vector<1x16x128xbf16> to vector<16x128xbf16>
    %168 = vector.shape_cast %165 : vector<16x128xbf16> to vector<1x16x128xbf16>
    tpu.vector_store %arg6[%c3, %c0_60, %c0_61], %168 {strides = array<i32>} : memref<8x16x128xbf16, #tpu.memory_space<vmem>>, vector<1x16x128xbf16>,
    %169 = vector.extract_strided_slice %9 {offsets = [64, 0], sizes = [16, 512], strides = [1, 1]} : vector<128x512xf32> to vector<16x512xf32>
    %170 = arith.truncf %164 : vector<16x128xf32> to vector<16x128xbf16>
    %cst_62 = arith.constant dense<0.000000e+00> : vector<16x512xf32>
    %171 = tpu.matmul %170, %12, %cst_62 {dimension_numbers = #tpu.dot_dimension_numbers<[1], [0], [0], [1], [0, 0, 1, 1], [], []>} : vector<16x128xbf16>, vector<128x512xbf16>, vector<16x512xf32> -> vector<16x512xf32>
    %172 = arith.addf %169, %171 : vector<16x512xf32>
    %173 = vector.extract_strided_slice %172 {offsets = [0, 0], sizes = [16, 128], strides = [1, 1]} : vector<16x512xf32> to vector<16x128xf32>
    %cst_63 = arith.constant 5.000000e-01 : f32
    %174 = vector.broadcast %cst_63 : f32 to vector<16x128xf32>
    %175 = arith.mulf %174, %173 : vector<16x128xf32>
    %176 = math.tanh %175 : vector<16x128xf32>
    %cst_64 = arith.constant 1.000000e+00 : f32
    %177 = vector.broadcast %cst_64 : f32 to vector<16x128xf32>
    %178 = arith.addf %176, %177 : vector<16x128xf32>
    %cst_65 = arith.constant 5.000000e-01 : f32
    %179 = vector.broadcast %cst_65 : f32 to vector<16x128xf32>
    %180 = arith.mulf %179, %178 : vector<16x128xf32>
    %181 = vector.extract_strided_slice %172 {offsets = [0, 128], sizes = [16, 128], strides = [1, 1]} : vector<16x512xf32> to vector<16x128xf32>
    %cst_66 = arith.constant 5.000000e-01 : f32
    %182 = vector.broadcast %cst_66 : f32 to vector<16x128xf32>
    %183 = arith.mulf %182, %181 : vector<16x128xf32>
    %184 = math.tanh %183 : vector<16x128xf32>
    %cst_67 = arith.constant 1.000000e+00 : f32
    %185 = vector.broadcast %cst_67 : f32 to vector<16x128xf32>
    %186 = arith.addf %184, %185 : vector<16x128xf32>
    %cst_68 = arith.constant 5.000000e-01 : f32
    %187 = vector.broadcast %cst_68 : f32 to vector<16x128xf32>
    %188 = arith.mulf %187, %186 : vector<16x128xf32>
    %189 = vector.extract_strided_slice %172 {offsets = [0, 256], sizes = [16, 128], strides = [1, 1]} : vector<16x512xf32> to vector<16x128xf32>
    %190 = math.tanh %189 : vector<16x128xf32>
    %191 = vector.extract_strided_slice %172 {offsets = [0, 384], sizes = [16, 128], strides = [1, 1]} : vector<16x512xf32> to vector<16x128xf32>
    %cst_69 = arith.constant 5.000000e-01 : f32
    %192 = vector.broadcast %cst_69 : f32 to vector<16x128xf32>
    %193 = arith.mulf %192, %191 : vector<16x128xf32>
    %194 = math.tanh %193 : vector<16x128xf32>
    %cst_70 = arith.constant 1.000000e+00 : f32
    %195 = vector.broadcast %cst_70 : f32 to vector<16x128xf32>
    %196 = arith.addf %194, %195 : vector<16x128xf32>
    %cst_71 = arith.constant 5.000000e-01 : f32
    %197 = vector.broadcast %cst_71 : f32 to vector<16x128xf32>
    %198 = arith.mulf %197, %196 : vector<16x128xf32>
    %199 = arith.mulf %188, %162 : vector<16x128xf32>
    %200 = arith.mulf %180, %190 : vector<16x128xf32>
    %201 = arith.addf %199, %200 : vector<16x128xf32>
    %202 = math.tanh %201 : vector<16x128xf32>
    %203 = arith.mulf %198, %202 : vector<16x128xf32>
    %204 = arith.truncf %203 : vector<16x128xf32> to vector<16x128xbf16>
    %c4 = arith.constant 4 : index
    %c0_72 = arith.constant 0 : index
    %c0_73 = arith.constant 0 : index
    %205 = vector.load %arg6[%c4, %c0_72, %c0_73] : memref<8x16x128xbf16, #tpu.memory_space<vmem>>, vector<1x16x128xbf16>
    %206 = vector.shape_cast %205 : vector<1x16x128xbf16> to vector<16x128xbf16>
    %207 = vector.shape_cast %204 : vector<16x128xbf16> to vector<1x16x128xbf16>
    tpu.vector_store %arg6[%c4, %c0_72, %c0_73], %207 {strides = array<i32>} : memref<8x16x128xbf16, #tpu.memory_space<vmem>>, vector<1x16x128xbf16>,
    %208 = vector.extract_strided_slice %9 {offsets = [80, 0], sizes = [16, 512], strides = [1, 1]} : vector<128x512xf32> to vector<16x512xf32>
    %209 = arith.truncf %203 : vector<16x128xf32> to vector<16x128xbf16>
    %cst_74 = arith.constant dense<0.000000e+00> : vector<16x512xf32>
    %210 = tpu.matmul %209, %12, %cst_74 {dimension_numbers = #tpu.dot_dimension_numbers<[1], [0], [0], [1], [0, 0, 1, 1], [], []>} : vector<16x128xbf16>, vector<128x512xbf16>, vector<16x512xf32> -> vector<16x512xf32>
    %211 = arith.addf %208, %210 : vector<16x512xf32>
    %212 = vector.extract_strided_slice %211 {offsets = [0, 0], sizes = [16, 128], strides = [1, 1]} : vector<16x512xf32> to vector<16x128xf32>
    %cst_75 = arith.constant 5.000000e-01 : f32
    %213 = vector.broadcast %cst_75 : f32 to vector<16x128xf32>
    %214 = arith.mulf %213, %212 : vector<16x128xf32>
    %215 = math.tanh %214 : vector<16x128xf32>
    %cst_76 = arith.constant 1.000000e+00 : f32
    %216 = vector.broadcast %cst_76 : f32 to vector<16x128xf32>
    %217 = arith.addf %215, %216 : vector<16x128xf32>
    %cst_77 = arith.constant 5.000000e-01 : f32
    %218 = vector.broadcast %cst_77 : f32 to vector<16x128xf32>
    %219 = arith.mulf %218, %217 : vector<16x128xf32>
    %220 = vector.extract_strided_slice %211 {offsets = [0, 128], sizes = [16, 128], strides = [1, 1]} : vector<16x512xf32> to vector<16x128xf32>
    %cst_78 = arith.constant 5.000000e-01 : f32
    %221 = vector.broadcast %cst_78 : f32 to vector<16x128xf32>
    %222 = arith.mulf %221, %220 : vector<16x128xf32>
    %223 = math.tanh %222 : vector<16x128xf32>
    %cst_79 = arith.constant 1.000000e+00 : f32
    %224 = vector.broadcast %cst_79 : f32 to vector<16x128xf32>
    %225 = arith.addf %223, %224 : vector<16x128xf32>
    %cst_80 = arith.constant 5.000000e-01 : f32
    %226 = vector.broadcast %cst_80 : f32 to vector<16x128xf32>
    %227 = arith.mulf %226, %225 : vector<16x128xf32>
    %228 = vector.extract_strided_slice %211 {offsets = [0, 256], sizes = [16, 128], strides = [1, 1]} : vector<16x512xf32> to vector<16x128xf32>
    %229 = math.tanh %228 : vector<16x128xf32>
    %230 = vector.extract_strided_slice %211 {offsets = [0, 384], sizes = [16, 128], strides = [1, 1]} : vector<16x512xf32> to vector<16x128xf32>
    %cst_81 = arith.constant 5.000000e-01 : f32
    %231 = vector.broadcast %cst_81 : f32 to vector<16x128xf32>
    %232 = arith.mulf %231, %230 : vector<16x128xf32>
    %233 = math.tanh %232 : vector<16x128xf32>
    %cst_82 = arith.constant 1.000000e+00 : f32
    %234 = vector.broadcast %cst_82 : f32 to vector<16x128xf32>
    %235 = arith.addf %233, %234 : vector<16x128xf32>
    %cst_83 = arith.constant 5.000000e-01 : f32
    %236 = vector.broadcast %cst_83 : f32 to vector<16x128xf32>
    %237 = arith.mulf %236, %235 : vector<16x128xf32>
    %238 = arith.mulf %227, %201 : vector<16x128xf32>
    %239 = arith.mulf %219, %229 : vector<16x128xf32>
    %240 = arith.addf %238, %239 : vector<16x128xf32>
    %241 = math.tanh %240 : vector<16x128xf32>
    %242 = arith.mulf %237, %241 : vector<16x128xf32>
    %243 = arith.truncf %242 : vector<16x128xf32> to vector<16x128xbf16>
    %c5 = arith.constant 5 : index
    %c0_84 = arith.constant 0 : index
    %c0_85 = arith.constant 0 : index
    %244 = vector.load %arg6[%c5, %c0_84, %c0_85] : memref<8x16x128xbf16, #tpu.memory_space<vmem>>, vector<1x16x128xbf16>
    %245 = vector.shape_cast %244 : vector<1x16x128xbf16> to vector<16x128xbf16>
    %246 = vector.shape_cast %243 : vector<16x128xbf16> to vector<1x16x128xbf16>
    tpu.vector_store %arg6[%c5, %c0_84, %c0_85], %246 {strides = array<i32>} : memref<8x16x128xbf16, #tpu.memory_space<vmem>>, vector<1x16x128xbf16>,
    %247 = vector.extract_strided_slice %9 {offsets = [96, 0], sizes = [16, 512], strides = [1, 1]} : vector<128x512xf32> to vector<16x512xf32>
    %248 = arith.truncf %242 : vector<16x128xf32> to vector<16x128xbf16>
    %cst_86 = arith.constant dense<0.000000e+00> : vector<16x512xf32>
    %249 = tpu.matmul %248, %12, %cst_86 {dimension_numbers = #tpu.dot_dimension_numbers<[1], [0], [0], [1], [0, 0, 1, 1], [], []>} : vector<16x128xbf16>, vector<128x512xbf16>, vector<16x512xf32> -> vector<16x512xf32>
    %250 = arith.addf %247, %249 : vector<16x512xf32>
    %251 = vector.extract_strided_slice %250 {offsets = [0, 0], sizes = [16, 128], strides = [1, 1]} : vector<16x512xf32> to vector<16x128xf32>
    %cst_87 = arith.constant 5.000000e-01 : f32
    %252 = vector.broadcast %cst_87 : f32 to vector<16x128xf32>
    %253 = arith.mulf %252, %251 : vector<16x128xf32>
    %254 = math.tanh %253 : vector<16x128xf32>
    %cst_88 = arith.constant 1.000000e+00 : f32
    %255 = vector.broadcast %cst_88 : f32 to vector<16x128xf32>
    %256 = arith.addf %254, %255 : vector<16x128xf32>
    %cst_89 = arith.constant 5.000000e-01 : f32
    %257 = vector.broadcast %cst_89 : f32 to vector<16x128xf32>
    %258 = arith.mulf %257, %256 : vector<16x128xf32>
    %259 = vector.extract_strided_slice %250 {offsets = [0, 128], sizes = [16, 128], strides = [1, 1]} : vector<16x512xf32> to vector<16x128xf32>
    %cst_90 = arith.constant 5.000000e-01 : f32
    %260 = vector.broadcast %cst_90 : f32 to vector<16x128xf32>
    %261 = arith.mulf %260, %259 : vector<16x128xf32>
    %262 = math.tanh %261 : vector<16x128xf32>
    %cst_91 = arith.constant 1.000000e+00 : f32
    %263 = vector.broadcast %cst_91 : f32 to vector<16x128xf32>
    %264 = arith.addf %262, %263 : vector<16x128xf32>
    %cst_92 = arith.constant 5.000000e-01 : f32
    %265 = vector.broadcast %cst_92 : f32 to vector<16x128xf32>
    %266 = arith.mulf %265, %264 : vector<16x128xf32>
    %267 = vector.extract_strided_slice %250 {offsets = [0, 256], sizes = [16, 128], strides = [1, 1]} : vector<16x512xf32> to vector<16x128xf32>
    %268 = math.tanh %267 : vector<16x128xf32>
    %269 = vector.extract_strided_slice %250 {offsets = [0, 384], sizes = [16, 128], strides = [1, 1]} : vector<16x512xf32> to vector<16x128xf32>
    %cst_93 = arith.constant 5.000000e-01 : f32
    %270 = vector.broadcast %cst_93 : f32 to vector<16x128xf32>
    %271 = arith.mulf %270, %269 : vector<16x128xf32>
    %272 = math.tanh %271 : vector<16x128xf32>
    %cst_94 = arith.constant 1.000000e+00 : f32
    %273 = vector.broadcast %cst_94 : f32 to vector<16x128xf32>
    %274 = arith.addf %272, %273 : vector<16x128xf32>
    %cst_95 = arith.constant 5.000000e-01 : f32
    %275 = vector.broadcast %cst_95 : f32 to vector<16x128xf32>
    %276 = arith.mulf %275, %274 : vector<16x128xf32>
    %277 = arith.mulf %266, %240 : vector<16x128xf32>
    %278 = arith.mulf %258, %268 : vector<16x128xf32>
    %279 = arith.addf %277, %278 : vector<16x128xf32>
    %280 = math.tanh %279 : vector<16x128xf32>
    %281 = arith.mulf %276, %280 : vector<16x128xf32>
    %282 = arith.truncf %281 : vector<16x128xf32> to vector<16x128xbf16>
    %c6 = arith.constant 6 : index
    %c0_96 = arith.constant 0 : index
    %c0_97 = arith.constant 0 : index
    %283 = vector.load %arg6[%c6, %c0_96, %c0_97] : memref<8x16x128xbf16, #tpu.memory_space<vmem>>, vector<1x16x128xbf16>
    %284 = vector.shape_cast %283 : vector<1x16x128xbf16> to vector<16x128xbf16>
    %285 = vector.shape_cast %282 : vector<16x128xbf16> to vector<1x16x128xbf16>
    tpu.vector_store %arg6[%c6, %c0_96, %c0_97], %285 {strides = array<i32>} : memref<8x16x128xbf16, #tpu.memory_space<vmem>>, vector<1x16x128xbf16>,
    %286 = vector.extract_strided_slice %9 {offsets = [112, 0], sizes = [16, 512], strides = [1, 1]} : vector<128x512xf32> to vector<16x512xf32>
    %287 = arith.truncf %281 : vector<16x128xf32> to vector<16x128xbf16>
    %cst_98 = arith.constant dense<0.000000e+00> : vector<16x512xf32>
    %288 = tpu.matmul %287, %12, %cst_98 {dimension_numbers = #tpu.dot_dimension_numbers<[1], [0], [0], [1], [0, 0, 1, 1], [], []>} : vector<16x128xbf16>, vector<128x512xbf16>, vector<16x512xf32> -> vector<16x512xf32>
    %289 = arith.addf %286, %288 : vector<16x512xf32>
    %290 = vector.extract_strided_slice %289 {offsets = [0, 0], sizes = [16, 128], strides = [1, 1]} : vector<16x512xf32> to vector<16x128xf32>
    %cst_99 = arith.constant 5.000000e-01 : f32
    %291 = vector.broadcast %cst_99 : f32 to vector<16x128xf32>
    %292 = arith.mulf %291, %290 : vector<16x128xf32>
    %293 = math.tanh %292 : vector<16x128xf32>
    %cst_100 = arith.constant 1.000000e+00 : f32
    %294 = vector.broadcast %cst_100 : f32 to vector<16x128xf32>
    %295 = arith.addf %293, %294 : vector<16x128xf32>
    %cst_101 = arith.constant 5.000000e-01 : f32
    %296 = vector.broadcast %cst_101 : f32 to vector<16x128xf32>
    %297 = arith.mulf %296, %295 : vector<16x128xf32>
    %298 = vector.extract_strided_slice %289 {offsets = [0, 128], sizes = [16, 128], strides = [1, 1]} : vector<16x512xf32> to vector<16x128xf32>
    %cst_102 = arith.constant 5.000000e-01 : f32
    %299 = vector.broadcast %cst_102 : f32 to vector<16x128xf32>
    %300 = arith.mulf %299, %298 : vector<16x128xf32>
    %301 = math.tanh %300 : vector<16x128xf32>
    %cst_103 = arith.constant 1.000000e+00 : f32
    %302 = vector.broadcast %cst_103 : f32 to vector<16x128xf32>
    %303 = arith.addf %301, %302 : vector<16x128xf32>
    %cst_104 = arith.constant 5.000000e-01 : f32
    %304 = vector.broadcast %cst_104 : f32 to vector<16x128xf32>
    %305 = arith.mulf %304, %303 : vector<16x128xf32>
    %306 = vector.extract_strided_slice %289 {offsets = [0, 256], sizes = [16, 128], strides = [1, 1]} : vector<16x512xf32> to vector<16x128xf32>
    %307 = math.tanh %306 : vector<16x128xf32>
    %308 = vector.extract_strided_slice %289 {offsets = [0, 384], sizes = [16, 128], strides = [1, 1]} : vector<16x512xf32> to vector<16x128xf32>
    %cst_105 = arith.constant 5.000000e-01 : f32
    %309 = vector.broadcast %cst_105 : f32 to vector<16x128xf32>
    %310 = arith.mulf %309, %308 : vector<16x128xf32>
    %311 = math.tanh %310 : vector<16x128xf32>
    %cst_106 = arith.constant 1.000000e+00 : f32
    %312 = vector.broadcast %cst_106 : f32 to vector<16x128xf32>
    %313 = arith.addf %311, %312 : vector<16x128xf32>
    %cst_107 = arith.constant 5.000000e-01 : f32
    %314 = vector.broadcast %cst_107 : f32 to vector<16x128xf32>
    %315 = arith.mulf %314, %313 : vector<16x128xf32>
    %316 = arith.mulf %305, %279 : vector<16x128xf32>
    %317 = arith.mulf %297, %307 : vector<16x128xf32>
    %318 = arith.addf %316, %317 : vector<16x128xf32>
    %319 = math.tanh %318 : vector<16x128xf32>
    %320 = arith.mulf %315, %319 : vector<16x128xf32>
    %321 = arith.truncf %320 : vector<16x128xf32> to vector<16x128xbf16>
    %c7 = arith.constant 7 : index
    %c0_108 = arith.constant 0 : index
    %c0_109 = arith.constant 0 : index
    %322 = vector.load %arg6[%c7, %c0_108, %c0_109] : memref<8x16x128xbf16, #tpu.memory_space<vmem>>, vector<1x16x128xbf16>
    %323 = vector.shape_cast %322 : vector<1x16x128xbf16> to vector<16x128xbf16>
    %324 = vector.shape_cast %321 : vector<16x128xbf16> to vector<1x16x128xbf16>
    tpu.vector_store %arg6[%c7, %c0_108, %c0_109], %324 {strides = array<i32>} : memref<8x16x128xbf16, #tpu.memory_space<vmem>>, vector<1x16x128xbf16>,
    %c0_110 = arith.constant 0 : index
    %c0_111 = arith.constant 0 : index
    %325 = vector.load %arg9[%c0_110, %c0_111] : memref<16x128xf32, #tpu.memory_space<vmem>>, vector<16x128xf32>
    tpu.vector_store %arg9[%c0_110, %c0_111], %320 {strides = array<i32>} : memref<16x128xf32, #tpu.memory_space<vmem>>, vector<16x128xf32>,
    %c0_112 = arith.constant 0 : index
    %c0_113 = arith.constant 0 : index
    %326 = vector.load %arg10[%c0_112, %c0_113] : memref<16x128xf32, #tpu.memory_space<vmem>>, vector<16x128xf32>
    tpu.vector_store %arg10[%c0_112, %c0_113], %318 {strides = array<i32>} : memref<16x128xf32, #tpu.memory_space<vmem>>, vector<16x128xf32>,
    %c0_i32_114 = arith.constant 0 : i32
    %327 = arith.cmpi eq, %arg1, %c0_i32_114 : i32
    %328 = arith.extui %327 : i1 to i32
    %c0_i32_115 = arith.constant 0 : i32
    %329 = arith.cmpi ne, %328, %c0_i32_115 : i32
    scf.if %329 {
      %c0_116 = arith.constant 0 : index
      %c0_117 = arith.constant 0 : index
      %330 = vector.load %arg7[%c0_116, %c0_117] : memref<16x128xf32, #tpu.memory_space<vmem>>, vector<16x128xf32>
      tpu.vector_store %arg7[%c0_116, %c0_117], %320 {strides = array<i32>} : memref<16x128xf32, #tpu.memory_space<vmem>>, vector<16x128xf32>,
      %c0_118 = arith.constant 0 : index
      %c0_119 = arith.constant 0 : index
      %331 = vector.load %arg8[%c0_118, %c0_119] : memref<16x128xf32, #tpu.memory_space<vmem>>, vector<16x128xf32>
      tpu.vector_store %arg8[%c0_118, %c0_119], %318 {strides = array<i32>} : memref<16x128xf32, #tpu.memory_space<vmem>>, vector<16x128xf32>,
    } else {
    }
    return
  }
  func.func @transform_0(%arg0: i32, %arg1: i32) -> (i32, i32, i32) {
    %c0_i32 = arith.constant 0 : i32
    %c0_i32_0 = arith.constant 0 : i32
    return %arg1, %arg0, %c0_i32 : i32, i32, i32
  }
  func.func @transform_1(%arg0: i32, %arg1: i32) -> (i32, i32) {
    %c0_i32 = arith.constant 0 : i32
    %c0_i32_0 = arith.constant 0 : i32
    %c0_i32_1 = arith.constant 0 : i32
    return %c0_i32, %c0_i32_0 : i32, i32
  }
  func.func @transform_4(%arg0: i32, %arg1: i32) -> (i32, i32, i32) {
    %c0_i32 = arith.constant 0 : i32
    %c0_i32_0 = arith.constant 0 : i32
    return %arg1, %arg0, %c0_i32 : i32, i32, i32
  }
  func.func @transform_5(%arg0: i32, %arg1: i32) -> (i32, i32) {
    %c0_i32 = arith.constant 0 : i32
    %c0_i32_0 = arith.constant 0 : i32
    return %arg0, %c0_i32 : i32, i32
  }
  func.func @transform_6(%arg0: i32, %arg1: i32) -> (i32, i32) {
    %c0_i32 = arith.constant 0 : i32
    %c0_i32_0 = arith.constant 0 : i32
    return %arg0, %c0_i32 : i32, i32
  }
}

</mosaic_0001>

<bundles_post_ra>
// kernel: _lambda_.5
= control target key start
LH: loop header
LB: loop body
LE: loop exit
PB: predicated region body
PF: predicated region fallthrough
CT: control target
= control target key end

     0   :  { %s586_s1 = inlined_call_operand.vmem [shape: bf16[128,128], index: 1, kind: input, shape index: {}]   ;;  %s587_s0 = inlined_call_operand.vmem [shape: bf16[128,128], index: 0, kind: input, shape index: {}]   ;;  %s588_s2 = inlined_call_operand.vmem [shape: f32[1,128], index: 2, kind: input, shape index: {}]   ;;  %s589_s3 = inlined_call_operand.vmem [shape: f32[128,128], index: 3, kind: output, shape index: {}]  }
   0x1   :  { %v451_v0 = vld [vmem:[%s586_s1 + $0x38] sm:$0xff]   ;;  %v452_v1 = vld [vmem:[%s586_s1 + $0x30] sm:$0xff]   ;;  %v453_v2 = vld [vmem:[%s586_s1 + $0x28] sm:$0xff]  }
   0x2   :  { %403 = vmatprep.subr.bf16.mxu0 %v451_v0  ;;  %435 = vmatprep.subr.bf16.mxu1 %v451_v0  ;;  %v454_v3 = vld [vmem:[%s586_s1 + $0x20] sm:$0xff]   ;;  %v455_v6 = vld [vmem:[%s586_s1 + $0x18] sm:$0xff]   ;;  %v456_v7 = vld [vmem:[%s586_s1 + $0x10] sm:$0xff]  }
   0x3   :  { %404 = vmatpush3.bf16.msra.mxu0 %v451_v0  ;;  %443 = vmatpush3.bf16.msra.mxu1 %v451_v0  ;;  %v459_v4 = vld [vmem:[%s587_s0] sm:$0xff]   ;;  %v457_v8 = vld [vmem:[%s586_s1 + $0x8] sm:$0xff]   ;;  %v463_v12 = vld [vmem:[%s587_s0 + $0x10] sm:$0xff]  }
   0x4   :  { %405 = vmatprep.subr.bf16.mxu0 %v452_v1  ;;  %436 = vmatprep.subr.bf16.mxu1 %v452_v1  ;;  %v460_v5 = vld [vmem:[%s587_s0 + $0x20] sm:$0xff]   ;;  %v461_v10 = vld [vmem:[%s587_s0 + $0x8] sm:$0xff]   ;;  %v464_v13 = vld [vmem:[%s587_s0 + $0x30] sm:$0xff]  }
   0x5   :  { %419 = vmatprep.mubr.bf16.mxu0 %v459_v4  ;;  %427 = vmatprep.mubr.bf16.mxu1 %v460_v5  ;;  %v458_v9 = vld [vmem:[%s586_s1] sm:$0xff]   ;;  %v462_v11 = vld [vmem:[%s587_s0 + $0x28] sm:$0xff]   ;;  %v465_v14 = vld [vmem:[%s587_s0 + $0x18] sm:$0xff]  }
   0x6   :  { %v466_v15 = vld [vmem:[%s587_s0 + $0x38] sm:$0xff]   ;;  %v386_v16 = vld [vmem:[%s588_s2] ss:$0 sm:$0xff] }
   0x7   :  { %406 = vmatpush3.bf16.msra.mxu0 %v452_v1  ;;  %444 = vmatpush3.bf16.msra.mxu1 %v452_v1 }
   0x8   :  { %407 = vmatprep.subr.bf16.mxu0 %v453_v2  ;;  %437 = vmatprep.subr.bf16.mxu1 %v453_v2 }
   0xb   :  { %408 = vmatpush3.bf16.msra.mxu0 %v453_v2  ;;  %445 = vmatpush3.bf16.msra.mxu1 %v453_v2 }
   0xc   :  { %409 = vmatprep.subr.bf16.mxu0 %v454_v3  ;;  %438 = vmatprep.subr.bf16.mxu1 %v454_v3 }
   0xf   :  { %410 = vmatpush3.bf16.msra.mxu0 %v454_v3  ;;  %446 = vmatpush3.bf16.msra.mxu1 %v454_v3 }
  0x10   :  { %411 = vmatprep.subr.bf16.mxu0 %v455_v6  ;;  %439 = vmatprep.subr.bf16.mxu1 %v455_v6 }
  0x13   :  { %412 = vmatpush3.bf16.msra.mxu0 %v455_v6  ;;  %447 = vmatpush3.bf16.msra.mxu1 %v455_v6 }
  0x14   :  { %413 = vmatprep.subr.bf16.mxu0 %v456_v7  ;;  %440 = vmatprep.subr.bf16.mxu1 %v456_v7 }
  0x17   :  { %414 = vmatpush3.bf16.msra.mxu0 %v456_v7  ;;  %448 = vmatpush3.bf16.msra.mxu1 %v456_v7 }
  0x18   :  { %415 = vmatprep.subr.bf16.mxu0 %v457_v8  ;;  %441 = vmatprep.subr.bf16.mxu1 %v457_v8 }
  0x1b   :  { %416 = vmatpush3.bf16.msra.mxu0 %v457_v8  ;;  %449 = vmatpush3.bf16.msra.mxu1 %v457_v8 }
  0x1c   :  { %417 = vmatprep.subr.bf16.mxu0 %v458_v9  ;;  %442 = vmatprep.subr.bf16.mxu1 %v458_v9 }
  0x1f   :  { %418 = vmatpush3.bf16.msra.mxu0 %v458_v9  ;;  %450 = vmatpush3.bf16.msra.mxu1 %v458_v9 }
  0x22   :  { %420 = vmatmul.mubr.bf16.vlgmr.msra.gmra.mxu0 %v461_v10  ;;  %428 = vmatmul.mubr.bf16.vlgmr.msra.gmra.mxu1 %v462_v11 }
  0x23   :  { %423 = vmatprep.mubr.bf16.mxu0 %v463_v12  ;;  %431 = vmatprep.mubr.bf16.mxu1 %v464_v13 }
  0x2a   :  { %424 = vmatmul.mubr.bf16.gmra.mxu0 %v465_v14  ;;  %432 = vmatmul.mubr.bf16.gmra.mxu1 %v466_v15 }
  0xe2   :  { %v421_v17 = vpop.f32.mrf.mxu0  ;;  %v429_v18 = vpop.f32.mrf.mxu1 }
  0xe3   :  { %v336_v19 = vadd.f32 %v421_v17, %v386_v16  ;;  %v344_v20 = vadd.f32 %v429_v18, %v386_v16 }
  0xe4   :  { %v213_v21 = vpop.f32.mrf.mxu0  ;;  %v245_v22 = vpop.f32.mrf.mxu1 }
  0xe5   :  { %352 = vst [vmem:[%s589_s3 + $0x10] sm:$0xff] %v336_v19  ;;  %360 = vst [vmem:[%s589_s3 + $0x50] sm:$0xff] %v344_v20  ;;  %v334_v23 = vadd.f32 %v386_v16, %v213_v21  ;;  %v342_v24 = vadd.f32 %v386_v16, %v245_v22 }
  0xe6   :  { %v422_v25 = vpop.f32.mrf.mxu0  ;;  %v430_v26 = vpop.f32.mrf.mxu1 }
  0xe7   :  { %350 = vst [vmem:[%s589_s3] sm:$0xff] %v334_v23  ;;  %358 = vst [vmem:[%s589_s3 + $0x40] sm:$0xff] %v342_v24  ;;  %v337_v27 = vadd.f32 %v422_v25, %v386_v16  ;;  %v345_v28 = vadd.f32 %v430_v26, %v386_v16 }
  0xe8   :  { %v216_v29 = vpop.f32.mrf.mxu0  ;;  %v248_v30 = vpop.f32.mrf.mxu1 }
  0xe9   :  { %353 = vst [vmem:[%s589_s3 + $0x18] sm:$0xff] %v337_v27  ;;  %361 = vst [vmem:[%s589_s3 + $0x58] sm:$0xff] %v345_v28  ;;  %v335_v31 = vadd.f32 %v386_v16, %v216_v29  ;;  %v343_v32 = vadd.f32 %v386_v16, %v248_v30 }
  0xea   :  { %v425_v33 = vpop.f32.mrf.mxu0  ;;  %v433_v34 = vpop.f32.mrf.mxu1 }
  0xeb   :  { %351 = vst [vmem:[%s589_s3 + $0x8] sm:$0xff] %v335_v31  ;;  %359 = vst [vmem:[%s589_s3 + $0x48] sm:$0xff] %v343_v32  ;;  %v340_v35 = vadd.f32 %v425_v33, %v386_v16  ;;  %v348_v36 = vadd.f32 %v433_v34, %v386_v16 }
  0xec   :  { %v229_v37 = vpop.f32.mrf.mxu0  ;;  %v261_v38 = vpop.f32.mrf.mxu1 }
  0xed   :  { %356 = vst [vmem:[%s589_s3 + $0x30] sm:$0xff] %v340_v35  ;;  %364 = vst [vmem:[%s589_s3 + $0x70] sm:$0xff] %v348_v36  ;;  %v338_v39 = vadd.f32 %v386_v16, %v229_v37  ;;  %v346_v40 = vadd.f32 %v386_v16, %v261_v38 }
  0xee   :  { %v426_v41 = vpop.f32.mrf.mxu0  ;;  %v434_v42 = vpop.f32.mrf.mxu1 }
  0xef   :  { %354 = vst [vmem:[%s589_s3 + $0x20] sm:$0xff] %v338_v39  ;;  %362 = vst [vmem:[%s589_s3 + $0x60] sm:$0xff] %v346_v40  ;;  %v341_v43 = vadd.f32 %v426_v41, %v386_v16  ;;  %v349_v44 = vadd.f32 %v434_v42, %v386_v16 }
  0xf0   :  { %v232_v45 = vpop.f32.mrf.mxu0  ;;  %v264_v46 = vpop.f32.mrf.mxu1 }
  0xf1   :  { %357 = vst [vmem:[%s589_s3 + $0x38] sm:$0xff] %v341_v43  ;;  %365 = vst [vmem:[%s589_s3 + $0x78] sm:$0xff] %v349_v44  ;;  %v339_v47 = vadd.f32 %v386_v16, %v232_v45  ;;  %v347_v48 = vadd.f32 %v386_v16, %v264_v46 }
  0xf3   :  { %355 = vst [vmem:[%s589_s3 + $0x28] sm:$0xff] %v339_v47  ;;  %363 = vst [vmem:[%s589_s3 + $0x68] sm:$0xff] %v347_v48 }

// kernel: _lambda_.4
= control target key start
LH: loop header
LB: loop body
LE: loop exit
PB: predicated region body
PF: predicated region fallthrough
CT: control target
= control target key end

     0   :  { %s3663_s0 = inlined_call_operand.vmem [shape: bf16[8,16,128], index: 0, kind: input, shape index: {}]   ;;  %s3664_s1 = inlined_call_operand.vmem [shape: f32[1,512], index: 1, kind: input, shape index: {}]   ;;  %s3665_s2 = inlined_call_operand.vmem [shape: bf16[128,512], index: 2, kind: input, shape index: {}]   ;;  %s3666_s3 = inlined_call_operand.vmem [shape: bf16[128,512], index: 3, kind: input, shape index: {}]   ;;  %s3667_s4 = inlined_call_operand.vmem [shape: bf16[8,16,128], index: 4, kind: output, shape index: {0}]   ;;  %s3668_s5 = inlined_call_operand.vmem [shape: f32[16,128], index: 5, kind: output, shape index: {1}]   ;;  %s3669_s6 = inlined_call_operand.vmem [shape: f32[16,128], index: 6, kind: output, shape index: {2}]  }
   0x1   :  { %v2503_v0 = vld [vmem:[%s3665_s2] sm:$0xff]  ;;  %v2508_v1 = vld [vmem:[%s3665_s2 + $0x8] sm:$0xff]  ;;  %v2513_v2 = vld [vmem:[%s3665_s2 + $0x10] sm:$0xff] }
   0x2   :  { %v2518_v3 = vld [vmem:[%s3665_s2 + $0x18] sm:$0xff]  ;;  %v2523_v4 = vld [vmem:[%s3665_s2 + $0x20] sm:$0xff]  ;;  %v2528_v5 = vld [vmem:[%s3665_s2 + $0x28] sm:$0xff] }
   0x3   :  { %v2533_v6 = vld [vmem:[%s3665_s2 + $0x30] sm:$0xff]  ;;  %v2538_v7 = vld [vmem:[%s3665_s2 + $0x38] sm:$0xff]  ;;  %v2543_v8 = vld [vmem:[%s3665_s2 + $0x40] sm:$0xff] }
   0x4   :  { %v2548_v9 = vld [vmem:[%s3665_s2 + $0x48] sm:$0xff]  ;;  %v2553_v10 = vld [vmem:[%s3665_s2 + $0x50] sm:$0xff]  ;;  %v2558_v11 = vld [vmem:[%s3665_s2 + $0x58] sm:$0xff] }
   0x5   :  { %v2563_v12 = vld [vmem:[%s3665_s2 + $0x60] sm:$0xff]  ;;  %v2568_v13 = vld [vmem:[%s3665_s2 + $0x68] sm:$0xff]  ;;  %v2573_v14 = vld [vmem:[%s3665_s2 + $0x70] sm:$0xff] }
   0x6   :  { %v2578_v15 = vld [vmem:[%s3665_s2 + $0x78] sm:$0xff]  ;;  %v2583_v16 = vld [vmem:[%s3665_s2 + $0x80] sm:$0xff]  ;;  %v2588_v17 = vld [vmem:[%s3665_s2 + $0x88] sm:$0xff] }
   0x7   :  { %v2593_v18 = vld [vmem:[%s3665_s2 + $0x90] sm:$0xff]  ;;  %v2598_v19 = vld [vmem:[%s3665_s2 + $0x98] sm:$0xff]  ;;  %v2603_v20 = vld [vmem:[%s3665_s2 + $0xa0] sm:$0xff] }
   0x8   :  { %v2608_v21 = vld [vmem:[%s3665_s2 + $0xa8] sm:$0xff]  ;;  %v2613_v22 = vld [vmem:[%s3665_s2 + $0xb0] sm:$0xff]  ;;  %v2618_v23 = vld [vmem:[%s3665_s2 + $0xb8] sm:$0xff] }
   0x9   :  { %v2623_v24 = vld [vmem:[%s3665_s2 + $0xc0] sm:$0xff]  ;;  %v2628_v25 = vld [vmem:[%s3665_s2 + $0xc8] sm:$0xff]  ;;  %v2633_v26 = vld [vmem:[%s3665_s2 + $0xd0] sm:$0xff] }
   0xa   :  { %v2638_v27 = vld [vmem:[%s3665_s2 + $0xd8] sm:$0xff]  ;;  %v110_v28 = vld [vmem:[%s3665_s2 + $0xe0] sm:$0xff]  ;;  %v112_v29 = vld [vmem:[%s3665_s2 + $0xe8] sm:$0xff] }
   0xb   :  { %v114_v30 = vld [vmem:[%s3665_s2 + $0xf0] sm:$0xff]  ;;  %v116_v31 = vld [vmem:[%s3665_s2 + $0xf8] sm:$0xff] }
   0xc   :  { %125 = vsyncadd [#allocation6], 4096  ;;  %v2655_v32 = vld [vmem:[%s3666_s3] sm:$0xff]  ;;  %v2660_v33 = vld [vmem:[%s3666_s3 + $0x8] sm:$0xff] }
   0xd   :  { %3680 = vst [vmem:[#allocation11_spill] sm:$0xff] %v2655_v32  ;;  %3681 = vst [vmem:[#allocation12_spill] sm:$0xff] %v2660_v33  ;;  %v2665_v34 = vld [vmem:[%s3666_s3 + $0x10] sm:$0xff]  ;;  %v2670_v35 = vld [vmem:[%s3666_s3 + $0x18] sm:$0xff] }
   0xe   :  { %3682 = vst [vmem:[#allocation13_spill] sm:$0xff] %v2665_v34  ;;  %3683 = vst [vmem:[#allocation14_spill] sm:$0xff] %v2670_v35  ;;  %v2675_v36 = vld [vmem:[%s3666_s3 + $0x20] sm:$0xff]  ;;  %v2680_v37 = vld [vmem:[%s3666_s3 + $0x28] sm:$0xff] }
   0xf   :  { %3684 = vst [vmem:[#allocation15_spill] sm:$0xff] %v2675_v36  ;;  %3685 = vst [vmem:[#allocation16_spill] sm:$0xff] %v2680_v37  ;;  %v2685_v38 = vld [vmem:[%s3666_s3 + $0x30] sm:$0xff]  ;;  %v2690_v39 = vld [vmem:[%s3666_s3 + $0x38] sm:$0xff] }
  0x10   :  { %3686 = vst [vmem:[#allocation17_spill] sm:$0xff] %v2685_v38  ;;  %3687 = vst [vmem:[#allocation18_spill] sm:$0xff] %v2690_v39  ;;  %v2695_v40 = vld [vmem:[%s3666_s3 + $0x40] sm:$0xff]  ;;  %v2700_v41 = vld [vmem:[%s3666_s3 + $0x48] sm:$0xff] }
  0x11   :  { %v2705_v42 = vld [vmem:[%s3666_s3 + $0x50] sm:$0xff]  ;;  %v2710_v43 = vld [vmem:[%s3666_s3 + $0x58] sm:$0xff]  ;;  %v2715_v44 = vld [vmem:[%s3666_s3 + $0x60] sm:$0xff] }
  0x12   :  { %v2720_v45 = vld [vmem:[%s3666_s3 + $0x68] sm:$0xff]  ;;  %v2725_v46 = vld [vmem:[%s3666_s3 + $0x70] sm:$0xff]  ;;  %v2730_v47 = vld [vmem:[%s3666_s3 + $0x78] sm:$0xff] }
  0x13   :  { %v2735_v48 = vld [vmem:[%s3666_s3 + $0x80] sm:$0xff]  ;;  %v2740_v49 = vld [vmem:[%s3666_s3 + $0x88] sm:$0xff]  ;;  %v2745_v50 = vld [vmem:[%s3666_s3 + $0x90] sm:$0xff] }
  0x14   :  { %v2750_v51 = vld [vmem:[%s3666_s3 + $0x98] sm:$0xff]  ;;  %v2755_v52 = vld [vmem:[%s3666_s3 + $0xa0] sm:$0xff]  ;;  %v2760_v53 = vld [vmem:[%s3666_s3 + $0xa8] sm:$0xff] }
  0x15   :  { %v2765_v54 = vld [vmem:[%s3666_s3 + $0xb0] sm:$0xff]  ;;  %v2770_v55 = vld [vmem:[%s3666_s3 + $0xb8] sm:$0xff]  ;;  %v2775_v56 = vld [vmem:[%s3666_s3 + $0xc0] sm:$0xff] }
  0x16   :  { %v2780_v57 = vld [vmem:[%s3666_s3 + $0xc8] sm:$0xff]  ;;  %v2785_v58 = vld [vmem:[%s3666_s3 + $0xd0] sm:$0xff]  ;;  %v2790_v59 = vld [vmem:[%s3666_s3 + $0xd8] sm:$0xff] }
  0x17   :  { %v2795_v60 = vld [vmem:[%s3666_s3 + $0xe0] sm:$0xff]  ;;  %v2800_v61 = vld [vmem:[%s3666_s3 + $0xe8] sm:$0xff]  ;;  %v2805_v62 = vld [vmem:[%s3666_s3 + $0xf0] sm:$0xff] }
  0x18   :  { %v2810_v63 = vld [vmem:[%s3666_s3 + $0xf8] sm:$0xff] }
  0x19   :  { %231 = vsyncadd [#allocation6 + $0x1], 4096 }
  0x1a   :  { %2459 = dma.done.wait [#allocation6], 4096 }
  0x1b   :  { %2460 = vsyncadd [#allocation6], 4294963200  ;;  %v2159_v33 = vcombine.high %v110_v28, %v114_v30  ;;  %v2161_v35 = vcombine.high %v112_v29, %v116_v31  ;;  %v2158_v32 = vcombine.low %v110_v28, %v114_v30  ;;  %v2160_v34 = vcombine.low %v112_v29, %v116_v31 }
  0x1c   :  { %2461 = dma.done.wait [#allocation6 + $0x1], 4096 }
  0x1d   :  { %2462 = vsyncadd [#allocation6 + $0x1], 4294963200  ;;  %v2155_v37 = vcombine.high %v2623_v24, %v2633_v26  ;;  %v2157_v39 = vcombine.high %v2628_v25, %v2638_v27  ;;  %520 = vmatprep.subr.bf16.mxu0 %v2159_v33  ;;  %633 = vmatprep.subr.bf16.mxu1 %v2161_v35  ;;  %v2154_v36 = vcombine.low %v2623_v24, %v2633_v26  ;;  %v3678_v30 = vmov 0   ;;  %v2292_v35 = vld [vmem:[%s3663_s0 + $0x8] sm:$0xff]  }
  0x1e   :  { %521 = vmatpush1.bf16.msra.mxu0 %v2158_v32  ;;  %634 = vmatpush1.bf16.msra.mxu1 %v2160_v34  ;;  %v2156_v38 = vcombine.low %v2628_v25, %v2638_v27  ;;  %v2151_v28 = vcombine.high %v2603_v20, %v2613_v22  ;;  %v2153_v29 = vcombine.high %v2608_v21, %v2618_v23 }
  0x1f   :  { %522 = vmatprep.subr.bf16.mxu0 %v2155_v37  ;;  %635 = vmatprep.subr.bf16.mxu1 %v2157_v39  ;;  %v2150_v24 = vcombine.low %v2603_v20, %v2613_v22  ;;  %v2152_v25 = vcombine.low %v2608_v21, %v2618_v23  ;;  %v2147_v26 = vcombine.high %v2583_v16, %v2593_v18 }
  0x20   :  { %552 = vmatprep.mubr.bf16.mxu0 %v3678_v30  ;;  %665 = vmatprep.mubr.bf16.mxu1 %v3678_v30  ;;  %v2149_v27 = vcombine.high %v2588_v17, %v2598_v19  ;;  %v2146_v31 = vcombine.low %v2583_v16, %v2593_v18  ;;  %v2148_v32 = vcombine.low %v2588_v17, %v2598_v19 }
  0x21   :  { %v2143_v20 = vcombine.high %v2563_v12, %v2573_v14  ;;  %v2145_v21 = vcombine.high %v2568_v13, %v2578_v15  ;;  %v2142_v22 = vcombine.low %v2563_v12, %v2573_v14  ;;  %v2144_v23 = vcombine.low %v2568_v13, %v2578_v15 }
  0x22   :  { %523 = vmatpush1.bf16.msra.mxu0 %v2154_v36  ;;  %636 = vmatpush1.bf16.msra.mxu1 %v2156_v38  ;;  %v2139_v16 = vcombine.high %v2543_v8, %v2553_v10  ;;  %v2141_v17 = vcombine.high %v2548_v9, %v2558_v11  ;;  %v2138_v18 = vcombine.low %v2543_v8, %v2553_v10 }
  0x23   :  { %524 = vmatprep.subr.bf16.mxu0 %v2151_v28  ;;  %637 = vmatprep.subr.bf16.mxu1 %v2153_v29  ;;  %v2140_v19 = vcombine.low %v2548_v9, %v2558_v11  ;;  %v2135_v12 = vcombine.high %v2523_v4, %v2533_v6  ;;  %v2137_v13 = vcombine.high %v2528_v5, %v2538_v7  ;;  %v3694_v28 = vld [vmem:[#allocation14_spill] sm:$0xff]  ;;  %v3695_v29 = vld [vmem:[#allocation12_spill] sm:$0xff] }
  0x24   :  { %v2134_v14 = vcombine.low %v2523_v4, %v2533_v6  ;;  %v2136_v15 = vcombine.low %v2528_v5, %v2538_v7  ;;  %v2131_v8 = vcombine.high %v2503_v0, %v2513_v2  ;;  %v2133_v9 = vcombine.high %v2508_v1, %v2518_v3  ;;  %v2291_v6 = vld [vmem:[%s3663_s0] sm:$0xff]  }
  0x25   :  { %v2130_v10 = vcombine.low %v2503_v0, %v2513_v2  ;;  %v2132_v11 = vcombine.low %v2508_v1, %v2518_v3  ;;  %v2872_v4 = vcombine.high %v2795_v60, %v2805_v62  ;;  %v2876_v5 = vcombine.high %v2800_v61, %v2810_v63 }
  0x26   :  { %525 = vmatpush1.bf16.msra.mxu0 %v2150_v24  ;;  %638 = vmatpush1.bf16.msra.mxu1 %v2152_v25  ;;  %v2883_v0 = vcombine.low %v2795_v60, %v2805_v62  ;;  %v2888_v1 = vcombine.high %v2775_v56, %v2785_v58  ;;  %v2893_v2 = vcombine.low %v2800_v61, %v2810_v63  ;;  %v3691_v60 = vld [vmem:[#allocation16_spill] sm:$0xff] }
  0x27   :  { %526 = vmatprep.subr.bf16.mxu0 %v2147_v26  ;;  %639 = vmatprep.subr.bf16.mxu1 %v2149_v27  ;;  %v2897_v3 = vcombine.high %v2780_v57, %v2790_v59  ;;  %v2903_v7 = vcombine.low %v2775_v56, %v2785_v58  ;;  %v2909_v33 = vcombine.high %v2755_v52, %v2765_v54  ;;  %v2293_v56 = vld [vmem:[%s3663_s0 + $0x10] sm:$0xff]   ;;  %v2295_v27 = vld [vmem:[%s3663_s0 + $0x20] sm:$0xff]  }
  0x28   :  { %v2914_v34 = vcombine.low %v2780_v57, %v2790_v59  ;;  %v2924_v36 = vcombine.low %v2755_v52, %v2765_v54  ;;  %v2928_v37 = vcombine.high %v2760_v53, %v2770_v55  ;;  %v2933_v38 = vcombine.high %v2735_v48, %v2745_v50  ;;  %v2294_v59 = vld [vmem:[%s3663_s0 + $0x18] sm:$0xff]  }
  0x29   :  { %v2937_v39 = vcombine.low %v2760_v53, %v2770_v55  ;;  %v2941_v52 = vcombine.high %v2740_v49, %v2750_v51  ;;  %v2949_v54 = vcombine.low %v2735_v48, %v2745_v50  ;;  %v2955_v53 = vcombine.high %v2715_v44, %v2725_v46 }
  0x2a   :  { %527 = vmatpush1.bf16.msra.mxu0 %v2146_v31  ;;  %640 = vmatpush1.bf16.msra.mxu1 %v2148_v32  ;;  %v2959_v55 = vcombine.low %v2740_v49, %v2750_v51  ;;  %v2968_v48 = vcombine.low %v2715_v44, %v2725_v46  ;;  %v2972_v50 = vcombine.high %v2720_v45, %v2730_v47  ;;  %v2296_v31 = vld [vmem:[%s3663_s0 + $0x28] sm:$0xff]   ;;  %v2297_v32 = vld [vmem:[%s3663_s0 + $0x30] sm:$0xff]  }
  0x2b   :  { %528 = vmatprep.subr.bf16.mxu0 %v2143_v20  ;;  %641 = vmatprep.subr.bf16.mxu1 %v2145_v21  ;;  %v2978_v49 = vcombine.high %v2695_v40, %v2705_v42  ;;  %v2982_v51 = vcombine.low %v2720_v45, %v2730_v47  ;;  %v2986_v44 = vcombine.high %v2700_v41, %v2710_v43  ;;  %v3688_v45 = vld [vmem:[#allocation17_spill] sm:$0xff]  ;;  %v3689_v47 = vld [vmem:[#allocation15_spill] sm:$0xff]  ;;  %v2298_v20 = vld [vmem:[%s3663_s0 + $0x38] sm:$0xff]   ;;  %v2464_v21 = vmov 0.0|0.0  }
  0x2c   :  { %v2994_v46 = vcombine.low %v2695_v40, %v2705_v42  ;;  %v3000_v57 = vcombine.high %v3689_v47, %v3688_v45  ;;  %v3004_v58 = vcombine.low %v2700_v41, %v2710_v43  ;;  %v3013_v40 = vcombine.low %v3689_v47, %v3688_v45  ;;  %v3690_v42 = vld [vmem:[#allocation18_spill] sm:$0xff]  ;;  %v3692_v41 = vld [vmem:[#allocation13_spill] sm:$0xff]  ;;  %v3693_v43 = vld [vmem:[#allocation11_spill] sm:$0xff] }
  0x2d   :  { %v3017_v61 = vcombine.high %v3691_v60, %v3690_v42  ;;  %v3023_v62 = vcombine.high %v3693_v43, %v3692_v41  ;;  %v3027_v63 = vcombine.low %v3691_v60, %v3690_v42  ;;  %v3031_v24 = vcombine.high %v3695_v29, %v3694_v28 }
  0x2e   :  { %529 = vmatpush1.bf16.msra.mxu0 %v2142_v22  ;;  %642 = vmatpush1.bf16.msra.mxu1 %v2144_v23  ;;  %v3039_v25 = vcombine.low %v3693_v43, %v3692_v41  ;;  %v3045_v26 = vcombine.low %v3695_v29, %v3694_v28  ;;  %v292_v22 = vlaneseq }
  0x2f   :  { %530 = vmatprep.subr.bf16.mxu0 %v2139_v16  ;;  %643 = vmatprep.subr.bf16.mxu1 %v2141_v17 }
  0x30   :  { %v293_v23 = vshrl.u32 %v292_v22, 7 }
  0x32   :  { %531 = vmatpush1.bf16.msra.mxu0 %v2138_v18  ;;  %644 = vmatpush1.bf16.msra.mxu1 %v2140_v19 }
  0x33   :  { %532 = vmatprep.subr.bf16.mxu0 %v2135_v12  ;;  %645 = vmatprep.subr.bf16.mxu1 %v2137_v13  ;;  %v294_v12 = vsub.s32 0, %v293_v23  ;;  %v302_v13 = vsub.s32 2, %v293_v23 }
  0x36   :  { %533 = vmatpush1.bf16.msra.mxu0 %v2134_v14  ;;  %646 = vmatpush1.bf16.msra.mxu1 %v2136_v15  ;;  %v290_v14 = vld [vmem:[%s3664_s1] sm:$0xf] }
  0x37   :  { %534 = vmatprep.subr.bf16.mxu0 %v2131_v8  ;;  %647 = vmatprep.subr.bf16.mxu1 %v2133_v9  ;;  %v298_v9 = vsub.s32 1, %v293_v23 }
  0x3a   :  { %535 = vmatpush1.bf16.msra.mxu0 %v2130_v10  ;;  %648 = vmatpush1.bf16.msra.mxu1 %v2132_v11  ;;  %v306_v10 = vsub.s32 3, %v293_v23 }
  0x3b   :  { %943 = vmatprep.subr.bf16.mxu0 %v2872_v4  ;;  %986 = vmatprep.subr.bf16.mxu1 %v2876_v5 }
  0x3c   :  { %v3131_v42 = vrot.slane %v290_v14, %v306_v10 }
  0x3d   :  { %553 = vmatmul.mubr.bf16.vlgmr.msra.gmra.mxu0 %v2291_v6  ;;  %666 = vmatmul.mubr.bf16.vlgmr.msra.gmra.mxu1 %v2291_v6 }
  0x3e   :  { %944 = vmatpush1.bf16.msra.mxu0 %v2883_v0  ;;  %562 = vmatprep.mubr.bf16.mxu0 %v3678_v30 }
  0x3f   :  { %675 = vmatprep.mubr.bf16.mxu1 %v3678_v30  ;;  %945 = vmatprep.subr.bf16.mxu0 %v2888_v1 }
  0x40   :  { %987 = vmatpush1.bf16.msra.mxu1 %v2893_v2 }
  0x41   :  { %988 = vmatprep.subr.bf16.mxu1 %v2897_v3 }
  0x42   :  { %946 = vmatpush1.bf16.msra.mxu0 %v2903_v7 }
  0x43   :  { %947 = vmatprep.subr.bf16.mxu0 %v2909_v33 }
  0x44   :  { %989 = vmatpush1.bf16.msra.mxu1 %v2914_v34 }
  0x45   :  { %563 = vmatmul.mubr.bf16.gmra.mxu0 %v2292_v35  ;;  %676 = vmatmul.mubr.bf16.gmra.mxu1 %v2292_v35  ;;  %v3125_v35 = vrot.slane %v290_v14, %v294_v12 }
  0x46   :  { %572 = vmatprep.mubr.bf16.mxu0 %v3678_v30  ;;  %685 = vmatprep.mubr.bf16.mxu1 %v3678_v30 }
  0x47   :  { %948 = vmatpush1.bf16.msra.mxu0 %v2924_v36  ;;  %990 = vmatprep.subr.bf16.mxu1 %v2928_v37 }
  0x48   :  { %949 = vmatprep.subr.bf16.mxu0 %v2933_v38  ;;  %991 = vmatpush1.bf16.msra.mxu1 %v2937_v39 }
  0x49   :  { %992 = vmatprep.subr.bf16.mxu1 %v2941_v52 }
  0x4b   :  { %950 = vmatpush1.bf16.msra.mxu0 %v2949_v54 }
  0x4c   :  { %951 = vmatprep.subr.bf16.mxu0 %v2955_v53  ;;  %993 = vmatpush1.bf16.msra.mxu1 %v2959_v55 }
  0x4d   :  { %573 = vmatmul.mubr.bf16.gmra.mxu0 %v2293_v56  ;;  %686 = vmatmul.mubr.bf16.gmra.mxu1 %v2293_v56  ;;  %v3127_v56 = vrot.slane %v290_v14, %v302_v13 }
  0x4e   :  { %582 = vmatprep.mubr.bf16.mxu0 %v3678_v30  ;;  %695 = vmatprep.mubr.bf16.mxu1 %v3678_v30 }
  0x4f   :  { %952 = vmatpush1.bf16.msra.mxu0 %v2968_v48  ;;  %994 = vmatprep.subr.bf16.mxu1 %v2972_v50 }
  0x50   :  { %953 = vmatprep.subr.bf16.mxu0 %v2978_v49  ;;  %995 = vmatpush1.bf16.msra.mxu1 %v2982_v51 }
  0x51   :  { %996 = vmatprep.subr.bf16.mxu1 %v2986_v44 }
  0x53   :  { %954 = vmatpush1.bf16.msra.mxu0 %v2994_v46 }
  0x54   :  { %955 = vmatprep.subr.bf16.mxu0 %v3000_v57  ;;  %997 = vmatpush1.bf16.msra.mxu1 %v3004_v58 }
  0x55   :  { %583 = vmatmul.mubr.bf16.gmra.mxu0 %v2294_v59  ;;  %696 = vmatmul.mubr.bf16.gmra.mxu1 %v2294_v59  ;;  %v3129_v59 = vrot.slane %v290_v14, %v298_v9 }
  0x56   :  { %592 = vmatprep.mubr.bf16.mxu0 %v3678_v30  ;;  %705 = vmatprep.mubr.bf16.mxu1 %v3678_v30 }
  0x57   :  { %956 = vmatpush1.bf16.msra.mxu0 %v3013_v40  ;;  %998 = vmatprep.subr.bf16.mxu1 %v3017_v61 }
  0x58   :  { %957 = vmatprep.subr.bf16.mxu0 %v3023_v62  ;;  %999 = vmatpush1.bf16.msra.mxu1 %v3027_v63 }
  0x59   :  { %1000 = vmatprep.subr.bf16.mxu1 %v3031_v24 }
  0x5b   :  { %958 = vmatpush1.bf16.msra.mxu0 %v3039_v25 }
  0x5c   :  { %1001 = vmatpush1.bf16.msra.mxu1 %v3045_v26  ;;  %1083 = vmatprep.subr.bf16.mxu0 %v2872_v4 }
  0x5d   :  { %593 = vmatmul.mubr.bf16.gmra.mxu0 %v2295_v27  ;;  %706 = vmatmul.mubr.bf16.gmra.mxu1 %v2295_v27 }
  0x5e   :  { %602 = vmatprep.mubr.bf16.mxu0 %v3678_v30  ;;  %715 = vmatprep.mubr.bf16.mxu1 %v3678_v30 }
  0x5f   :  { %1126 = vmatprep.subr.bf16.mxu1 %v2876_v5 }
  0x65   :  { %603 = vmatmul.mubr.bf16.gmra.mxu0 %v2296_v31  ;;  %716 = vmatmul.mubr.bf16.gmra.mxu1 %v2296_v31 }
  0x66   :  { %612 = vmatprep.mubr.bf16.mxu0 %v3678_v30  ;;  %725 = vmatprep.mubr.bf16.mxu1 %v3678_v30 }
  0x6d   :  { %613 = vmatmul.mubr.bf16.gmra.mxu0 %v2297_v32  ;;  %726 = vmatmul.mubr.bf16.gmra.mxu1 %v2297_v32 }
  0x6e   :  { %622 = vmatprep.mubr.bf16.mxu0 %v3678_v30  ;;  %735 = vmatprep.mubr.bf16.mxu1 %v3678_v30 }
  0x75   :  { %623 = vmatmul.mubr.bf16.gmra.mxu0 %v2298_v20  ;;  %736 = vmatmul.mubr.bf16.gmra.mxu1 %v2298_v20 }
  0x76   :  { %975 = vmatprep.mubr.bf16.mxu0 %v3678_v30  ;;  %1018 = vmatprep.mubr.bf16.mxu1 %v3678_v30 }
  0x7d   :  { %976 = vmatmul.mubr.bf16.vlgmr.msra.gmra.mxu0 %v2464_v21  ;;  %1019 = vmatmul.mubr.bf16.vlgmr.msra.gmra.mxu1 %v2464_v21 }
  0x7e   :  { %1084 = vmatpush1.bf16.msra.mxu0 %v2883_v0  ;;  %1127 = vmatpush1.bf16.msra.mxu1 %v2893_v2 }
  0x7f   :  { %1085 = vmatprep.subr.bf16.mxu0 %v2888_v1  ;;  %1128 = vmatprep.subr.bf16.mxu1 %v2897_v3 }
  0x80   :  { %1115 = vmatprep.mubr.bf16.mxu0 %v3678_v30  ;;  %1158 = vmatprep.mubr.bf16.mxu1 %v3678_v30 }
  0x82   :  { %1086 = vmatpush1.bf16.msra.mxu0 %v2903_v7  ;;  %1129 = vmatpush1.bf16.msra.mxu1 %v2914_v34 }
  0x83   :  { %1087 = vmatprep.subr.bf16.mxu0 %v2909_v33  ;;  %1130 = vmatprep.subr.bf16.mxu1 %v2928_v37 }
  0x86   :  { %1088 = vmatpush1.bf16.msra.mxu0 %v2924_v36  ;;  %1131 = vmatpush1.bf16.msra.mxu1 %v2937_v39 }
  0x87   :  { %1089 = vmatprep.subr.bf16.mxu0 %v2933_v38  ;;  %1132 = vmatprep.subr.bf16.mxu1 %v2941_v52 }
  0x8a   :  { %1090 = vmatpush1.bf16.msra.mxu0 %v2949_v54  ;;  %1133 = vmatpush1.bf16.msra.mxu1 %v2959_v55 }
  0x8b   :  { %1091 = vmatprep.subr.bf16.mxu0 %v2955_v53  ;;  %1134 = vmatprep.subr.bf16.mxu1 %v2972_v50 }
  0x8e   :  { %1092 = vmatpush1.bf16.msra.mxu0 %v2968_v48  ;;  %1135 = vmatpush1.bf16.msra.mxu1 %v2982_v51 }
  0x8f   :  { %1093 = vmatprep.subr.bf16.mxu0 %v2978_v49  ;;  %1136 = vmatprep.subr.bf16.mxu1 %v2986_v44 }
  0x92   :  { %1094 = vmatpush1.bf16.msra.mxu0 %v2994_v46  ;;  %1137 = vmatpush1.bf16.msra.mxu1 %v3004_v58 }
  0x93   :  { %1095 = vmatprep.subr.bf16.mxu0 %v3000_v57  ;;  %1138 = vmatprep.subr.bf16.mxu1 %v3017_v61 }
  0x96   :  { %1096 = vmatpush1.bf16.msra.mxu0 %v3013_v40  ;;  %1139 = vmatpush1.bf16.msra.mxu1 %v3027_v63 }
  0x97   :  { %1097 = vmatprep.subr.bf16.mxu0 %v3023_v62  ;;  %1140 = vmatprep.subr.bf16.mxu1 %v3031_v24 }
  0x9a   :  { %1098 = vmatpush1.bf16.msra.mxu0 %v3039_v25  ;;  %1141 = vmatpush1.bf16.msra.mxu1 %v3045_v26 }
  0x9b   :  { %1224 = vmatprep.subr.bf16.mxu0 %v2872_v4  ;;  %1267 = vmatprep.subr.bf16.mxu1 %v2876_v5 }
  0xfd   :  { %v3106_v16 = vpop.f32.mrf.mxu0  ;;  %v3108_v17 = vpop.f32.mrf.mxu1 }
  0xff   :  { %v3110_v18 = vpop.f32.mrf.mxu0  ;;  %v3112_v19 = vpop.f32.mrf.mxu1 }
 0x101   :  { %v3117_v15 = vpop.f32.mrf.mxu0  ;;  %v3119_v8 = vpop.f32.mrf.mxu1 }
 0x103   :  { %v3121_v11 = vpop.f32.mrf.mxu0  ;;  %v3123_v6 = vpop.f32.mrf.mxu1 }
 0x105   :  { %v564_v45 = vpop.f32.mrf.mxu0  ;;  %v677_v47 = vpop.f32.mrf.mxu1 }
 0x106   :  { %v3134_v60 = vadd.f32 %v564_v45, %v3125_v35  ;;  %v3137_v41 = vadd.f32 %v677_v47, %v3127_v56 }
 0x107   :  { %v566_v43 = vpop.f32.mrf.mxu0  ;;  %v679_v28 = vpop.f32.mrf.mxu1 }
 0x108   :  { %v3140_v29 = vadd.f32 %v566_v43, %v3129_v59  ;;  %v3143_v27 = vadd.f32 %v679_v28, %v3131_v42 }
 0x109   :  { %v568_v31 = vpop.f32.mrf.mxu0  ;;  %v681_v32 = vpop.f32.mrf.mxu1 }
 0x10a   :  { %3696 = vst [vmem:[#allocation17_spill] sm:$0xff] %v3143_v27  ;;  %v3146_v20 = vadd.f32 %v568_v31, %v3125_v35  ;;  %v3149_v21 = vadd.f32 %v681_v32, %v3127_v56 }
 0x10b   :  { %v570_v22 = vpop.f32.mrf.mxu0  ;;  %v683_v23 = vpop.f32.mrf.mxu1 }
 0x10c   :  { %3697 = vst [vmem:[#allocation15_spill] sm:$0xff] %v3149_v21  ;;  %v3152_v12 = vadd.f32 %v570_v22, %v3129_v59  ;;  %v3155_v13 = vadd.f32 %v683_v23, %v3131_v42 }
 0x10d   :  { %v574_v14 = vpop.f32.mrf.mxu0  ;;  %v687_v9 = vpop.f32.mrf.mxu1 }
 0x10e   :  { %3698 = vst [vmem:[#allocation18_spill] sm:$0xff] %v3155_v13  ;;  %v3158_v10 = vadd.f32 %v574_v14, %v3125_v35  ;;  %v3161_v45 = vadd.f32 %v687_v9, %v3127_v56 }
 0x10f   :  { %v576_v47 = vpop.f32.mrf.mxu0  ;;  %v689_v43 = vpop.f32.mrf.mxu1 }
 0x110   :  { %3699 = vst [vmem:[#allocation16_spill] sm:$0xff] %v3158_v10  ;;  %3700 = vst [vmem:[#allocation13_spill] sm:$0xff] %v3161_v45  ;;  %v3164_v28 = vadd.f32 %v576_v47, %v3129_v59  ;;  %v3167_v31 = vadd.f32 %v689_v43, %v3131_v42 }
 0x111   :  { %v578_v32 = vpop.f32.mrf.mxu0  ;;  %v691_v22 = vpop.f32.mrf.mxu1 }
 0x112   :  { %3701 = vst [vmem:[#allocation11_spill] sm:$0xff] %v3164_v28  ;;  %3702 = vst [vmem:[#allocation14_spill] sm:$0xff] %v3167_v31  ;;  %v3170_v23 = vadd.f32 %v578_v32, %v3125_v35  ;;  %v3173_v30 = vadd.f32 %v691_v22, %v3127_v56 }
 0x113   :  { %v580_v14 = vpop.f32.mrf.mxu0  ;;  %v693_v10 = vpop.f32.mrf.mxu1 }
 0x114   :  { %3703 = vst [vmem:[#allocation12_spill] sm:$0xff] %v3170_v23  ;;  %3704 = vst [vmem:[#allocation19_spill] sm:$0xff] %v3173_v30  ;;  %v3176_v9 = vadd.f32 %v580_v14, %v3129_v59  ;;  %v3179_v45 = vadd.f32 %v693_v10, %v3131_v42 }
 0x115   :  { %v584_v47 = vpop.f32.mrf.mxu0  ;;  %v697_v28 = vpop.f32.mrf.mxu1 }
 0x116   :  { %3705 = vst [vmem:[#allocation20_spill] sm:$0xff] %v3176_v9  ;;  %3706 = vst [vmem:[#allocation21_spill] sm:$0xff] %v3179_v45  ;;  %v3182_v43 = vadd.f32 %v584_v47, %v3125_v35  ;;  %v3185_v31 = vadd.f32 %v697_v28, %v3127_v56 }
 0x117   :  { %v586_v32 = vpop.f32.mrf.mxu0  ;;  %v699_v23 = vpop.f32.mrf.mxu1 }
 0x118   :  { %3707 = vst [vmem:[#allocation22_spill] sm:$0xff] %v3182_v43  ;;  %3708 = vst [vmem:[#allocation23_spill] sm:$0xff] %v3185_v31  ;;  %v3188_v22 = vadd.f32 %v586_v32, %v3129_v59  ;;  %v3191_v30 = vadd.f32 %v699_v23, %v3131_v42 }
 0x119   :  { %v588_v14 = vpop.f32.mrf.mxu0  ;;  %v701_v9 = vpop.f32.mrf.mxu1 }
 0x11a   :  { %3709 = vst [vmem:[#allocation24_spill] sm:$0xff] %v3188_v22  ;;  %3710 = vst [vmem:[#allocation25_spill] sm:$0xff] %v3191_v30  ;;  %v3194_v10 = vadd.f32 %v588_v14, %v3125_v35  ;;  %v3197_v45 = vadd.f32 %v701_v9, %v3127_v56 }
 0x11b   :  { %v590_v47 = vpop.f32.mrf.mxu0  ;;  %v703_v43 = vpop.f32.mrf.mxu1 }
 0x11c   :  { %3711 = vst [vmem:[#allocation26_spill] sm:$0xff] %v3194_v10  ;;  %3712 = vst [vmem:[#allocation27_spill] sm:$0xff] %v3197_v45  ;;  %v3200_v28 = vadd.f32 %v590_v47, %v3129_v59  ;;  %v3203_v31 = vadd.f32 %v703_v43, %v3131_v42 }
 0x11d   :  { %v594_v32 = vpop.f32.mrf.mxu0  ;;  %v707_v22 = vpop.f32.mrf.mxu1 }
 0x11e   :  { %3713 = vst [vmem:[#allocation28_spill] sm:$0xff] %v3200_v28  ;;  %3714 = vst [vmem:[#allocation29_spill] sm:$0xff] %v3203_v31  ;;  %v3206_v23 = vadd.f32 %v594_v32, %v3125_v35  ;;  %v3209_v30 = vadd.f32 %v707_v22, %v3127_v56 }
 0x11f   :  { %v596_v14 = vpop.f32.mrf.mxu0  ;;  %v709_v10 = vpop.f32.mrf.mxu1 }
 0x120   :  { %3715 = vst [vmem:[#allocation30_spill] sm:$0xff] %v3206_v23  ;;  %3716 = vst [vmem:[#allocation31_spill] sm:$0xff] %v3209_v30  ;;  %v3212_v9 = vadd.f32 %v596_v14, %v3129_v59  ;;  %v3215_v45 = vadd.f32 %v709_v10, %v3131_v42 }
 0x121   :  { %v598_v47 = vpop.f32.mrf.mxu0  ;;  %v711_v28 = vpop.f32.mrf.mxu1 }
 0x122   :  { %3717 = vst [vmem:[#allocation32_spill] sm:$0xff] %v3212_v9  ;;  %3718 = vst [vmem:[#allocation33_spill] sm:$0xff] %v3215_v45  ;;  %v3218_v43 = vadd.f32 %v598_v47, %v3125_v35  ;;  %v3221_v31 = vadd.f32 %v711_v28, %v3127_v56 }
 0x123   :  { %v600_v32 = vpop.f32.mrf.mxu0  ;;  %v713_v23 = vpop.f32.mrf.mxu1 }
 0x124   :  { %3719 = vst [vmem:[#allocation34_spill] sm:$0xff] %v3218_v43  ;;  %3720 = vst [vmem:[#allocation35_spill] sm:$0xff] %v3221_v31  ;;  %v3224_v22 = vadd.f32 %v600_v32, %v3129_v59  ;;  %v3227_v30 = vadd.f32 %v713_v23, %v3131_v42 }
 0x125   :  { %v604_v14 = vpop.f32.mrf.mxu0  ;;  %v717_v9 = vpop.f32.mrf.mxu1 }
 0x126   :  { %3721 = vst [vmem:[#allocation36_spill] sm:$0xff] %v3224_v22  ;;  %3722 = vst [vmem:[#allocation37_spill] sm:$0xff] %v3227_v30  ;;  %v3230_v10 = vadd.f32 %v604_v14, %v3125_v35  ;;  %v3233_v45 = vadd.f32 %v717_v9, %v3127_v56 }
 0x127   :  { %v606_v47 = vpop.f32.mrf.mxu0  ;;  %v719_v43 = vpop.f32.mrf.mxu1 }
 0x128   :  { %3723 = vst [vmem:[#allocation38_spill] sm:$0xff] %v3230_v10  ;;  %3724 = vst [vmem:[#allocation39_spill] sm:$0xff] %v3233_v45  ;;  %v3236_v28 = vadd.f32 %v606_v47, %v3129_v59  ;;  %v3239_v31 = vadd.f32 %v719_v43, %v3131_v42 }
 0x129   :  { %v608_v32 = vpop.f32.mrf.mxu0  ;;  %v721_v22 = vpop.f32.mrf.mxu1 }
 0x12a   :  { %3725 = vst [vmem:[#allocation40_spill] sm:$0xff] %v3236_v28  ;;  %3726 = vst [vmem:[#allocation41_spill] sm:$0xff] %v3239_v31  ;;  %v3242_v23 = vadd.f32 %v608_v32, %v3125_v35  ;;  %v3245_v30 = vadd.f32 %v721_v22, %v3127_v56 }
 0x12b   :  { %v610_v14 = vpop.f32.mrf.mxu0  ;;  %v723_v10 = vpop.f32.mrf.mxu1 }
 0x12c   :  { %3727 = vst [vmem:[#allocation42_spill] sm:$0xff] %v3242_v23  ;;  %3728 = vst [vmem:[#allocation43_spill] sm:$0xff] %v3245_v30  ;;  %v3248_v9 = vadd.f32 %v610_v14, %v3129_v59  ;;  %v3251_v45 = vadd.f32 %v723_v10, %v3131_v42 }
 0x12d   :  { %v614_v47 = vpop.f32.mrf.mxu0  ;;  %v727_v28 = vpop.f32.mrf.mxu1 }
 0x12e   :  { %3729 = vst [vmem:[#allocation44_spill] sm:$0xff] %v3248_v9  ;;  %3730 = vst [vmem:[#allocation45_spill] sm:$0xff] %v3251_v45  ;;  %v3254_v43 = vadd.f32 %v614_v47, %v3125_v35  ;;  %v3257_v31 = vadd.f32 %v727_v28, %v3127_v56 }
 0x12f   :  { %v616_v32 = vpop.f32.mrf.mxu0  ;;  %v729_v23 = vpop.f32.mrf.mxu1 }
 0x130   :  { %3731 = vst [vmem:[#allocation46_spill] sm:$0xff] %v3254_v43  ;;  %3732 = vst [vmem:[#allocation47_spill] sm:$0xff] %v3257_v31  ;;  %v3260_v22 = vadd.f32 %v616_v32, %v3129_v59  ;;  %v3263_v30 = vadd.f32 %v729_v23, %v3131_v42 }
 0x131   :  { %v618_v14 = vpop.f32.mrf.mxu0  ;;  %v731_v9 = vpop.f32.mrf.mxu1 }
 0x132   :  { %3733 = vst [vmem:[#allocation48_spill] sm:$0xff] %v3260_v22  ;;  %3734 = vst [vmem:[#allocation49_spill] sm:$0xff] %v3263_v30  ;;  %v3266_v10 = vadd.f32 %v618_v14, %v3125_v35  ;;  %v3269_v45 = vadd.f32 %v731_v9, %v3127_v56 }
 0x133   :  { %v620_v47 = vpop.f32.mrf.mxu0  ;;  %v733_v43 = vpop.f32.mrf.mxu1 }
 0x134   :  { %3735 = vst [vmem:[#allocation50_spill] sm:$0xff] %v3266_v10  ;;  %3736 = vst [vmem:[#allocation51_spill] sm:$0xff] %v3269_v45  ;;  %v3272_v28 = vadd.f32 %v620_v47, %v3129_v59  ;;  %v3275_v31 = vadd.f32 %v733_v43, %v3131_v42 }
 0x135   :  { %v624_v32 = vpop.f32.mrf.mxu0  ;;  %v737_v22 = vpop.f32.mrf.mxu1 }
 0x136   :  { %3737 = vst [vmem:[#allocation52_spill] sm:$0xff] %v3272_v28  ;;  %3738 = vst [vmem:[#allocation53_spill] sm:$0xff] %v3275_v31  ;;  %v3278_v23 = vadd.f32 %v624_v32, %v3125_v35  ;;  %v3281_v30 = vadd.f32 %v737_v22, %v3127_v56  ;;  %v555_v22 = vadd.f32 %v3106_v16, %v3125_v35 }
 0x137   :  { %v626_v14 = vpop.f32.mrf.mxu0  ;;  %v739_v10 = vpop.f32.mrf.mxu1 }
 0x138   :  { %3739 = vst [vmem:[#allocation54_spill] sm:$0xff] %v3278_v23  ;;  %3740 = vst [vmem:[#allocation55_spill] sm:$0xff] %v3281_v30  ;;  %v3284_v9 = vadd.f32 %v626_v14, %v3129_v59  ;;  %v3287_v45 = vadd.f32 %v739_v10, %v3131_v42 }
 0x139   :  { %v628_v47 = vpop.f32.mrf.mxu0  ;;  %v741_v28 = vpop.f32.mrf.mxu1 }
 0x13a   :  { %3741 = vst [vmem:[#allocation56_spill] sm:$0xff] %v3284_v9  ;;  %3742 = vst [vmem:[#allocation57_spill] sm:$0xff] %v3287_v45  ;;  %v3290_v43 = vadd.f32 %v628_v47, %v3125_v35  ;;  %v3293_v31 = vadd.f32 %v741_v28, %v3127_v56  ;;  %v557_v47 = vadd.f32 %v3110_v18, %v3129_v59 }
 0x13b   :  { %v630_v32 = vpop.f32.mrf.mxu0  ;;  %v743_v23 = vpop.f32.mrf.mxu1  ;;  %v668_v28 = vadd.f32 %v3108_v17, %v3127_v56  ;;  %v559_v9 = vadd.f32 %v3117_v15, %v3125_v35  ;;  %v672_v15 = vadd.f32 %v3119_v8, %v3127_v56 }
 0x13c   :  { %3743 = vst [vmem:[#allocation58_spill] sm:$0xff] %v3290_v43  ;;  %3744 = vst [vmem:[#allocation59_spill] sm:$0xff] %v3293_v31  ;;  %v3298_v30 = vadd.f32 %v630_v32, %v3129_v59  ;;  %v3301_v14 = vadd.f32 %v743_v23, %v3131_v42  ;;  %v561_v23 = vadd.f32 %v3121_v11, %v3129_v59 }
 0x13d   :  { %v977_v10 = vpop.f32.mrf.mxu0  ;;  %v1020_v45 = vpop.f32.mrf.mxu1  ;;  %v674_v59 = vadd.f32 %v3123_v6, %v3131_v42 }
 0x13e   :  { %3745 = vst [vmem:[#allocation60_spill] sm:$0xff] %v3298_v30  ;;  %3746 = vst [vmem:[#allocation61_spill] sm:$0xff] %v3301_v14  ;;  %v1029_v43 = vadd.f32 %v977_v10, %v555_v22  ;;  %v1031_v32 = vadd.f32 %v1020_v45, %v668_v28 }
 0x13f   :  { %v979_v31 = vpop.f32.mrf.mxu0  ;;  %v1022_v30 = vpop.f32.mrf.mxu1 }
 0x140   :  { %v1037_v16 = vmul.f32 0.5, %v1029_v43  ;;  %v1030_v13 = vadd.f32 %v979_v31, %v557_v47  ;;  %v670_v31 = vadd.f32 %v3112_v19, %v3131_v42 }
 0x141   :  { %v981_v27 = vpop.f32.mrf.mxu0  ;;  %v1024_v17 = vpop.f32.mrf.mxu1 }
 0x142   :  { %2299 = vtanh.f32 %v1037_v16  ;;  %v1045_v14 = vmul.f32 0.5, %v1030_v13  ;;  %v1033_v21 = vadd.f32 %v981_v27, %v559_v9  ;;  %v1035_v45 = vadd.f32 %v1024_v17, %v672_v15 }
 0x143   :  { %v983_v18 = vpop.f32.mrf.mxu0  ;;  %v1026_v11 = vpop.f32.mrf.mxu1  ;;  %v1032_v27 = vadd.f32 %v1022_v30, %v670_v31 }
 0x144   :  { %2301 = vtanh.f32 %v1045_v14  ;;  %v1038_v22 = vmul.f32 0.5, %v1033_v21  ;;  %v1034_v10 = vadd.f32 %v983_v18, %v561_v23  ;;  %v1036_v21 = vadd.f32 %v1026_v11, %v674_v59 }
 0x145   :  { %2303 = vtanh.f32 %v1031_v32  ;;  %v1055_v14 = vmul.f32 0.5, %v1032_v27 }
 0x146   :  { %2305 = vtanh.f32 %v1038_v22  ;;  %v1046_v35 = vmul.f32 0.5, %v1034_v10  ;;  %v1056_v28 = vmul.f32 0.5, %v1036_v21 }
 0x148   :  { %2307 = vtanh.f32 %v1046_v35 }
 0x149   :  { %2309 = vtanh.f32 %v1035_v45 }
 0x14a   :  { %2311 = vtanh.f32 %v1055_v14 }
 0x14b   :  { %2313 = vtanh.f32 %v1056_v28 }
 0x14f   :  { %v2300_v13 = vpop.eup %2299 }
 0x150   :  { %v1041_v9 = vadd.f32 1.0, %v2300_v13 }
 0x151   :  { %v2302_v43 = vpop.eup %2301 }
 0x152   :  { %v2304_v47 = vpop.eup %2303  ;;  %v1043_v8 = vmul.f32 0.5, %v1041_v9  ;;  %v1049_v56 = vadd.f32 1.0, %v2302_v43 }
 0x153   :  { %v2306_v16 = vpop.eup %2305 }
 0x154   :  { %v1051_v32 = vmul.f32 0.5, %v1049_v56  ;;  %v1065_v23 = vmul.f32 %v2304_v47, %v1043_v8  ;;  %v1042_v18 = vadd.f32 1.0, %v2306_v16  ;;  %v3747_v56 = vmov 0  }
 0x155   :  { %v2308_v19 = vpop.eup %2307 }
 0x156   :  { %v1063_v22 = vmul.f32 0.0, %v1051_v32  ;;  %v1044_v10 = vmul.f32 0.5, %v1042_v18  ;;  %v1050_v6 = vadd.f32 1.0, %v2308_v19  ;;  %v2310_v17 = vpop.eup %2309 }
 0x157   :  { %v2312_v31 = vpop.eup %2311 }
 0x158   :  { %v3317_v30 = vadd.f32 %v1065_v23, %v1063_v22  ;;  %v1052_v42 = vmul.f32 0.5, %v1050_v6  ;;  %v1066_v35 = vmul.f32 %v2310_v17, %v1044_v10  ;;  %v2314_v11 = vpop.eup %2313  ;;  %v1059_v59 = vadd.f32 1.0, %v2312_v31 }
 0x159   :  { %v1060_v27 = vadd.f32 1.0, %v2314_v11 }
 0x15a   :  { %v1064_v15 = vmul.f32 0.0, %v1052_v42  ;;  %2315 = vtanh.f32 %v3317_v30  ;;  %v1061_v13 = vmul.f32 0.5, %v1059_v59 }
 0x15b   :  { %v1062_v9 = vmul.f32 0.5, %v1060_v27 }
 0x15c   :  { %v3320_v45 = vadd.f32 %v1066_v35, %v1064_v15 }
 0x15e   :  { %2317 = vtanh.f32 %v3320_v45 }
 0x167   :  { %v2316_v21 = vpop.eup %2315 }
 0x168   :  { %v1071_v14 = vmul.f32 %v2316_v21, %v1061_v13  ;;  %v3750_v13 = vld [vmem:[#allocation18_spill] sm:$0xff] }
 0x16b   :  { %v2318_v43 = vpop.eup %2317 }
 0x16c   :  { %v1072_v47 = vmul.f32 %v2318_v43, %v1062_v9 }
 0x16e   :  { %v1073_v8 = vpack.c.bf16 %v1072_v47, %v1071_v14 }
 0x170   :  { %2246 = vst [vmem:[%s3667_s4] sm:$0xff] %v1073_v8   ;;  %1116 = vmatmul.mubr.bf16.vlgmr.msra.gmra.mxu0 %v1073_v8  ;;  %1159 = vmatmul.mubr.bf16.vlgmr.msra.gmra.mxu1 %v1073_v8 }
 0x171   :  { %1225 = vmatpush1.bf16.msra.mxu0 %v2883_v0  ;;  %1268 = vmatpush1.bf16.msra.mxu1 %v2893_v2 }
 0x172   :  { %1226 = vmatprep.subr.bf16.mxu0 %v2888_v1  ;;  %1269 = vmatprep.subr.bf16.mxu1 %v2897_v3 }
 0x173   :  { %1256 = vmatprep.mubr.bf16.mxu0 %v3747_v56  ;;  %1299 = vmatprep.mubr.bf16.mxu1 %v3747_v56 }
 0x175   :  { %1227 = vmatpush1.bf16.msra.mxu0 %v2903_v7  ;;  %1270 = vmatpush1.bf16.msra.mxu1 %v2914_v34 }
 0x176   :  { %1228 = vmatprep.subr.bf16.mxu0 %v2909_v33  ;;  %1271 = vmatprep.subr.bf16.mxu1 %v2928_v37 }
 0x179   :  { %1229 = vmatpush1.bf16.msra.mxu0 %v2924_v36  ;;  %1272 = vmatpush1.bf16.msra.mxu1 %v2937_v39 }
 0x17a   :  { %1230 = vmatprep.subr.bf16.mxu0 %v2933_v38  ;;  %1273 = vmatprep.subr.bf16.mxu1 %v2941_v52 }
 0x17d   :  { %1231 = vmatpush1.bf16.msra.mxu0 %v2949_v54  ;;  %1274 = vmatpush1.bf16.msra.mxu1 %v2959_v55 }
 0x17e   :  { %1232 = vmatprep.subr.bf16.mxu0 %v2955_v53  ;;  %1275 = vmatprep.subr.bf16.mxu1 %v2972_v50 }
 0x181   :  { %1233 = vmatpush1.bf16.msra.mxu0 %v2968_v48  ;;  %1276 = vmatpush1.bf16.msra.mxu1 %v2982_v51 }
 0x182   :  { %1234 = vmatprep.subr.bf16.mxu0 %v2978_v49  ;;  %1277 = vmatprep.subr.bf16.mxu1 %v2986_v44 }
 0x185   :  { %1235 = vmatpush1.bf16.msra.mxu0 %v2994_v46  ;;  %1278 = vmatpush1.bf16.msra.mxu1 %v3004_v58 }
 0x186   :  { %1236 = vmatprep.subr.bf16.mxu0 %v3000_v57  ;;  %1279 = vmatprep.subr.bf16.mxu1 %v3017_v61 }
 0x189   :  { %1237 = vmatpush1.bf16.msra.mxu0 %v3013_v40  ;;  %1280 = vmatpush1.bf16.msra.mxu1 %v3027_v63 }
 0x18a   :  { %1238 = vmatprep.subr.bf16.mxu0 %v3023_v62  ;;  %1281 = vmatprep.subr.bf16.mxu1 %v3031_v24 }
 0x18d   :  { %1239 = vmatpush1.bf16.msra.mxu0 %v3039_v25  ;;  %1282 = vmatpush1.bf16.msra.mxu1 %v3045_v26 }
 0x18e   :  { %1365 = vmatprep.subr.bf16.mxu0 %v2872_v4  ;;  %1408 = vmatprep.subr.bf16.mxu1 %v2876_v5 }
 0x230   :  { %v1117_v28 = vpop.f32.mrf.mxu0  ;;  %v1160_v16 = vpop.f32.mrf.mxu1 }
 0x231   :  { %v1169_v32 = vadd.f32 %v1117_v28, %v3134_v60  ;;  %v1171_v10 = vadd.f32 %v1160_v16, %v3137_v41  ;;  %v3748_v60 = vld [vmem:[#allocation15_spill] sm:$0xff]  ;;  %v3749_v41 = vld [vmem:[#allocation17_spill] sm:$0xff] }
 0x232   :  { %v1119_v23 = vpop.f32.mrf.mxu0  ;;  %v1162_v18 = vpop.f32.mrf.mxu1 }
 0x233   :  { %v1177_v19 = vmul.f32 0.5, %v1169_v32  ;;  %v1170_v22 = vadd.f32 %v1119_v23, %v3140_v29  ;;  %v1172_v21 = vadd.f32 %v1162_v18, %v3749_v41 }
 0x234   :  { %v1121_v6 = vpop.f32.mrf.mxu0  ;;  %v1164_v15 = vpop.f32.mrf.mxu1 }
 0x235   :  { %2319 = vtanh.f32 %v1177_v19  ;;  %v1185_v42 = vmul.f32 0.5, %v1170_v22  ;;  %v1173_v17 = vadd.f32 %v1121_v6, %v3146_v20  ;;  %v1175_v59 = vadd.f32 %v1164_v15, %v3748_v60 }
 0x236   :  { %v1123_v35 = vpop.f32.mrf.mxu0  ;;  %v1166_v29 = vpop.f32.mrf.mxu1  ;;  %v1195_v47 = vmul.f32 0.5, %v1172_v21 }
 0x237   :  { %2321 = vtanh.f32 %v1185_v42  ;;  %v1178_v31 = vmul.f32 0.5, %v1173_v17  ;;  %v1174_v11 = vadd.f32 %v1123_v35, %v3152_v12  ;;  %v1176_v9 = vadd.f32 %v1166_v29, %v3750_v13 }
 0x238   :  { %2323 = vtanh.f32 %v1171_v10 }
 0x239   :  { %2325 = vtanh.f32 %v1178_v31  ;;  %v1186_v27 = vmul.f32 0.5, %v1174_v11  ;;  %v1196_v12 = vmul.f32 0.5, %v1176_v9 }
 0x23b   :  { %2327 = vtanh.f32 %v1186_v27 }
 0x23c   :  { %2329 = vtanh.f32 %v1175_v59 }
 0x23d   :  { %2331 = vtanh.f32 %v1195_v47 }
 0x23e   :  { %2333 = vtanh.f32 %v1196_v12 }
 0x242   :  { %v2320_v43 = vpop.eup %2319 }
 0x243   :  { %v1181_v20 = vadd.f32 1.0, %v2320_v43 }
 0x244   :  { %v2322_v14 = vpop.eup %2321 }
 0x245   :  { %v2324_v8 = vpop.eup %2323  ;;  %v1183_v28 = vmul.f32 0.5, %v1181_v20  ;;  %v1189_v16 = vadd.f32 1.0, %v2322_v14 }
 0x246   :  { %v2326_v32 = vpop.eup %2325 }
 0x247   :  { %v1191_v23 = vmul.f32 0.5, %v1189_v16  ;;  %v1205_v19 = vmul.f32 %v2324_v8, %v1183_v28  ;;  %v1182_v22 = vadd.f32 1.0, %v2326_v32  ;;  %v3751_v8 = vld [vmem:[#allocation16_spill] sm:$0xff] }
 0x248   :  { %v2328_v10 = vpop.eup %2327 }
 0x249   :  { %v1203_v6 = vmul.f32 %v1191_v23, %v3317_v30  ;;  %v1184_v42 = vmul.f32 0.5, %v1182_v22  ;;  %v1190_v18 = vadd.f32 1.0, %v2328_v10  ;;  %v2330_v17 = vpop.eup %2329  ;;  %v3752_v23 = vld [vmem:[#allocation11_spill] sm:$0xff]  ;;  %v3753_v22 = vld [vmem:[#allocation13_spill] sm:$0xff] }
 0x24a   :  { %v2332_v59 = vpop.eup %2331 }
 0x24b   :  { %v3369_v15 = vadd.f32 %v1205_v19, %v1203_v6  ;;  %v1192_v35 = vmul.f32 0.5, %v1190_v18  ;;  %v1206_v31 = vmul.f32 %v2330_v17, %v1184_v42  ;;  %v2334_v27 = vpop.eup %2333  ;;  %v1199_v29 = vadd.f32 1.0, %v2332_v59  ;;  %v3754_v18 = vld [vmem:[#allocation12_spill] sm:$0xff] }
 0x24c   :  { %v1200_v30 = vadd.f32 1.0, %v2334_v27  ;;  %v3755_v59 = vld [vmem:[#allocation20_spill] sm:$0xff] }
 0x24d   :  { %v1204_v11 = vmul.f32 %v1192_v35, %v3320_v45  ;;  %2335 = vtanh.f32 %v3369_v15  ;;  %v1201_v21 = vmul.f32 0.5, %v1199_v29  ;;  %v3756_v29 = vld [vmem:[#allocation19_spill] sm:$0xff] }
 0x24e   :  { %v1202_v13 = vmul.f32 0.5, %v1200_v30 }
 0x24f   :  { %v3373_v60 = vadd.f32 %v1206_v31, %v1204_v11 }
 0x251   :  { %2337 = vtanh.f32 %v3373_v60 }
 0x25a   :  { %v2336_v41 = vpop.eup %2335 }
 0x25b   :  { %v1211_v43 = vmul.f32 %v2336_v41, %v1201_v21 }
 0x25e   :  { %v2338_v9 = vpop.eup %2337 }
 0x25f   :  { %v1212_v20 = vmul.f32 %v2338_v9, %v1202_v13  ;;  %v3757_v13 = vld [vmem:[#allocation14_spill] sm:$0xff] }
 0x261   :  { %v1213_v14 = vpack.c.bf16 %v1212_v20, %v1211_v43  ;;  %v3758_v43 = vld [vmem:[#allocation21_spill] sm:$0xff] }
 0x263   :  { %2282 = vst [vmem:[%s3667_s4 + $0x8] sm:$0xff] %v1213_v14   ;;  %1257 = vmatmul.mubr.bf16.vlgmr.msra.gmra.mxu0 %v1213_v14  ;;  %1300 = vmatmul.mubr.bf16.vlgmr.msra.gmra.mxu1 %v1213_v14 }
 0x264   :  { %1366 = vmatpush1.bf16.msra.mxu0 %v2883_v0  ;;  %1409 = vmatpush1.bf16.msra.mxu1 %v2893_v2 }
 0x265   :  { %1367 = vmatprep.subr.bf16.mxu0 %v2888_v1  ;;  %1410 = vmatprep.subr.bf16.mxu1 %v2897_v3 }
 0x266   :  { %1397 = vmatprep.mubr.bf16.mxu0 %v3747_v56  ;;  %1440 = vmatprep.mubr.bf16.mxu1 %v3747_v56 }
 0x268   :  { %1368 = vmatpush1.bf16.msra.mxu0 %v2903_v7  ;;  %1411 = vmatpush1.bf16.msra.mxu1 %v2914_v34 }
 0x269   :  { %1369 = vmatprep.subr.bf16.mxu0 %v2909_v33  ;;  %1412 = vmatprep.subr.bf16.mxu1 %v2928_v37 }
 0x26c   :  { %1370 = vmatpush1.bf16.msra.mxu0 %v2924_v36  ;;  %1413 = vmatpush1.bf16.msra.mxu1 %v2937_v39 }
 0x26d   :  { %1371 = vmatprep.subr.bf16.mxu0 %v2933_v38  ;;  %1414 = vmatprep.subr.bf16.mxu1 %v2941_v52 }
 0x270   :  { %1372 = vmatpush1.bf16.msra.mxu0 %v2949_v54  ;;  %1415 = vmatpush1.bf16.msra.mxu1 %v2959_v55 }
 0x271   :  { %1373 = vmatprep.subr.bf16.mxu0 %v2955_v53  ;;  %1416 = vmatprep.subr.bf16.mxu1 %v2972_v50 }
 0x274   :  { %1374 = vmatpush1.bf16.msra.mxu0 %v2968_v48  ;;  %1417 = vmatpush1.bf16.msra.mxu1 %v2982_v51 }
 0x275   :  { %1375 = vmatprep.subr.bf16.mxu0 %v2978_v49  ;;  %1418 = vmatprep.subr.bf16.mxu1 %v2986_v44 }
 0x278   :  { %1376 = vmatpush1.bf16.msra.mxu0 %v2994_v46  ;;  %1419 = vmatpush1.bf16.msra.mxu1 %v3004_v58 }
 0x279   :  { %1377 = vmatprep.subr.bf16.mxu0 %v3000_v57  ;;  %1420 = vmatprep.subr.bf16.mxu1 %v3017_v61 }
 0x27c   :  { %1378 = vmatpush1.bf16.msra.mxu0 %v3013_v40  ;;  %1421 = vmatpush1.bf16.msra.mxu1 %v3027_v63 }
 0x27d   :  { %1379 = vmatprep.subr.bf16.mxu0 %v3023_v62  ;;  %1422 = vmatprep.subr.bf16.mxu1 %v3031_v24 }
 0x280   :  { %1380 = vmatpush1.bf16.msra.mxu0 %v3039_v25  ;;  %1423 = vmatpush1.bf16.msra.mxu1 %v3045_v26 }
 0x281   :  { %1506 = vmatprep.subr.bf16.mxu0 %v2872_v4  ;;  %1549 = vmatprep.subr.bf16.mxu1 %v2876_v5 }
 0x323   :  { %v1258_v45 = vpop.f32.mrf.mxu0  ;;  %v1301_v47 = vpop.f32.mrf.mxu1 }
 0x324   :  { %v1310_v28 = vadd.f32 %v1258_v45, %v3751_v8  ;;  %v1312_v10 = vadd.f32 %v1301_v47, %v3753_v22 }
 0x325   :  { %v1260_v16 = vpop.f32.mrf.mxu0  ;;  %v1303_v12 = vpop.f32.mrf.mxu1 }
 0x326   :  { %v1318_v32 = vmul.f32 0.5, %v1310_v28  ;;  %v1311_v19 = vadd.f32 %v1260_v16, %v3752_v23  ;;  %v1313_v9 = vadd.f32 %v1303_v12, %v3757_v13 }
 0x327   :  { %v1262_v6 = vpop.f32.mrf.mxu0  ;;  %v1305_v35 = vpop.f32.mrf.mxu1 }
 0x328   :  { %2339 = vtanh.f32 %v1318_v32  ;;  %v1326_v42 = vmul.f32 0.5, %v1311_v19  ;;  %v1314_v17 = vadd.f32 %v1262_v6, %v3754_v18  ;;  %v1316_v30 = vadd.f32 %v1305_v35, %v3756_v29 }
 0x329   :  { %v1264_v31 = vpop.f32.mrf.mxu0  ;;  %v1307_v21 = vpop.f32.mrf.mxu1  ;;  %v1336_v8 = vmul.f32 0.5, %v1313_v9 }
 0x32a   :  { %2341 = vtanh.f32 %v1326_v42  ;;  %v1319_v11 = vmul.f32 0.5, %v1314_v17  ;;  %v1315_v27 = vadd.f32 %v1264_v31, %v3755_v59  ;;  %v1317_v20 = vadd.f32 %v1307_v21, %v3758_v43 }
 0x32b   :  { %2343 = vtanh.f32 %v1312_v10 }
 0x32c   :  { %2345 = vtanh.f32 %v1319_v11  ;;  %v1327_v41 = vmul.f32 0.5, %v1315_v27  ;;  %v1337_v23 = vmul.f32 0.5, %v1317_v20 }
 0x32e   :  { %2347 = vtanh.f32 %v1327_v41 }
 0x32f   :  { %2349 = vtanh.f32 %v1316_v30 }
 0x330   :  { %2351 = vtanh.f32 %v1336_v8 }
 0x331   :  { %2353 = vtanh.f32 %v1337_v23 }
 0x335   :  { %v2340_v14 = vpop.eup %2339 }
 0x336   :  { %v1322_v45 = vadd.f32 1.0, %v2340_v14 }
 0x337   :  { %v2342_v47 = vpop.eup %2341 }
 0x338   :  { %v2344_v28 = vpop.eup %2343  ;;  %v1324_v16 = vmul.f32 0.5, %v1322_v45  ;;  %v1330_v32 = vadd.f32 1.0, %v2342_v47 }
 0x339   :  { %v2346_v19 = vpop.eup %2345 }
 0x33a   :  { %v1332_v22 = vmul.f32 0.5, %v1330_v32  ;;  %v1346_v10 = vmul.f32 %v2344_v28, %v1324_v16  ;;  %v1323_v6 = vadd.f32 1.0, %v2346_v19  ;;  %v3759_v28 = vld [vmem:[#allocation22_spill] sm:$0xff] }
 0x33b   :  { %v2348_v42 = vpop.eup %2347 }
 0x33c   :  { %v1344_v18 = vmul.f32 %v1332_v22, %v3369_v15  ;;  %v1325_v17 = vmul.f32 0.5, %v1323_v6  ;;  %v1331_v12 = vadd.f32 1.0, %v2348_v42  ;;  %v2350_v35 = vpop.eup %2349  ;;  %v3760_v22 = vld [vmem:[#allocation24_spill] sm:$0xff]  ;;  %v3761_v6 = vld [vmem:[#allocation23_spill] sm:$0xff] }
 0x33d   :  { %v2352_v30 = vpop.eup %2351 }
 0x33e   :  { %v3422_v31 = vadd.f32 %v1346_v10, %v1344_v18  ;;  %v1333_v11 = vmul.f32 0.5, %v1331_v12  ;;  %v1347_v59 = vmul.f32 %v2350_v35, %v1325_v17  ;;  %v2354_v41 = vpop.eup %2353  ;;  %v1340_v21 = vadd.f32 1.0, %v2352_v30  ;;  %v3762_v12 = vld [vmem:[#allocation26_spill] sm:$0xff]  ;;  %v3763_v30 = vld [vmem:[#allocation28_spill] sm:$0xff] }
 0x33f   :  { %v1341_v15 = vadd.f32 1.0, %v2354_v41 }
 0x340   :  { %v1345_v27 = vmul.f32 %v1333_v11, %v3373_v60  ;;  %2355 = vtanh.f32 %v3422_v31  ;;  %v1342_v9 = vmul.f32 0.5, %v1340_v21  ;;  %v3764_v21 = vld [vmem:[#allocation27_spill] sm:$0xff] }
 0x341   :  { %v1343_v43 = vmul.f32 0.5, %v1341_v15 }
 0x342   :  { %v3426_v29 = vadd.f32 %v1347_v59, %v1345_v27 }
 0x344   :  { %2357 = vtanh.f32 %v3426_v29 }
 0x34d   :  { %v2356_v13 = vpop.eup %2355 }
 0x34e   :  { %v1352_v14 = vmul.f32 %v2356_v13, %v1342_v9 }
 0x351   :  { %v2358_v20 = vpop.eup %2357 }
 0x352   :  { %v1353_v45 = vmul.f32 %v2358_v20, %v1343_v43  ;;  %v3765_v43 = vld [vmem:[#allocation25_spill] sm:$0xff] }
 0x354   :  { %v1354_v47 = vpack.c.bf16 %v1353_v45, %v1352_v14  ;;  %v3766_v14 = vld [vmem:[#allocation29_spill] sm:$0xff] }
 0x356   :  { %2283 = vst [vmem:[%s3667_s4 + $0x10] sm:$0xff] %v1354_v47   ;;  %1398 = vmatmul.mubr.bf16.vlgmr.msra.gmra.mxu0 %v1354_v47  ;;  %1441 = vmatmul.mubr.bf16.vlgmr.msra.gmra.mxu1 %v1354_v47 }
 0x357   :  { %1507 = vmatpush1.bf16.msra.mxu0 %v2883_v0  ;;  %1550 = vmatpush1.bf16.msra.mxu1 %v2893_v2 }
 0x358   :  { %1508 = vmatprep.subr.bf16.mxu0 %v2888_v1  ;;  %1551 = vmatprep.subr.bf16.mxu1 %v2897_v3 }
 0x359   :  { %1538 = vmatprep.mubr.bf16.mxu0 %v3747_v56  ;;  %1581 = vmatprep.mubr.bf16.mxu1 %v3747_v56 }
 0x35b   :  { %1509 = vmatpush1.bf16.msra.mxu0 %v2903_v7  ;;  %1552 = vmatpush1.bf16.msra.mxu1 %v2914_v34 }
 0x35c   :  { %1510 = vmatprep.subr.bf16.mxu0 %v2909_v33  ;;  %1553 = vmatprep.subr.bf16.mxu1 %v2928_v37 }
 0x35f   :  { %1511 = vmatpush1.bf16.msra.mxu0 %v2924_v36  ;;  %1554 = vmatpush1.bf16.msra.mxu1 %v2937_v39 }
 0x360   :  { %1512 = vmatprep.subr.bf16.mxu0 %v2933_v38  ;;  %1555 = vmatprep.subr.bf16.mxu1 %v2941_v52 }
 0x363   :  { %1513 = vmatpush1.bf16.msra.mxu0 %v2949_v54  ;;  %1556 = vmatpush1.bf16.msra.mxu1 %v2959_v55 }
 0x364   :  { %1514 = vmatprep.subr.bf16.mxu0 %v2955_v53  ;;  %1557 = vmatprep.subr.bf16.mxu1 %v2972_v50 }
 0x367   :  { %1515 = vmatpush1.bf16.msra.mxu0 %v2968_v48  ;;  %1558 = vmatpush1.bf16.msra.mxu1 %v2982_v51 }
 0x368   :  { %1516 = vmatprep.subr.bf16.mxu0 %v2978_v49  ;;  %1559 = vmatprep.subr.bf16.mxu1 %v2986_v44 }
 0x36b   :  { %1517 = vmatpush1.bf16.msra.mxu0 %v2994_v46  ;;  %1560 = vmatpush1.bf16.msra.mxu1 %v3004_v58 }
 0x36c   :  { %1518 = vmatprep.subr.bf16.mxu0 %v3000_v57  ;;  %1561 = vmatprep.subr.bf16.mxu1 %v3017_v61 }
 0x36f   :  { %1519 = vmatpush1.bf16.msra.mxu0 %v3013_v40  ;;  %1562 = vmatpush1.bf16.msra.mxu1 %v3027_v63 }
 0x370   :  { %1520 = vmatprep.subr.bf16.mxu0 %v3023_v62  ;;  %1563 = vmatprep.subr.bf16.mxu1 %v3031_v24 }
 0x373   :  { %1521 = vmatpush1.bf16.msra.mxu0 %v3039_v25  ;;  %1564 = vmatpush1.bf16.msra.mxu1 %v3045_v26 }
 0x374   :  { %1647 = vmatprep.subr.bf16.mxu0 %v2872_v4  ;;  %1690 = vmatprep.subr.bf16.mxu1 %v2876_v5 }
 0x416   :  { %v1399_v60 = vpop.f32.mrf.mxu0  ;;  %v1442_v8 = vpop.f32.mrf.mxu1 }
 0x417   :  { %v1451_v16 = vadd.f32 %v1399_v60, %v3759_v28  ;;  %v1453_v42 = vadd.f32 %v1442_v8, %v3761_v6 }
 0x418   :  { %v1401_v32 = vpop.f32.mrf.mxu0  ;;  %v1444_v23 = vpop.f32.mrf.mxu1 }
 0x419   :  { %v1459_v19 = vmul.f32 0.5, %v1451_v16  ;;  %v1452_v10 = vadd.f32 %v1401_v32, %v3760_v22  ;;  %v1454_v20 = vadd.f32 %v1444_v23, %v3765_v43 }
 0x41a   :  { %v1403_v18 = vpop.f32.mrf.mxu0  ;;  %v1446_v11 = vpop.f32.mrf.mxu1 }
 0x41b   :  { %2359 = vtanh.f32 %v1459_v19  ;;  %v1467_v17 = vmul.f32 0.5, %v1452_v10  ;;  %v1455_v35 = vadd.f32 %v1403_v18, %v3762_v12  ;;  %v1457_v15 = vadd.f32 %v1446_v11, %v3764_v21 }
 0x41c   :  { %v1405_v59 = vpop.f32.mrf.mxu0  ;;  %v1448_v9 = vpop.f32.mrf.mxu1  ;;  %v1477_v28 = vmul.f32 0.5, %v1454_v20 }
 0x41d   :  { %2361 = vtanh.f32 %v1467_v17  ;;  %v1460_v27 = vmul.f32 0.5, %v1455_v35  ;;  %v1456_v41 = vadd.f32 %v1405_v59, %v3763_v30  ;;  %v1458_v45 = vadd.f32 %v1448_v9, %v3766_v14 }
 0x41e   :  { %2363 = vtanh.f32 %v1453_v42 }
 0x41f   :  { %2365 = vtanh.f32 %v1460_v27  ;;  %v1468_v13 = vmul.f32 0.5, %v1456_v41  ;;  %v1478_v22 = vmul.f32 0.5, %v1458_v45 }
 0x421   :  { %2367 = vtanh.f32 %v1468_v13 }
 0x422   :  { %2369 = vtanh.f32 %v1457_v15 }
 0x423   :  { %2371 = vtanh.f32 %v1477_v28 }
 0x424   :  { %2373 = vtanh.f32 %v1478_v22 }
 0x428   :  { %v2360_v47 = vpop.eup %2359 }
 0x429   :  { %v1463_v60 = vadd.f32 1.0, %v2360_v47 }
 0x42a   :  { %v2362_v8 = vpop.eup %2361 }
 0x42b   :  { %v2364_v16 = vpop.eup %2363  ;;  %v1465_v32 = vmul.f32 0.5, %v1463_v60  ;;  %v1471_v19 = vadd.f32 1.0, %v2362_v8 }
 0x42c   :  { %v2366_v10 = vpop.eup %2365 }
 0x42d   :  { %v1473_v6 = vmul.f32 0.5, %v1471_v19  ;;  %v1487_v42 = vmul.f32 %v2364_v16, %v1465_v32  ;;  %v1464_v18 = vadd.f32 1.0, %v2366_v10  ;;  %v3767_v16 = vld [vmem:[#allocation30_spill] sm:$0xff] }
 0x42e   :  { %v2368_v17 = vpop.eup %2367 }
 0x42f   :  { %v1485_v12 = vmul.f32 %v1473_v6, %v3422_v31  ;;  %v1466_v35 = vmul.f32 0.5, %v1464_v18  ;;  %v1472_v23 = vadd.f32 1.0, %v2368_v17  ;;  %v2370_v11 = vpop.eup %2369  ;;  %v3768_v6 = vld [vmem:[#allocation32_spill] sm:$0xff]  ;;  %v3769_v18 = vld [vmem:[#allocation31_spill] sm:$0xff] }
 0x430   :  { %v2372_v15 = vpop.eup %2371 }
 0x431   :  { %v3475_v59 = vadd.f32 %v1487_v42, %v1485_v12  ;;  %v1474_v27 = vmul.f32 0.5, %v1472_v23  ;;  %v1488_v30 = vmul.f32 %v2370_v11, %v1466_v35  ;;  %v2374_v13 = vpop.eup %2373  ;;  %v1481_v9 = vadd.f32 1.0, %v2372_v15  ;;  %v3770_v23 = vld [vmem:[#allocation34_spill] sm:$0xff]  ;;  %v3771_v15 = vld [vmem:[#allocation36_spill] sm:$0xff] }
 0x432   :  { %v1482_v31 = vadd.f32 1.0, %v2374_v13 }
 0x433   :  { %v1486_v41 = vmul.f32 %v1474_v27, %v3426_v29  ;;  %2375 = vtanh.f32 %v3475_v59  ;;  %v1483_v20 = vmul.f32 0.5, %v1481_v9  ;;  %v3772_v9 = vld [vmem:[#allocation35_spill] sm:$0xff] }
 0x434   :  { %v1484_v14 = vmul.f32 0.5, %v1482_v31 }
 0x435   :  { %v3479_v21 = vadd.f32 %v1488_v30, %v1486_v41 }
 0x437   :  { %2377 = vtanh.f32 %v3479_v21 }
 0x440   :  { %v2376_v43 = vpop.eup %2375 }
 0x441   :  { %v1493_v47 = vmul.f32 %v2376_v43, %v1483_v20 }
 0x444   :  { %v2378_v45 = vpop.eup %2377 }
 0x445   :  { %v1494_v60 = vmul.f32 %v2378_v45, %v1484_v14  ;;  %v3773_v14 = vld [vmem:[#allocation33_spill] sm:$0xff] }
 0x447   :  { %v1495_v8 = vpack.c.bf16 %v1494_v60, %v1493_v47  ;;  %v3774_v47 = vld [vmem:[#allocation37_spill] sm:$0xff] }
 0x449   :  { %2284 = vst [vmem:[%s3667_s4 + $0x18] sm:$0xff] %v1495_v8   ;;  %1539 = vmatmul.mubr.bf16.vlgmr.msra.gmra.mxu0 %v1495_v8  ;;  %1582 = vmatmul.mubr.bf16.vlgmr.msra.gmra.mxu1 %v1495_v8 }
 0x44a   :  { %1648 = vmatpush1.bf16.msra.mxu0 %v2883_v0  ;;  %1691 = vmatpush1.bf16.msra.mxu1 %v2893_v2 }
 0x44b   :  { %1649 = vmatprep.subr.bf16.mxu0 %v2888_v1  ;;  %1692 = vmatprep.subr.bf16.mxu1 %v2897_v3 }
 0x44c   :  { %1679 = vmatprep.mubr.bf16.mxu0 %v3747_v56  ;;  %1722 = vmatprep.mubr.bf16.mxu1 %v3747_v56 }
 0x44e   :  { %1650 = vmatpush1.bf16.msra.mxu0 %v2903_v7  ;;  %1693 = vmatpush1.bf16.msra.mxu1 %v2914_v34 }
 0x44f   :  { %1651 = vmatprep.subr.bf16.mxu0 %v2909_v33  ;;  %1694 = vmatprep.subr.bf16.mxu1 %v2928_v37 }
 0x452   :  { %1652 = vmatpush1.bf16.msra.mxu0 %v2924_v36  ;;  %1695 = vmatpush1.bf16.msra.mxu1 %v2937_v39 }
 0x453   :  { %1653 = vmatprep.subr.bf16.mxu0 %v2933_v38  ;;  %1696 = vmatprep.subr.bf16.mxu1 %v2941_v52 }
 0x456   :  { %1654 = vmatpush1.bf16.msra.mxu0 %v2949_v54  ;;  %1697 = vmatpush1.bf16.msra.mxu1 %v2959_v55 }
 0x457   :  { %1655 = vmatprep.subr.bf16.mxu0 %v2955_v53  ;;  %1698 = vmatprep.subr.bf16.mxu1 %v2972_v50 }
 0x45a   :  { %1656 = vmatpush1.bf16.msra.mxu0 %v2968_v48  ;;  %1699 = vmatpush1.bf16.msra.mxu1 %v2982_v51 }
 0x45b   :  { %1657 = vmatprep.subr.bf16.mxu0 %v2978_v49  ;;  %1700 = vmatprep.subr.bf16.mxu1 %v2986_v44 }
 0x45e   :  { %1658 = vmatpush1.bf16.msra.mxu0 %v2994_v46  ;;  %1701 = vmatpush1.bf16.msra.mxu1 %v3004_v58 }
 0x45f   :  { %1659 = vmatprep.subr.bf16.mxu0 %v3000_v57  ;;  %1702 = vmatprep.subr.bf16.mxu1 %v3017_v61 }
 0x462   :  { %1660 = vmatpush1.bf16.msra.mxu0 %v3013_v40  ;;  %1703 = vmatpush1.bf16.msra.mxu1 %v3027_v63 }
 0x463   :  { %1661 = vmatprep.subr.bf16.mxu0 %v3023_v62  ;;  %1704 = vmatprep.subr.bf16.mxu1 %v3031_v24 }
 0x466   :  { %1662 = vmatpush1.bf16.msra.mxu0 %v3039_v25  ;;  %1705 = vmatpush1.bf16.msra.mxu1 %v3045_v26 }
 0x467   :  { %1788 = vmatprep.subr.bf16.mxu0 %v2872_v4  ;;  %1831 = vmatprep.subr.bf16.mxu1 %v2876_v5 }
 0x509   :  { %v1540_v29 = vpop.f32.mrf.mxu0  ;;  %v1583_v28 = vpop.f32.mrf.mxu1 }
 0x50a   :  { %v1592_v32 = vadd.f32 %v1540_v29, %v3767_v16  ;;  %v1594_v17 = vadd.f32 %v1583_v28, %v3769_v18 }
 0x50b   :  { %v1542_v19 = vpop.f32.mrf.mxu0  ;;  %v1585_v22 = vpop.f32.mrf.mxu1 }
 0x50c   :  { %v1600_v10 = vmul.f32 0.5, %v1592_v32  ;;  %v1593_v42 = vadd.f32 %v1542_v19, %v3768_v6  ;;  %v1595_v45 = vadd.f32 %v1585_v22, %v3773_v14 }
 0x50d   :  { %v1544_v12 = vpop.f32.mrf.mxu0  ;;  %v1587_v27 = vpop.f32.mrf.mxu1 }
 0x50e   :  { %2379 = vtanh.f32 %v1600_v10  ;;  %v1608_v35 = vmul.f32 0.5, %v1593_v42  ;;  %v1596_v11 = vadd.f32 %v1544_v12, %v3770_v23  ;;  %v1598_v31 = vadd.f32 %v1587_v27, %v3772_v9 }
 0x50f   :  { %v1546_v30 = vpop.f32.mrf.mxu0  ;;  %v1589_v20 = vpop.f32.mrf.mxu1  ;;  %v1618_v16 = vmul.f32 0.5, %v1595_v45 }
 0x510   :  { %2381 = vtanh.f32 %v1608_v35  ;;  %v1601_v41 = vmul.f32 0.5, %v1596_v11  ;;  %v1597_v13 = vadd.f32 %v1546_v30, %v3771_v15  ;;  %v1599_v60 = vadd.f32 %v1589_v20, %v3774_v47 }
 0x511   :  { %2383 = vtanh.f32 %v1594_v17 }
 0x512   :  { %2385 = vtanh.f32 %v1601_v41  ;;  %v1609_v43 = vmul.f32 0.5, %v1597_v13  ;;  %v1619_v6 = vmul.f32 0.5, %v1599_v60 }
 0x514   :  { %2387 = vtanh.f32 %v1609_v43 }
 0x515   :  { %2389 = vtanh.f32 %v1598_v31 }
 0x516   :  { %2391 = vtanh.f32 %v1618_v16 }
 0x517   :  { %2393 = vtanh.f32 %v1619_v6 }
 0x51b   :  { %v2380_v8 = vpop.eup %2379 }
 0x51c   :  { %v1604_v29 = vadd.f32 1.0, %v2380_v8 }
 0x51d   :  { %v2382_v28 = vpop.eup %2381 }
 0x51e   :  { %v2384_v32 = vpop.eup %2383  ;;  %v1606_v19 = vmul.f32 0.5, %v1604_v29  ;;  %v1612_v10 = vadd.f32 1.0, %v2382_v28 }
 0x51f   :  { %v2386_v42 = vpop.eup %2385 }
 0x520   :  { %v1614_v18 = vmul.f32 0.5, %v1612_v10  ;;  %v1628_v17 = vmul.f32 %v2384_v32, %v1606_v19  ;;  %v1605_v12 = vadd.f32 1.0, %v2386_v42  ;;  %v3775_v32 = vld [vmem:[#allocation38_spill] sm:$0xff] }
 0x521   :  { %v2388_v35 = vpop.eup %2387 }
 0x522   :  { %v1626_v23 = vmul.f32 %v1614_v18, %v3475_v59  ;;  %v1607_v11 = vmul.f32 0.5, %v1605_v12  ;;  %v1613_v22 = vadd.f32 1.0, %v2388_v35  ;;  %v2390_v27 = vpop.eup %2389  ;;  %v3776_v18 = vld [vmem:[#allocation40_spill] sm:$0xff]  ;;  %v3777_v12 = vld [vmem:[#allocation39_spill] sm:$0xff] }
 0x523   :  { %v2392_v31 = vpop.eup %2391 }
 0x524   :  { %v3528_v30 = vadd.f32 %v1628_v17, %v1626_v23  ;;  %v1615_v41 = vmul.f32 0.5, %v1613_v22  ;;  %v1629_v15 = vmul.f32 %v2390_v27, %v1607_v11  ;;  %v2394_v43 = vpop.eup %2393  ;;  %v1622_v20 = vadd.f32 1.0, %v2392_v31  ;;  %v3778_v22 = vld [vmem:[#allocation42_spill] sm:$0xff]  ;;  %v3780_v31 = vld [vmem:[#allocation43_spill] sm:$0xff] }
 0x525   :  { %v1623_v59 = vadd.f32 1.0, %v2394_v43 }
 0x526   :  { %v1627_v13 = vmul.f32 %v1615_v41, %v3479_v21  ;;  %2395 = vtanh.f32 %v3528_v30  ;;  %v1624_v45 = vmul.f32 0.5, %v1622_v20 }
 0x527   :  { %v1625_v47 = vmul.f32 0.5, %v1623_v59 }
 0x528   :  { %v3532_v9 = vadd.f32 %v1629_v15, %v1627_v13  ;;  %v3779_v15 = vld [vmem:[#allocation44_spill] sm:$0xff] }
 0x52a   :  { %2397 = vtanh.f32 %v3532_v9 }
 0x533   :  { %v2396_v14 = vpop.eup %2395 }
 0x534   :  { %v1634_v8 = vmul.f32 %v2396_v14, %v1624_v45  ;;  %v3781_v14 = vld [vmem:[#allocation41_spill] sm:$0xff] }
 0x537   :  { %v2398_v60 = vpop.eup %2397 }
 0x538   :  { %v1635_v29 = vmul.f32 %v2398_v60, %v1625_v47  ;;  %v3782_v47 = vld [vmem:[#allocation45_spill] sm:$0xff] }
 0x53a   :  { %v1636_v28 = vpack.c.bf16 %v1635_v29, %v1634_v8 }
 0x53c   :  { %2285 = vst [vmem:[%s3667_s4 + $0x20] sm:$0xff] %v1636_v28   ;;  %1680 = vmatmul.mubr.bf16.vlgmr.msra.gmra.mxu0 %v1636_v28  ;;  %1723 = vmatmul.mubr.bf16.vlgmr.msra.gmra.mxu1 %v1636_v28 }
 0x53d   :  { %1789 = vmatpush1.bf16.msra.mxu0 %v2883_v0  ;;  %1832 = vmatpush1.bf16.msra.mxu1 %v2893_v2 }
 0x53e   :  { %1790 = vmatprep.subr.bf16.mxu0 %v2888_v1  ;;  %1833 = vmatprep.subr.bf16.mxu1 %v2897_v3 }
 0x53f   :  { %1820 = vmatprep.mubr.bf16.mxu0 %v3747_v56  ;;  %1863 = vmatprep.mubr.bf16.mxu1 %v3747_v56 }
 0x541   :  { %1791 = vmatpush1.bf16.msra.mxu0 %v2903_v7  ;;  %1834 = vmatpush1.bf16.msra.mxu1 %v2914_v34 }
 0x542   :  { %1792 = vmatprep.subr.bf16.mxu0 %v2909_v33  ;;  %1835 = vmatprep.subr.bf16.mxu1 %v2928_v37 }
 0x545   :  { %1793 = vmatpush1.bf16.msra.mxu0 %v2924_v36  ;;  %1836 = vmatpush1.bf16.msra.mxu1 %v2937_v39 }
 0x546   :  { %1794 = vmatprep.subr.bf16.mxu0 %v2933_v38  ;;  %1837 = vmatprep.subr.bf16.mxu1 %v2941_v52 }
 0x549   :  { %1795 = vmatpush1.bf16.msra.mxu0 %v2949_v54  ;;  %1838 = vmatpush1.bf16.msra.mxu1 %v2959_v55 }
 0x54a   :  { %1796 = vmatprep.subr.bf16.mxu0 %v2955_v53  ;;  %1839 = vmatprep.subr.bf16.mxu1 %v2972_v50 }
 0x54d   :  { %1797 = vmatpush1.bf16.msra.mxu0 %v2968_v48  ;;  %1840 = vmatpush1.bf16.msra.mxu1 %v2982_v51 }
 0x54e   :  { %1798 = vmatprep.subr.bf16.mxu0 %v2978_v49  ;;  %1841 = vmatprep.subr.bf16.mxu1 %v2986_v44 }
 0x551   :  { %1799 = vmatpush1.bf16.msra.mxu0 %v2994_v46  ;;  %1842 = vmatpush1.bf16.msra.mxu1 %v3004_v58 }
 0x552   :  { %1800 = vmatprep.subr.bf16.mxu0 %v3000_v57  ;;  %1843 = vmatprep.subr.bf16.mxu1 %v3017_v61 }
 0x555   :  { %1801 = vmatpush1.bf16.msra.mxu0 %v3013_v40  ;;  %1844 = vmatpush1.bf16.msra.mxu1 %v3027_v63 }
 0x556   :  { %1802 = vmatprep.subr.bf16.mxu0 %v3023_v62  ;;  %1845 = vmatprep.subr.bf16.mxu1 %v3031_v24 }
 0x559   :  { %1803 = vmatpush1.bf16.msra.mxu0 %v3039_v25  ;;  %1846 = vmatpush1.bf16.msra.mxu1 %v3045_v26 }
 0x55a   :  { %1929 = vmatprep.subr.bf16.mxu0 %v2872_v4  ;;  %1972 = vmatprep.subr.bf16.mxu1 %v2876_v5 }
 0x5fc   :  { %v1681_v21 = vpop.f32.mrf.mxu0  ;;  %v1724_v16 = vpop.f32.mrf.mxu1 }
 0x5fd   :  { %v1733_v19 = vadd.f32 %v1681_v21, %v3775_v32  ;;  %v1735_v35 = vadd.f32 %v1724_v16, %v3777_v12 }
 0x5fe   :  { %v1683_v10 = vpop.f32.mrf.mxu0  ;;  %v1726_v6 = vpop.f32.mrf.mxu1 }
 0x5ff   :  { %v1741_v42 = vmul.f32 0.5, %v1733_v19  ;;  %v1734_v17 = vadd.f32 %v1683_v10, %v3776_v18  ;;  %v1736_v45 = vadd.f32 %v1726_v6, %v3781_v14 }
 0x600   :  { %v1685_v23 = vpop.f32.mrf.mxu0  ;;  %v1728_v41 = vpop.f32.mrf.mxu1 }
 0x601   :  { %2399 = vtanh.f32 %v1741_v42  ;;  %v1749_v11 = vmul.f32 0.5, %v1734_v17  ;;  %v1737_v27 = vadd.f32 %v1685_v23, %v3778_v22  ;;  %v1739_v43 = vadd.f32 %v1728_v41, %v3780_v31 }
 0x602   :  { %v1687_v4 = vpop.f32.mrf.mxu0  ;;  %v1730_v59 = vpop.f32.mrf.mxu1  ;;  %v1759_v21 = vmul.f32 0.5, %v1736_v45 }
 0x603   :  { %2401 = vtanh.f32 %v1749_v11  ;;  %v1742_v5 = vmul.f32 0.5, %v1737_v27  ;;  %v1738_v13 = vadd.f32 %v1687_v4, %v3779_v15  ;;  %v1740_v60 = vadd.f32 %v1730_v59, %v3782_v47 }
 0x604   :  { %2403 = vtanh.f32 %v1735_v35 }
 0x605   :  { %2405 = vtanh.f32 %v1742_v5  ;;  %v1750_v20 = vmul.f32 0.5, %v1738_v13  ;;  %v1760_v10 = vmul.f32 0.5, %v1740_v60 }
 0x607   :  { %2407 = vtanh.f32 %v1750_v20 }
 0x608   :  { %2409 = vtanh.f32 %v1739_v43 }
 0x609   :  { %2411 = vtanh.f32 %v1759_v21 }
 0x60a   :  { %2413 = vtanh.f32 %v1760_v10 }
 0x60e   :  { %v2400_v8 = vpop.eup %2399 }
 0x60f   :  { %v1745_v29 = vadd.f32 1.0, %v2400_v8 }
 0x610   :  { %v2402_v28 = vpop.eup %2401 }
 0x611   :  { %v2404_v16 = vpop.eup %2403  ;;  %v1747_v32 = vmul.f32 0.5, %v1745_v29  ;;  %v1753_v19 = vadd.f32 1.0, %v2402_v28 }
 0x612   :  { %v2406_v42 = vpop.eup %2405 }
 0x613   :  { %v1755_v18 = vmul.f32 0.5, %v1753_v19  ;;  %v1769_v17 = vmul.f32 %v2404_v16, %v1747_v32  ;;  %v1746_v12 = vadd.f32 1.0, %v2406_v42 }
 0x614   :  { %v2408_v35 = vpop.eup %2407 }
 0x615   :  { %v1767_v23 = vmul.f32 %v1755_v18, %v3528_v30  ;;  %v1748_v11 = vmul.f32 0.5, %v1746_v12  ;;  %v1754_v6 = vadd.f32 1.0, %v2408_v35  ;;  %v2410_v22 = vpop.eup %2409 }
 0x616   :  { %v2412_v13 = vpop.eup %2411 }
 0x617   :  { %v3581_v27 = vadd.f32 %v1769_v17, %v1767_v23  ;;  %v1756_v41 = vmul.f32 0.5, %v1754_v6  ;;  %v1770_v4 = vmul.f32 %v2410_v22, %v1748_v11  ;;  %v2414_v31 = vpop.eup %2413  ;;  %v1763_v43 = vadd.f32 1.0, %v2412_v13 }
 0x618   :  { %v1764_v30 = vadd.f32 1.0, %v2414_v31 }
 0x619   :  { %v1768_v5 = vmul.f32 %v1756_v41, %v3532_v9  ;;  %2415 = vtanh.f32 %v3581_v27  ;;  %v1765_v59 = vmul.f32 0.5, %v1763_v43 }
 0x61a   :  { %v1766_v14 = vmul.f32 0.5, %v1764_v30 }
 0x61b   :  { %v3585_v15 = vadd.f32 %v1770_v4, %v1768_v5 }
 0x61d   :  { %2417 = vtanh.f32 %v3585_v15 }
 0x626   :  { %v2416_v20 = vpop.eup %2415 }
 0x627   :  { %v1775_v47 = vmul.f32 %v2416_v20, %v1765_v59 }
 0x62a   :  { %v2418_v45 = vpop.eup %2417 }
 0x62b   :  { %v1776_v60 = vmul.f32 %v2418_v45, %v1766_v14 }
 0x62d   :  { %v1777_v8 = vpack.c.bf16 %v1776_v60, %v1775_v47 }
 0x62f   :  { %2286 = vst [vmem:[%s3667_s4 + $0x28] sm:$0xff] %v1777_v8   ;;  %1821 = vmatmul.mubr.bf16.vlgmr.msra.gmra.mxu0 %v1777_v8  ;;  %1864 = vmatmul.mubr.bf16.vlgmr.msra.gmra.mxu1 %v1777_v8  ;;  %v3791_v8 = vld [vmem:[#allocation54_spill] sm:$0xff] }
 0x630   :  { %1930 = vmatpush1.bf16.msra.mxu0 %v2883_v0  ;;  %1973 = vmatpush1.bf16.msra.mxu1 %v2893_v2  ;;  %v3783_v2 = vld [vmem:[#allocation46_spill] sm:$0xff] }
 0x631   :  { %1931 = vmatprep.subr.bf16.mxu0 %v2888_v1  ;;  %1974 = vmatprep.subr.bf16.mxu1 %v2897_v3 }
 0x632   :  { %1961 = vmatprep.mubr.bf16.mxu0 %v3747_v56  ;;  %2004 = vmatprep.mubr.bf16.mxu1 %v3747_v56 }
 0x634   :  { %1932 = vmatpush1.bf16.msra.mxu0 %v2903_v7  ;;  %1975 = vmatpush1.bf16.msra.mxu1 %v2914_v34 }
 0x635   :  { %1933 = vmatprep.subr.bf16.mxu0 %v2909_v33  ;;  %1976 = vmatprep.subr.bf16.mxu1 %v2928_v37 }
 0x638   :  { %1934 = vmatpush1.bf16.msra.mxu0 %v2924_v36  ;;  %1977 = vmatpush1.bf16.msra.mxu1 %v2937_v39  ;;  %v3784_v36 = vld [vmem:[#allocation48_spill] sm:$0xff] }
 0x639   :  { %1935 = vmatprep.subr.bf16.mxu0 %v2933_v38  ;;  %1978 = vmatprep.subr.bf16.mxu1 %v2941_v52  ;;  %v3785_v38 = vld [vmem:[#allocation47_spill] sm:$0xff] }
 0x63c   :  { %1936 = vmatpush1.bf16.msra.mxu0 %v2949_v54  ;;  %1979 = vmatpush1.bf16.msra.mxu1 %v2959_v55 }
 0x63d   :  { %1937 = vmatprep.subr.bf16.mxu0 %v2955_v53  ;;  %1980 = vmatprep.subr.bf16.mxu1 %v2972_v50  ;;  %v3786_v53 = vld [vmem:[#allocation50_spill] sm:$0xff] }
 0x640   :  { %1938 = vmatpush1.bf16.msra.mxu0 %v2968_v48  ;;  %1981 = vmatpush1.bf16.msra.mxu1 %v2982_v51  ;;  %v3787_v51 = vld [vmem:[#allocation52_spill] sm:$0xff] }
 0x641   :  { %1939 = vmatprep.subr.bf16.mxu0 %v2978_v49  ;;  %1982 = vmatprep.subr.bf16.mxu1 %v2986_v44 }
 0x644   :  { %1940 = vmatpush1.bf16.msra.mxu0 %v2994_v46  ;;  %1983 = vmatpush1.bf16.msra.mxu1 %v3004_v58  ;;  %v3788_v46 = vld [vmem:[#allocation51_spill] sm:$0xff] }
 0x645   :  { %1941 = vmatprep.subr.bf16.mxu0 %v3000_v57  ;;  %1984 = vmatprep.subr.bf16.mxu1 %v3017_v61  ;;  %v3789_v61 = vld [vmem:[#allocation49_spill] sm:$0xff] }
 0x648   :  { %1942 = vmatpush1.bf16.msra.mxu0 %v3013_v40  ;;  %1985 = vmatpush1.bf16.msra.mxu1 %v3027_v63  ;;  %v3790_v63 = vld [vmem:[#allocation53_spill] sm:$0xff] }
 0x649   :  { %1943 = vmatprep.subr.bf16.mxu0 %v3023_v62  ;;  %1986 = vmatprep.subr.bf16.mxu1 %v3031_v24 }
 0x64c   :  { %1944 = vmatpush1.bf16.msra.mxu0 %v3039_v25  ;;  %1987 = vmatpush1.bf16.msra.mxu1 %v3045_v26 }
 0x6ef   :  { %v1822_v0 = vpop.f32.mrf.mxu0  ;;  %v1865_v1 = vpop.f32.mrf.mxu1 }
 0x6f0   :  { %v1874_v3 = vadd.f32 %v1822_v0, %v3783_v2  ;;  %v1876_v39 = vadd.f32 %v1865_v1, %v3785_v38 }
 0x6f1   :  { %v1824_v7 = vpop.f32.mrf.mxu0  ;;  %v1867_v33 = vpop.f32.mrf.mxu1 }
 0x6f2   :  { %v1882_v34 = vmul.f32 0.5, %v1874_v3  ;;  %v1875_v37 = vadd.f32 %v1824_v7, %v3784_v36  ;;  %v1877_v62 = vadd.f32 %v1867_v33, %v3789_v61  ;;  %v3792_v7 = vld [vmem:[#allocation56_spill] sm:$0xff]  ;;  %v3798_v61 = vld [vmem:[#allocation61_spill] sm:$0xff] }
 0x6f3   :  { %v1826_v52 = vpop.f32.mrf.mxu0  ;;  %v1869_v48 = vpop.f32.mrf.mxu1 }
 0x6f4   :  { %2419 = vtanh.f32 %v1882_v34  ;;  %v1890_v54 = vmul.f32 0.5, %v1875_v37  ;;  %v1878_v55 = vadd.f32 %v1826_v52, %v3786_v53  ;;  %v1880_v57 = vadd.f32 %v1869_v48, %v3788_v46  ;;  %v3793_v34 = vld [vmem:[#allocation55_spill] sm:$0xff]  ;;  %v3795_v48 = vld [vmem:[#allocation60_spill] sm:$0xff]  ;;  %v3797_v46 = vld [vmem:[#allocation57_spill] sm:$0xff] }
 0x6f5   :  { %v1828_v50 = vpop.f32.mrf.mxu0  ;;  %v1871_v40 = vpop.f32.mrf.mxu1  ;;  %v1900_v9 = vmul.f32 0.5, %v1877_v62 }
 0x6f6   :  { %2421 = vtanh.f32 %v1890_v54  ;;  %v1883_v49 = vmul.f32 0.5, %v1878_v55  ;;  %v1879_v44 = vadd.f32 %v1828_v50, %v3787_v51  ;;  %v1881_v24 = vadd.f32 %v1871_v40, %v3790_v63 }
 0x6f7   :  { %2423 = vtanh.f32 %v1876_v39  ;;  %v3794_v39 = vld [vmem:[#allocation58_spill] sm:$0xff] }
 0x6f8   :  { %2425 = vtanh.f32 %v1883_v49  ;;  %v1891_v58 = vmul.f32 0.5, %v1879_v44  ;;  %v1901_v16 = vmul.f32 0.5, %v1881_v24  ;;  %v3796_v49 = vld [vmem:[#allocation59_spill] sm:$0xff] }
 0x6fa   :  { %2427 = vtanh.f32 %v1891_v58 }
 0x6fb   :  { %2429 = vtanh.f32 %v1880_v57 }
 0x6fc   :  { %2431 = vtanh.f32 %v1900_v9 }
 0x6fd   :  { %2433 = vtanh.f32 %v1901_v16 }
 0x701   :  { %v2420_v25 = vpop.eup %2419 }
 0x702   :  { %v1886_v26 = vadd.f32 1.0, %v2420_v25 }
 0x703   :  { %v2422_v56 = vpop.eup %2421 }
 0x704   :  { %v2424_v29 = vpop.eup %2423  ;;  %v1888_v28 = vmul.f32 0.5, %v1886_v26  ;;  %v1894_v21 = vadd.f32 1.0, %v2422_v56 }
 0x705   :  { %v2426_v32 = vpop.eup %2425 }
 0x706   :  { %v1896_v19 = vmul.f32 0.5, %v1894_v21  ;;  %v1910_v10 = vmul.f32 %v2424_v29, %v1888_v28  ;;  %v1887_v42 = vadd.f32 1.0, %v2426_v32 }
 0x707   :  { %v2428_v18 = vpop.eup %2427 }
 0x708   :  { %v1908_v17 = vmul.f32 %v1896_v19, %v3581_v27  ;;  %v1889_v12 = vmul.f32 0.5, %v1887_v42  ;;  %v1895_v35 = vadd.f32 1.0, %v2428_v18  ;;  %v2430_v23 = vpop.eup %2429 }
 0x709   :  { %v2432_v5 = vpop.eup %2431 }
 0x70a   :  { %v1912_v11 = vadd.f32 %v1910_v10, %v1908_v17  ;;  %v1897_v6 = vmul.f32 0.5, %v1895_v35  ;;  %v1911_v22 = vmul.f32 %v2430_v23, %v1889_v12  ;;  %v2434_v13 = vpop.eup %2433  ;;  %v1904_v31 = vadd.f32 1.0, %v2432_v5 }
 0x70b   :  { %v1905_v43 = vadd.f32 1.0, %v2434_v13 }
 0x70c   :  { %v1909_v41 = vmul.f32 %v1897_v6, %v3585_v15  ;;  %2435 = vtanh.f32 %v1912_v11  ;;  %v1906_v27 = vmul.f32 0.5, %v1904_v31 }
 0x70d   :  { %v1907_v20 = vmul.f32 0.5, %v1905_v43 }
 0x70e   :  { %v3633_v4 = vadd.f32 %v1911_v22, %v1909_v41 }
 0x710   :  { %2437 = vtanh.f32 %v3633_v4 }
 0x719   :  { %v2436_v30 = vpop.eup %2435 }
 0x71a   :  { %v1916_v14 = vmul.f32 %v2436_v30, %v1906_v27 }
 0x71d   :  { %v2438_v59 = vpop.eup %2437 }
 0x71e   :  { %v1917_v45 = vmul.f32 %v2438_v59, %v1907_v20 }
 0x720   :  { %v1918_v47 = vpack.c.bf16 %v1917_v45, %v1916_v14 }
 0x722   :  { %2287 = vst [vmem:[%s3667_s4 + $0x30] sm:$0xff] %v1918_v47   ;;  %1962 = vmatmul.mubr.bf16.vlgmr.msra.gmra.mxu0 %v1918_v47  ;;  %2005 = vmatmul.mubr.bf16.vlgmr.msra.gmra.mxu1 %v1918_v47 }
 0x7e2   :  { %v1963_v15 = vpop.f32.mrf.mxu0  ;;  %v2006_v60 = vpop.f32.mrf.mxu1 }
 0x7e3   :  { %v2015_v0 = vadd.f32 %v1963_v15, %v3791_v8  ;;  %v2017_v36 = vadd.f32 %v2006_v60, %v3793_v34 }
 0x7e4   :  { %v1965_v1 = vpop.f32.mrf.mxu0  ;;  %v2008_v2 = vpop.f32.mrf.mxu1 }
 0x7e5   :  { %v2023_v3 = vmul.f32 0.5, %v2015_v0  ;;  %v2016_v33 = vadd.f32 %v1965_v1, %v3792_v7  ;;  %v2018_v57 = vadd.f32 %v2008_v2, %v3797_v46 }
 0x7e6   :  { %v1967_v37 = vpop.f32.mrf.mxu0  ;;  %v2010_v54 = vpop.f32.mrf.mxu1 }
 0x7e7   :  { %2439 = vtanh.f32 %v2023_v3  ;;  %v2031_v38 = vmul.f32 0.5, %v2016_v33  ;;  %v2019_v52 = vadd.f32 %v1967_v37, %v3794_v39  ;;  %v2021_v51 = vadd.f32 %v2010_v54, %v3796_v49 }
 0x7e8   :  { %v1969_v53 = vpop.f32.mrf.mxu0  ;;  %v2012_v58 = vpop.f32.mrf.mxu1  ;;  %v2041_v40 = vmul.f32 0.5, %v2018_v57 }
 0x7e9   :  { %2441 = vtanh.f32 %v2031_v38  ;;  %v2024_v55 = vmul.f32 0.5, %v2019_v52  ;;  %v2020_v50 = vadd.f32 %v1969_v53, %v3795_v48  ;;  %v2022_v62 = vadd.f32 %v2012_v58, %v3798_v61 }
 0x7ea   :  { %2443 = vtanh.f32 %v2017_v36 }
 0x7eb   :  { %2445 = vtanh.f32 %v2024_v55  ;;  %v2032_v44 = vmul.f32 0.5, %v2020_v50  ;;  %v2042_v29 = vmul.f32 0.5, %v2022_v62 }
 0x7ed   :  { %2447 = vtanh.f32 %v2032_v44 }
 0x7ee   :  { %2449 = vtanh.f32 %v2021_v51 }
 0x7ef   :  { %2451 = vtanh.f32 %v2041_v40 }
 0x7f0   :  { %2453 = vtanh.f32 %v2042_v29 }
 0x7f4   :  { %v2440_v63 = vpop.eup %2439 }
 0x7f5   :  { %v2027_v24 = vadd.f32 1.0, %v2440_v63 }
 0x7f6   :  { %v2442_v25 = vpop.eup %2441 }
 0x7f7   :  { %v2444_v26 = vpop.eup %2443  ;;  %v2029_v56 = vmul.f32 0.5, %v2027_v24  ;;  %v2035_v9 = vadd.f32 1.0, %v2442_v25 }
 0x7f8   :  { %v2446_v28 = vpop.eup %2445 }
 0x7f9   :  { %v2037_v21 = vmul.f32 0.5, %v2035_v9  ;;  %v2051_v16 = vmul.f32 %v2444_v26, %v2029_v56  ;;  %v2028_v32 = vadd.f32 1.0, %v2446_v28 }
 0x7fa   :  { %v2448_v19 = vpop.eup %2447 }
 0x7fb   :  { %v2049_v10 = vmul.f32 %v2037_v21, %v1912_v11  ;;  %v2030_v42 = vmul.f32 0.5, %v2028_v32  ;;  %v2036_v18 = vadd.f32 1.0, %v2448_v19  ;;  %v2450_v17 = vpop.eup %2449 }
 0x7fc   :  { %v2452_v11 = vpop.eup %2451 }
 0x7fd   :  { %v2053_v12 = vadd.f32 %v2051_v16, %v2049_v10  ;;  %v2038_v35 = vmul.f32 0.5, %v2036_v18  ;;  %v2052_v23 = vmul.f32 %v2450_v17, %v2030_v42  ;;  %v2045_v41 = vadd.f32 1.0, %v2452_v11  ;;  %v2454_v5 = vpop.eup %2453 }
 0x7fe   :  { %v2046_v31 = vadd.f32 1.0, %v2454_v5 }
 0x7ff   :  { %2455 = vtanh.f32 %v2053_v12  ;;  %2079 = vst [vmem:[%s3669_s6] sm:$0xff] %v2053_v12  ;;  %v2050_v6 = vmul.f32 %v2038_v35, %v3633_v4  ;;  %v2047_v13 = vmul.f32 0.5, %v2045_v41 }
 0x800   :  { %v2048_v27 = vmul.f32 0.5, %v2046_v31 }
 0x801   :  { %v2054_v22 = vadd.f32 %v2052_v23, %v2050_v6 }
 0x803   :  { %2457 = vtanh.f32 %v2054_v22  ;;  %2080 = vst [vmem:[%s3669_s6 + $0x8] sm:$0xff] %v2054_v22 }
 0x80c   :  { %v2456_v43 = vpop.eup %2455 }
 0x80d   :  { %v2057_v30 = vmul.f32 %v2456_v43, %v2047_v13 }
 0x80f   :  { %2077 = vst [vmem:[%s3668_s5] sm:$0xff] %v2057_v30 }
 0x810   :  { %v2458_v20 = vpop.eup %2457 }
 0x811   :  { %v2058_v4 = vmul.f32 %v2458_v20, %v2048_v27 }
 0x813   :  { %v2280_v59 = vpack.c.bf16 %v2058_v4, %v2057_v30  ;;  %2078 = vst [vmem:[%s3668_s5 + $0x8] sm:$0xff] %v2058_v4 }
 0x815   :  { %2288 = vst [vmem:[%s3667_s4 + $0x38] sm:$0xff] %v2280_v59  }
 0x816   :  { %2093 = vsyncmov [#allocation6] }
 0x819   :  { %s2094_s14 = vpop.sfrf %2093 }
 0x81a   :  { %p2224_p0 = scmp.ne.s32.totalorder %s2094_s14, 0 }
 0x81c   :  { %2098 = shalt.err (%p2224_p0)  }
 0x81d   :  { %2100 = vsyncmov [#allocation6 + $0x1] }
 0x820   :  { %s2101_s15 = vpop.sfrf %2100 }
 0x821   :  { %p2225_p1 = scmp.ne.s32.totalorder %s2101_s15, 0 }
 0x823   :  { %2105 = shalt.err (%p2225_p1)  }

// kernel: _lambda_.3
= control target key start
LH: loop header
LB: loop body
LE: loop exit
PB: predicated region body
PF: predicated region fallthrough
CT: control target
= control target key end

     0   :  { %s2429_s21 = smov [#allocation4]   ;;  %s2430_s23 = smov [#allocation5]   ;;  %s3269_s0 = inlined_call_operand.vmem [shape: bf16[8,16,128], index: 0, kind: input, shape index: {}]   ;;  %s3270_s1 = inlined_call_operand.vmem [shape: f32[1,512], index: 1, kind: input, shape index: {}]   ;;  %s3271_s2 = inlined_call_operand.hbm [shape: bf16[128,512], index: 2, kind: input, shape index: {}]   ;;  %s3272_s4 = inlined_call_operand.vmem [shape: bf16[8,16,128], index: 4, kind: output, shape index: {0}]   ;;  %s3273_s5 = inlined_call_operand.vmem [shape: f32[16,128], index: 5, kind: output, shape index: {1}]   ;;  %s3274_s6 = inlined_call_operand.vmem [shape: f32[16,128], index: 6, kind: output, shape index: {2}]   ;;  %s3275_s3 = inlined_call_operand.hbm [shape: bf16[128,512], index: 3, kind: input, shape index: {}]  }
   0x1   :  { %s28_s22 = sshll.u32 %s2429_s21, 4  ;;  %s40_s24 = sshll.u32 %s2430_s23, 4  ;;  %s29_s22 = int_to_ptr.vmem [resolvable:$true] %s28_s22  ;;  %s41_s24 = int_to_ptr.vmem [resolvable:$true] %s40_s24 }
   0x2   :  { %s2393_s25 = scalar_lea.vmem %s29_s22, 4096  ;;  %p2398_p1 = scmp.lt.s32.totalorder %s29_s22, %s29_s22 }
   0x3   :  { %p2394_p0 = scmp.ne.s32.totalorder %s29_s22, %s2393_s25  ;;  %p2399_p2 = scmp.lt.s32.totalorder %s2393_s25, %s2393_s25 }
   0x5   :  { %p2400_p3 = por %p2399_p2, %p2398_p1 }
   0x7   :  { %p2401_p4 = pnand %p2400_p3, %p2394_p0 }
   0x9   :  { %2404 = shalt.err (!%p2401_p4)  }
   0xa   :  { %31 = dma.hbm_to_vmem [thread:$0]  %s3271_s2, 4096, %s29_s22, [#allocation6] }
   0xb   :  { %s2413_s28 = scalar_lea.vmem %s41_s24, 4096  ;;  %p2418_p6 = scmp.lt.s32.totalorder %s41_s24, %s41_s24 }
   0xc   :  { %p2414_p5 = scmp.ne.s32.totalorder %s41_s24, %s2413_s28  ;;  %p2419_p7 = scmp.lt.s32.totalorder %s2413_s28, %s2413_s28 }
   0xe   :  { %p2420_p8 = por %p2419_p7, %p2418_p6 }
  0x10   :  { %p2421_p9 = pnand %p2420_p8, %p2414_p5 }
  0x12   :  { %2424 = shalt.err (!%p2421_p9)  }
  0x13   :  { %43 = dma.hbm_to_vmem [thread:$0]  %s3275_s3, 4096, %s41_s24, [#allocation6 + $0x1] }
  0x14   :  { %2425 = dma.done.wait [#allocation6], 4096 }
  0x15   :  { %2426 = vsyncadd [#allocation6], 4294963200 }
  0x16   :  { %2427 = dma.done.wait [#allocation6 + $0x1], 4096 }
  0x17   :  { %2428 = vsyncadd [#allocation6 + $0x1], 4294963200  ;;  %v3276_v0 = vmov 0   ;;  %v2089_v1 = vld [vmem:[#allocation4 + $0xe4] ss:$16 sps:$4 sm:$0xff]   ;;  %v2141_v43 = vld [vmem:[%s3269_s0 + $0x8] sm:$0xff]  }
  0x18   :  { %364 = vmatprep.mubr.bf16.mxu0 %v3276_v0  ;;  %477 = vmatprep.mubr.bf16.mxu1 %v3276_v0  ;;  %v2091_v2 = vld [vmem:[#allocation4 + $0xec] ss:$16 sps:$4 sm:$0xff]   ;;  %v2093_v3 = vld [vmem:[#allocation4 + $0xe0] ss:$16 sps:$4 sm:$0xff]   ;;  %v2094_v4 = vld [vmem:[#allocation4 + $0xe8] ss:$16 sps:$4 sm:$0xff]  }
  0x19   :  { %332 = vmatprep.subr.bf16.mxu0 %v2089_v1  ;;  %445 = vmatprep.subr.bf16.mxu1 %v2091_v2  ;;  %v2095_v5 = vld [vmem:[#allocation4 + $0xc4] ss:$16 sps:$4 sm:$0xff]   ;;  %v2097_v6 = vld [vmem:[#allocation4 + $0xcc] ss:$16 sps:$4 sm:$0xff]   ;;  %v2099_v7 = vld [vmem:[#allocation4 + $0xc0] ss:$16 sps:$4 sm:$0xff]  }
  0x1a   :  { %333 = vmatpush1.bf16.msra.mxu0 %v2093_v3  ;;  %446 = vmatpush1.bf16.msra.mxu1 %v2094_v4  ;;  %v2100_v8 = vld [vmem:[#allocation4 + $0xc8] ss:$16 sps:$4 sm:$0xff]   ;;  %v2101_v9 = vld [vmem:[#allocation4 + $0xa4] ss:$16 sps:$4 sm:$0xff]   ;;  %v2103_v10 = vld [vmem:[#allocation4 + $0xac] ss:$16 sps:$4 sm:$0xff]  }
  0x1b   :  { %334 = vmatprep.subr.bf16.mxu0 %v2095_v5  ;;  %447 = vmatprep.subr.bf16.mxu1 %v2097_v6  ;;  %v2105_v11 = vld [vmem:[#allocation4 + $0xa0] ss:$16 sps:$4 sm:$0xff]   ;;  %v2106_v12 = vld [vmem:[#allocation4 + $0xa8] ss:$16 sps:$4 sm:$0xff]   ;;  %v2107_v13 = vld [vmem:[#allocation4 + $0x84] ss:$16 sps:$4 sm:$0xff]  }
  0x1c   :  { %v2109_v14 = vld [vmem:[#allocation4 + $0x8c] ss:$16 sps:$4 sm:$0xff]   ;;  %v2111_v15 = vld [vmem:[#allocation4 + $0x80] ss:$16 sps:$4 sm:$0xff]   ;;  %v2112_v16 = vld [vmem:[#allocation4 + $0x88] ss:$16 sps:$4 sm:$0xff]  }
  0x1d   :  { %v2113_v17 = vld [vmem:[#allocation4 + $0x64] ss:$16 sps:$4 sm:$0xff]   ;;  %v2115_v18 = vld [vmem:[#allocation4 + $0x6c] ss:$16 sps:$4 sm:$0xff]   ;;  %v2117_v19 = vld [vmem:[#allocation4 + $0x60] ss:$16 sps:$4 sm:$0xff]  }
  0x1e   :  { %335 = vmatpush1.bf16.msra.mxu0 %v2099_v7  ;;  %448 = vmatpush1.bf16.msra.mxu1 %v2100_v8  ;;  %v2118_v20 = vld [vmem:[#allocation4 + $0x68] ss:$16 sps:$4 sm:$0xff]   ;;  %v2119_v21 = vld [vmem:[#allocation4 + $0x44] ss:$16 sps:$4 sm:$0xff]   ;;  %v2121_v22 = vld [vmem:[#allocation4 + $0x4c] ss:$16 sps:$4 sm:$0xff]  }
  0x1f   :  { %336 = vmatprep.subr.bf16.mxu0 %v2101_v9  ;;  %449 = vmatprep.subr.bf16.mxu1 %v2103_v10  ;;  %v2123_v23 = vld [vmem:[#allocation4 + $0x40] ss:$16 sps:$4 sm:$0xff]   ;;  %v2124_v24 = vld [vmem:[#allocation4 + $0x48] ss:$16 sps:$4 sm:$0xff]   ;;  %v2125_v25 = vld [vmem:[#allocation4 + $0x24] ss:$16 sps:$4 sm:$0xff]  }
  0x20   :  { %v2127_v26 = vld [vmem:[#allocation4 + $0x2c] ss:$16 sps:$4 sm:$0xff]   ;;  %v2129_v27 = vld [vmem:[#allocation4 + $0x20] ss:$16 sps:$4 sm:$0xff]   ;;  %v2130_v28 = vld [vmem:[#allocation4 + $0x28] ss:$16 sps:$4 sm:$0xff]  }
  0x21   :  { %v2131_v29 = vld [vmem:[#allocation4 + $0x4] ss:$16 sps:$4 sm:$0xff]   ;;  %v2133_v30 = vld [vmem:[#allocation4 + $0xc] ss:$16 sps:$4 sm:$0xff]   ;;  %v2135_v31 = vld [vmem:[#allocation4] ss:$16 sps:$4 sm:$0xff]  }
  0x22   :  { %337 = vmatpush1.bf16.msra.mxu0 %v2105_v11  ;;  %450 = vmatpush1.bf16.msra.mxu1 %v2106_v12  ;;  %v2136_v32 = vld [vmem:[#allocation4 + $0x8] ss:$16 sps:$4 sm:$0xff]   ;;  %v2476_v33 = vld [vmem:[#allocation5 + $0xe4] ss:$16 sps:$4 sm:$0xff]   ;;  %v2478_v34 = vld [vmem:[#allocation5 + $0xec] ss:$16 sps:$4 sm:$0xff]   ;;  %v104_v11 = vlaneseq }
  0x23   :  { %338 = vmatprep.subr.bf16.mxu0 %v2107_v13  ;;  %451 = vmatprep.subr.bf16.mxu1 %v2109_v14  ;;  %v2137_v35 = vld [vmem:[%s3269_s0] sm:$0xff]   ;;  %v2489_v38 = vld [vmem:[#allocation5 + $0xe8] ss:$16 sps:$4 sm:$0xff]   ;;  %v2491_v39 = vld [vmem:[#allocation5 + $0xcc] ss:$16 sps:$4 sm:$0xff]   ;;  %v2432_v10 = vmov 0.0|0.0  }
  0x24   :  { %v2483_v36 = vld [vmem:[#allocation5 + $0xe0] ss:$16 sps:$4 sm:$0xff]   ;;  %v2486_v37 = vld [vmem:[#allocation5 + $0xc4] ss:$16 sps:$4 sm:$0xff]   ;;  %v2502_v42 = vld [vmem:[#allocation5 + $0xc8] ss:$16 sps:$4 sm:$0xff]  }
  0x25   :  { %v2495_v40 = vld [vmem:[#allocation5 + $0xc0] ss:$16 sps:$4 sm:$0xff]   ;;  %v2499_v41 = vld [vmem:[#allocation5 + $0xa4] ss:$16 sps:$4 sm:$0xff]   ;;  %v2514_v46 = vld [vmem:[#allocation5 + $0xac] ss:$16 sps:$4 sm:$0xff]  }
  0x26   :  { %339 = vmatpush1.bf16.msra.mxu0 %v2111_v15  ;;  %452 = vmatpush1.bf16.msra.mxu1 %v2112_v16  ;;  %v2510_v44 = vld [vmem:[#allocation5 + $0xa0] ss:$16 sps:$4 sm:$0xff]   ;;  %v2512_v45 = vld [vmem:[#allocation5 + $0x84] ss:$16 sps:$4 sm:$0xff]   ;;  %v2517_v47 = vld [vmem:[#allocation5 + $0xa8] ss:$16 sps:$4 sm:$0xff]  }
  0x27   :  { %340 = vmatprep.subr.bf16.mxu0 %v2113_v17  ;;  %453 = vmatprep.subr.bf16.mxu1 %v2115_v18  ;;  %v2519_v48 = vld [vmem:[#allocation5 + $0x8c] ss:$16 sps:$4 sm:$0xff]   ;;  %v2525_v49 = vld [vmem:[#allocation5 + $0x80] ss:$16 sps:$4 sm:$0xff]   ;;  %v2527_v50 = vld [vmem:[#allocation5 + $0x64] ss:$16 sps:$4 sm:$0xff]  }
  0x28   :  { %v2531_v51 = vld [vmem:[#allocation5 + $0x88] ss:$16 sps:$4 sm:$0xff]   ;;  %v2148_v52 = vld [vmem:[%s3269_s0 + $0x10] sm:$0xff]   ;;  %v2540_v54 = vld [vmem:[#allocation5 + $0x6c] ss:$16 sps:$4 sm:$0xff]   ;;  %v105_v12 = vshrl.u32 %v104_v11, 7 }
  0x29   :  { %v2537_v53 = vld [vmem:[#allocation5 + $0x60] ss:$16 sps:$4 sm:$0xff]   ;;  %v2544_v55 = vld [vmem:[#allocation5 + $0x44] ss:$16 sps:$4 sm:$0xff]   ;;  %v2546_v56 = vld [vmem:[#allocation5 + $0x68] ss:$16 sps:$4 sm:$0xff]  }
  0x2a   :  { %341 = vmatpush1.bf16.msra.mxu0 %v2117_v19  ;;  %454 = vmatpush1.bf16.msra.mxu1 %v2118_v20  ;;  %v2548_v57 = vld [vmem:[#allocation5 + $0x4c] ss:$16 sps:$4 sm:$0xff]   ;;  %v2554_v58 = vld [vmem:[#allocation5 + $0x40] ss:$16 sps:$4 sm:$0xff]   ;;  %v2558_v59 = vld [vmem:[#allocation5 + $0x24] ss:$16 sps:$4 sm:$0xff]  }
  0x2b   :  { %342 = vmatprep.subr.bf16.mxu0 %v2119_v21  ;;  %455 = vmatprep.subr.bf16.mxu1 %v2121_v22  ;;  %v2560_v60 = vld [vmem:[#allocation5 + $0x48] ss:$16 sps:$4 sm:$0xff]   ;;  %v2567_v62 = vld [vmem:[#allocation5 + $0x20] ss:$16 sps:$4 sm:$0xff]   ;;  %v2569_v63 = vld [vmem:[#allocation5 + $0x2c] ss:$16 sps:$4 sm:$0xff]  }
  0x2c   :  { %v2155_v61 = vld [vmem:[%s3269_s0 + $0x18] sm:$0xff]   ;;  %v2573_v1 = vld [vmem:[#allocation5 + $0x4] ss:$16 sps:$4 sm:$0xff]   ;;  %v2583_v4 = vld [vmem:[#allocation5] ss:$16 sps:$4 sm:$0xff]   ;;  %v106_v17 = vsub.s32 0, %v105_v12 }
  0x2d   :  { %v2575_v2 = vld [vmem:[#allocation5 + $0x28] ss:$16 sps:$4 sm:$0xff]   ;;  %v2577_v3 = vld [vmem:[#allocation5 + $0xc] ss:$16 sps:$4 sm:$0xff]   ;;  %v2162_v6 = vld [vmem:[%s3269_s0 + $0x20] sm:$0xff]   ;;  %v114_v18 = vsub.s32 2, %v105_v12 }
  0x2e   :  { %343 = vmatpush1.bf16.msra.mxu0 %v2123_v23  ;;  %456 = vmatpush1.bf16.msra.mxu1 %v2124_v24  ;;  %v2587_v5 = vld [vmem:[#allocation5 + $0x8] ss:$16 sps:$4 sm:$0xff]   ;;  %v2176_v8 = vld [vmem:[%s3269_s0 + $0x30] sm:$0xff]   ;;  %v102_v19 = vld [vmem:[%s3270_s1] sm:$0xf]  ;;  %v110_v22 = vsub.s32 1, %v105_v12 }
  0x2f   :  { %344 = vmatprep.subr.bf16.mxu0 %v2125_v25  ;;  %457 = vmatprep.subr.bf16.mxu1 %v2127_v26  ;;  %v2169_v7 = vld [vmem:[%s3269_s0 + $0x28] sm:$0xff]   ;;  %v2183_v9 = vld [vmem:[%s3269_s0 + $0x38] sm:$0xff]   ;;  %v118_v23 = vsub.s32 3, %v105_v12  ;;  %v2667_v26 = vrot.slane %v102_v19, %v106_v17 }
  0x32   :  { %345 = vmatpush1.bf16.msra.mxu0 %v2129_v27  ;;  %458 = vmatpush1.bf16.msra.mxu1 %v2130_v28  ;;  %v2669_v27 = vrot.slane %v102_v19, %v114_v18 }
  0x33   :  { %346 = vmatprep.subr.bf16.mxu0 %v2131_v29  ;;  %459 = vmatprep.subr.bf16.mxu1 %v2133_v30  ;;  %v2671_v30 = vrot.slane %v102_v19, %v110_v22 }
  0x36   :  { %347 = vmatpush1.bf16.msra.mxu0 %v2135_v31  ;;  %460 = vmatpush1.bf16.msra.mxu1 %v2136_v32  ;;  %v2673_v31 = vrot.slane %v102_v19, %v118_v23 }
  0x37   :  { %755 = vmatprep.subr.bf16.mxu0 %v2476_v33  ;;  %798 = vmatprep.subr.bf16.mxu1 %v2478_v34 }
  0x39   :  { %365 = vmatmul.mubr.bf16.vlgmr.msra.gmra.mxu0 %v2137_v35  ;;  %478 = vmatmul.mubr.bf16.vlgmr.msra.gmra.mxu1 %v2137_v35 }
  0x3a   :  { %756 = vmatpush1.bf16.msra.mxu0 %v2483_v36  ;;  %374 = vmatprep.mubr.bf16.mxu0 %v3276_v0 }
  0x3b   :  { %487 = vmatprep.mubr.bf16.mxu1 %v3276_v0  ;;  %757 = vmatprep.subr.bf16.mxu0 %v2486_v37 }
  0x3c   :  { %799 = vmatpush1.bf16.msra.mxu1 %v2489_v38 }
  0x3d   :  { %800 = vmatprep.subr.bf16.mxu1 %v2491_v39 }
  0x3e   :  { %758 = vmatpush1.bf16.msra.mxu0 %v2495_v40 }
  0x3f   :  { %759 = vmatprep.subr.bf16.mxu0 %v2499_v41 }
  0x40   :  { %801 = vmatpush1.bf16.msra.mxu1 %v2502_v42 }
  0x41   :  { %375 = vmatmul.mubr.bf16.gmra.mxu0 %v2141_v43  ;;  %488 = vmatmul.mubr.bf16.gmra.mxu1 %v2141_v43 }
  0x42   :  { %384 = vmatprep.mubr.bf16.mxu0 %v3276_v0  ;;  %497 = vmatprep.mubr.bf16.mxu1 %v3276_v0 }
  0x43   :  { %760 = vmatpush1.bf16.msra.mxu0 %v2510_v44  ;;  %802 = vmatprep.subr.bf16.mxu1 %v2514_v46 }
  0x44   :  { %761 = vmatprep.subr.bf16.mxu0 %v2512_v45  ;;  %803 = vmatpush1.bf16.msra.mxu1 %v2517_v47 }
  0x45   :  { %804 = vmatprep.subr.bf16.mxu1 %v2519_v48 }
  0x47   :  { %762 = vmatpush1.bf16.msra.mxu0 %v2525_v49 }
  0x48   :  { %763 = vmatprep.subr.bf16.mxu0 %v2527_v50  ;;  %805 = vmatpush1.bf16.msra.mxu1 %v2531_v51 }
  0x49   :  { %385 = vmatmul.mubr.bf16.gmra.mxu0 %v2148_v52  ;;  %498 = vmatmul.mubr.bf16.gmra.mxu1 %v2148_v52 }
  0x4a   :  { %394 = vmatprep.mubr.bf16.mxu0 %v3276_v0  ;;  %507 = vmatprep.mubr.bf16.mxu1 %v3276_v0 }
  0x4b   :  { %764 = vmatpush1.bf16.msra.mxu0 %v2537_v53  ;;  %806 = vmatprep.subr.bf16.mxu1 %v2540_v54 }
  0x4c   :  { %765 = vmatprep.subr.bf16.mxu0 %v2544_v55  ;;  %807 = vmatpush1.bf16.msra.mxu1 %v2546_v56 }
  0x4d   :  { %808 = vmatprep.subr.bf16.mxu1 %v2548_v57 }
  0x4f   :  { %766 = vmatpush1.bf16.msra.mxu0 %v2554_v58 }
  0x50   :  { %767 = vmatprep.subr.bf16.mxu0 %v2558_v59  ;;  %809 = vmatpush1.bf16.msra.mxu1 %v2560_v60 }
  0x51   :  { %395 = vmatmul.mubr.bf16.gmra.mxu0 %v2155_v61  ;;  %508 = vmatmul.mubr.bf16.gmra.mxu1 %v2155_v61 }
  0x52   :  { %404 = vmatprep.mubr.bf16.mxu0 %v3276_v0  ;;  %517 = vmatprep.mubr.bf16.mxu1 %v3276_v0 }
  0x53   :  { %768 = vmatpush1.bf16.msra.mxu0 %v2567_v62  ;;  %810 = vmatprep.subr.bf16.mxu1 %v2569_v63 }
  0x54   :  { %769 = vmatprep.subr.bf16.mxu0 %v2573_v1  ;;  %811 = vmatpush1.bf16.msra.mxu1 %v2575_v2 }
  0x55   :  { %812 = vmatprep.subr.bf16.mxu1 %v2577_v3 }
  0x57   :  { %770 = vmatpush1.bf16.msra.mxu0 %v2583_v4 }
  0x58   :  { %813 = vmatpush1.bf16.msra.mxu1 %v2587_v5  ;;  %895 = vmatprep.subr.bf16.mxu0 %v2476_v33 }
  0x59   :  { %405 = vmatmul.mubr.bf16.gmra.mxu0 %v2162_v6  ;;  %518 = vmatmul.mubr.bf16.gmra.mxu1 %v2162_v6 }
  0x5a   :  { %414 = vmatprep.mubr.bf16.mxu0 %v3276_v0  ;;  %527 = vmatprep.mubr.bf16.mxu1 %v3276_v0 }
  0x5b   :  { %938 = vmatprep.subr.bf16.mxu1 %v2478_v34 }
  0x61   :  { %415 = vmatmul.mubr.bf16.gmra.mxu0 %v2169_v7  ;;  %528 = vmatmul.mubr.bf16.gmra.mxu1 %v2169_v7 }
  0x62   :  { %424 = vmatprep.mubr.bf16.mxu0 %v3276_v0  ;;  %537 = vmatprep.mubr.bf16.mxu1 %v3276_v0 }
  0x69   :  { %425 = vmatmul.mubr.bf16.gmra.mxu0 %v2176_v8  ;;  %538 = vmatmul.mubr.bf16.gmra.mxu1 %v2176_v8 }
  0x6a   :  { %434 = vmatprep.mubr.bf16.mxu0 %v3276_v0  ;;  %547 = vmatprep.mubr.bf16.mxu1 %v3276_v0 }
  0x71   :  { %435 = vmatmul.mubr.bf16.gmra.mxu0 %v2183_v9  ;;  %548 = vmatmul.mubr.bf16.gmra.mxu1 %v2183_v9 }
  0x72   :  { %787 = vmatprep.mubr.bf16.mxu0 %v3276_v0  ;;  %830 = vmatprep.mubr.bf16.mxu1 %v3276_v0 }
  0x79   :  { %788 = vmatmul.mubr.bf16.vlgmr.msra.gmra.mxu0 %v2432_v10  ;;  %831 = vmatmul.mubr.bf16.vlgmr.msra.gmra.mxu1 %v2432_v10 }
  0x7a   :  { %896 = vmatpush1.bf16.msra.mxu0 %v2483_v36  ;;  %939 = vmatpush1.bf16.msra.mxu1 %v2489_v38 }
  0x7b   :  { %897 = vmatprep.subr.bf16.mxu0 %v2486_v37  ;;  %940 = vmatprep.subr.bf16.mxu1 %v2491_v39 }
  0x7c   :  { %927 = vmatprep.mubr.bf16.mxu0 %v3276_v0  ;;  %970 = vmatprep.mubr.bf16.mxu1 %v3276_v0 }
  0x7e   :  { %898 = vmatpush1.bf16.msra.mxu0 %v2495_v40  ;;  %941 = vmatpush1.bf16.msra.mxu1 %v2502_v42 }
  0x7f   :  { %899 = vmatprep.subr.bf16.mxu0 %v2499_v41  ;;  %942 = vmatprep.subr.bf16.mxu1 %v2514_v46 }
  0x82   :  { %900 = vmatpush1.bf16.msra.mxu0 %v2510_v44  ;;  %943 = vmatpush1.bf16.msra.mxu1 %v2517_v47 }
  0x83   :  { %901 = vmatprep.subr.bf16.mxu0 %v2512_v45  ;;  %944 = vmatprep.subr.bf16.mxu1 %v2519_v48 }
  0x86   :  { %902 = vmatpush1.bf16.msra.mxu0 %v2525_v49  ;;  %945 = vmatpush1.bf16.msra.mxu1 %v2531_v51 }
  0x87   :  { %903 = vmatprep.subr.bf16.mxu0 %v2527_v50  ;;  %946 = vmatprep.subr.bf16.mxu1 %v2540_v54 }
  0x8a   :  { %904 = vmatpush1.bf16.msra.mxu0 %v2537_v53  ;;  %947 = vmatpush1.bf16.msra.mxu1 %v2546_v56 }
  0x8b   :  { %905 = vmatprep.subr.bf16.mxu0 %v2544_v55  ;;  %948 = vmatprep.subr.bf16.mxu1 %v2548_v57 }
  0x8e   :  { %906 = vmatpush1.bf16.msra.mxu0 %v2554_v58  ;;  %949 = vmatpush1.bf16.msra.mxu1 %v2560_v60 }
  0x8f   :  { %907 = vmatprep.subr.bf16.mxu0 %v2558_v59  ;;  %950 = vmatprep.subr.bf16.mxu1 %v2569_v63 }
  0x92   :  { %908 = vmatpush1.bf16.msra.mxu0 %v2567_v62  ;;  %951 = vmatpush1.bf16.msra.mxu1 %v2575_v2 }
  0x93   :  { %909 = vmatprep.subr.bf16.mxu0 %v2573_v1  ;;  %952 = vmatprep.subr.bf16.mxu1 %v2577_v3 }
  0x96   :  { %910 = vmatpush1.bf16.msra.mxu0 %v2583_v4  ;;  %953 = vmatpush1.bf16.msra.mxu1 %v2587_v5 }
  0x97   :  { %1036 = vmatprep.subr.bf16.mxu0 %v2476_v33  ;;  %1079 = vmatprep.subr.bf16.mxu1 %v2478_v34 }
  0xf9   :  { %v2648_v13 = vpop.f32.mrf.mxu0  ;;  %v2650_v14 = vpop.f32.mrf.mxu1 }
  0xfb   :  { %v2652_v15 = vpop.f32.mrf.mxu0  ;;  %v2654_v16 = vpop.f32.mrf.mxu1 }
  0xfd   :  { %v2659_v20 = vpop.f32.mrf.mxu0  ;;  %v2661_v21 = vpop.f32.mrf.mxu1 }
  0xff   :  { %v2663_v24 = vpop.f32.mrf.mxu0  ;;  %v2665_v25 = vpop.f32.mrf.mxu1 }
 0x101   :  { %v376_v28 = vpop.f32.mrf.mxu0  ;;  %v489_v29 = vpop.f32.mrf.mxu1 }
 0x102   :  { %v2676_v32 = vadd.f32 %v376_v28, %v2667_v26  ;;  %v2679_v35 = vadd.f32 %v489_v29, %v2669_v27 }
 0x103   :  { %v378_v43 = vpop.f32.mrf.mxu0  ;;  %v491_v52 = vpop.f32.mrf.mxu1 }
 0x104   :  { %v2682_v61 = vadd.f32 %v378_v43, %v2671_v30  ;;  %v2685_v6 = vadd.f32 %v491_v52, %v2673_v31 }
 0x105   :  { %v380_v7 = vpop.f32.mrf.mxu0  ;;  %v493_v8 = vpop.f32.mrf.mxu1 }
 0x106   :  { %3278 = vst [vmem:[#allocation15_spill] sm:$0xff] %v2685_v6  ;;  %v2688_v9 = vadd.f32 %v380_v7, %v2667_v26  ;;  %v2691_v10 = vadd.f32 %v493_v8, %v2669_v27 }
 0x107   :  { %v382_v11 = vpop.f32.mrf.mxu0  ;;  %v495_v12 = vpop.f32.mrf.mxu1 }
 0x108   :  { %3279 = vst [vmem:[#allocation16_spill] sm:$0xff] %v2691_v10  ;;  %v2694_v17 = vadd.f32 %v382_v11, %v2671_v30  ;;  %v2697_v18 = vadd.f32 %v495_v12, %v2673_v31 }
 0x109   :  { %v386_v19 = vpop.f32.mrf.mxu0  ;;  %v499_v22 = vpop.f32.mrf.mxu1 }
 0x10a   :  { %3280 = vst [vmem:[#allocation17_spill] sm:$0xff] %v2697_v18  ;;  %v2700_v23 = vadd.f32 %v386_v19, %v2667_v26  ;;  %v2703_v28 = vadd.f32 %v499_v22, %v2669_v27 }
 0x10b   :  { %v388_v29 = vpop.f32.mrf.mxu0  ;;  %v501_v43 = vpop.f32.mrf.mxu1 }
 0x10c   :  { %3281 = vst [vmem:[#allocation18_spill] sm:$0xff] %v2700_v23  ;;  %3282 = vst [vmem:[#allocation19_spill] sm:$0xff] %v2703_v28  ;;  %v2706_v52 = vadd.f32 %v388_v29, %v2671_v30  ;;  %v2709_v7 = vadd.f32 %v501_v43, %v2673_v31 }
 0x10d   :  { %v390_v8 = vpop.f32.mrf.mxu0  ;;  %v503_v11 = vpop.f32.mrf.mxu1 }
 0x10e   :  { %3283 = vst [vmem:[#allocation20_spill] sm:$0xff] %v2706_v52  ;;  %3284 = vst [vmem:[#allocation21_spill] sm:$0xff] %v2709_v7  ;;  %v2712_v12 = vadd.f32 %v390_v8, %v2667_v26  ;;  %v2715_v0 = vadd.f32 %v503_v11, %v2669_v27 }
 0x10f   :  { %v392_v19 = vpop.f32.mrf.mxu0  ;;  %v505_v23 = vpop.f32.mrf.mxu1 }
 0x110   :  { %3285 = vst [vmem:[#allocation22_spill] sm:$0xff] %v2712_v12  ;;  %3286 = vst [vmem:[#allocation23_spill] sm:$0xff] %v2715_v0  ;;  %v2718_v22 = vadd.f32 %v392_v19, %v2671_v30  ;;  %v2721_v28 = vadd.f32 %v505_v23, %v2673_v31 }
 0x111   :  { %v396_v29 = vpop.f32.mrf.mxu0  ;;  %v509_v52 = vpop.f32.mrf.mxu1 }
 0x112   :  { %3287 = vst [vmem:[#allocation24_spill] sm:$0xff] %v2718_v22  ;;  %3288 = vst [vmem:[#allocation25_spill] sm:$0xff] %v2721_v28  ;;  %v2724_v43 = vadd.f32 %v396_v29, %v2667_v26  ;;  %v2727_v7 = vadd.f32 %v509_v52, %v2669_v27 }
 0x113   :  { %v398_v8 = vpop.f32.mrf.mxu0  ;;  %v511_v12 = vpop.f32.mrf.mxu1 }
 0x114   :  { %3289 = vst [vmem:[#allocation26_spill] sm:$0xff] %v2724_v43  ;;  %3290 = vst [vmem:[#allocation27_spill] sm:$0xff] %v2727_v7  ;;  %v2730_v11 = vadd.f32 %v398_v8, %v2671_v30  ;;  %v2733_v0 = vadd.f32 %v511_v12, %v2673_v31 }
 0x115   :  { %v400_v19 = vpop.f32.mrf.mxu0  ;;  %v513_v22 = vpop.f32.mrf.mxu1 }
 0x116   :  { %3291 = vst [vmem:[#allocation28_spill] sm:$0xff] %v2730_v11  ;;  %3292 = vst [vmem:[#allocation29_spill] sm:$0xff] %v2733_v0  ;;  %v2736_v23 = vadd.f32 %v400_v19, %v2667_v26  ;;  %v2739_v28 = vadd.f32 %v513_v22, %v2669_v27 }
 0x117   :  { %v402_v29 = vpop.f32.mrf.mxu0  ;;  %v515_v43 = vpop.f32.mrf.mxu1 }
 0x118   :  { %3293 = vst [vmem:[#allocation30_spill] sm:$0xff] %v2736_v23  ;;  %3294 = vst [vmem:[#allocation31_spill] sm:$0xff] %v2739_v28  ;;  %v2742_v52 = vadd.f32 %v402_v29, %v2671_v30  ;;  %v2745_v7 = vadd.f32 %v515_v43, %v2673_v31 }
 0x119   :  { %v406_v8 = vpop.f32.mrf.mxu0  ;;  %v519_v11 = vpop.f32.mrf.mxu1 }
 0x11a   :  { %3295 = vst [vmem:[#allocation32_spill] sm:$0xff] %v2742_v52  ;;  %3296 = vst [vmem:[#allocation33_spill] sm:$0xff] %v2745_v7  ;;  %v2748_v12 = vadd.f32 %v406_v8, %v2667_v26  ;;  %v2751_v0 = vadd.f32 %v519_v11, %v2669_v27 }
 0x11b   :  { %v408_v19 = vpop.f32.mrf.mxu0  ;;  %v521_v23 = vpop.f32.mrf.mxu1 }
 0x11c   :  { %3297 = vst [vmem:[#allocation34_spill] sm:$0xff] %v2748_v12  ;;  %3298 = vst [vmem:[#allocation35_spill] sm:$0xff] %v2751_v0  ;;  %v2754_v22 = vadd.f32 %v408_v19, %v2671_v30  ;;  %v2757_v28 = vadd.f32 %v521_v23, %v2673_v31 }
 0x11d   :  { %v410_v29 = vpop.f32.mrf.mxu0  ;;  %v523_v52 = vpop.f32.mrf.mxu1 }
 0x11e   :  { %3299 = vst [vmem:[#allocation36_spill] sm:$0xff] %v2754_v22  ;;  %3300 = vst [vmem:[#allocation37_spill] sm:$0xff] %v2757_v28  ;;  %v2760_v43 = vadd.f32 %v410_v29, %v2667_v26  ;;  %v2763_v7 = vadd.f32 %v523_v52, %v2669_v27 }
 0x11f   :  { %v412_v8 = vpop.f32.mrf.mxu0  ;;  %v525_v12 = vpop.f32.mrf.mxu1 }
 0x120   :  { %3301 = vst [vmem:[#allocation38_spill] sm:$0xff] %v2760_v43  ;;  %3302 = vst [vmem:[#allocation39_spill] sm:$0xff] %v2763_v7  ;;  %v2766_v11 = vadd.f32 %v412_v8, %v2671_v30  ;;  %v2769_v0 = vadd.f32 %v525_v12, %v2673_v31 }
 0x121   :  { %v416_v19 = vpop.f32.mrf.mxu0  ;;  %v529_v22 = vpop.f32.mrf.mxu1 }
 0x122   :  { %3303 = vst [vmem:[#allocation40_spill] sm:$0xff] %v2766_v11  ;;  %3304 = vst [vmem:[#allocation41_spill] sm:$0xff] %v2769_v0  ;;  %v2772_v23 = vadd.f32 %v416_v19, %v2667_v26  ;;  %v2775_v28 = vadd.f32 %v529_v22, %v2669_v27 }
 0x123   :  { %v418_v29 = vpop.f32.mrf.mxu0  ;;  %v531_v43 = vpop.f32.mrf.mxu1 }
 0x124   :  { %3305 = vst [vmem:[#allocation42_spill] sm:$0xff] %v2772_v23  ;;  %3306 = vst [vmem:[#allocation43_spill] sm:$0xff] %v2775_v28  ;;  %v2778_v52 = vadd.f32 %v418_v29, %v2671_v30  ;;  %v2781_v7 = vadd.f32 %v531_v43, %v2673_v31 }
 0x125   :  { %v420_v8 = vpop.f32.mrf.mxu0  ;;  %v533_v11 = vpop.f32.mrf.mxu1 }
 0x126   :  { %3307 = vst [vmem:[#allocation44_spill] sm:$0xff] %v2778_v52  ;;  %3308 = vst [vmem:[#allocation45_spill] sm:$0xff] %v2781_v7  ;;  %v2784_v12 = vadd.f32 %v420_v8, %v2667_v26  ;;  %v2787_v0 = vadd.f32 %v533_v11, %v2669_v27 }
 0x127   :  { %v422_v19 = vpop.f32.mrf.mxu0  ;;  %v535_v23 = vpop.f32.mrf.mxu1 }
 0x128   :  { %3309 = vst [vmem:[#allocation46_spill] sm:$0xff] %v2784_v12  ;;  %3310 = vst [vmem:[#allocation47_spill] sm:$0xff] %v2787_v0  ;;  %v2790_v22 = vadd.f32 %v422_v19, %v2671_v30  ;;  %v2793_v28 = vadd.f32 %v535_v23, %v2673_v31 }
 0x129   :  { %v426_v29 = vpop.f32.mrf.mxu0  ;;  %v539_v52 = vpop.f32.mrf.mxu1 }
 0x12a   :  { %3311 = vst [vmem:[#allocation48_spill] sm:$0xff] %v2790_v22  ;;  %3312 = vst [vmem:[#allocation49_spill] sm:$0xff] %v2793_v28  ;;  %v2796_v43 = vadd.f32 %v426_v29, %v2667_v26  ;;  %v2799_v7 = vadd.f32 %v539_v52, %v2669_v27 }
 0x12b   :  { %v428_v8 = vpop.f32.mrf.mxu0  ;;  %v541_v12 = vpop.f32.mrf.mxu1 }
 0x12c   :  { %3313 = vst [vmem:[#allocation50_spill] sm:$0xff] %v2796_v43  ;;  %3314 = vst [vmem:[#allocation51_spill] sm:$0xff] %v2799_v7  ;;  %v2802_v11 = vadd.f32 %v428_v8, %v2671_v30  ;;  %v2805_v0 = vadd.f32 %v541_v12, %v2673_v31 }
 0x12d   :  { %v430_v19 = vpop.f32.mrf.mxu0  ;;  %v543_v22 = vpop.f32.mrf.mxu1 }
 0x12e   :  { %3315 = vst [vmem:[#allocation52_spill] sm:$0xff] %v2802_v11  ;;  %3316 = vst [vmem:[#allocation53_spill] sm:$0xff] %v2805_v0  ;;  %v2808_v23 = vadd.f32 %v430_v19, %v2667_v26  ;;  %v2811_v28 = vadd.f32 %v543_v22, %v2669_v27 }
 0x12f   :  { %v432_v29 = vpop.f32.mrf.mxu0  ;;  %v545_v43 = vpop.f32.mrf.mxu1 }
 0x130   :  { %3317 = vst [vmem:[#allocation54_spill] sm:$0xff] %v2808_v23  ;;  %3318 = vst [vmem:[#allocation55_spill] sm:$0xff] %v2811_v28  ;;  %v2814_v52 = vadd.f32 %v432_v29, %v2671_v30  ;;  %v2817_v7 = vadd.f32 %v545_v43, %v2673_v31 }
 0x131   :  { %v436_v8 = vpop.f32.mrf.mxu0  ;;  %v549_v11 = vpop.f32.mrf.mxu1 }
 0x132   :  { %3319 = vst [vmem:[#allocation56_spill] sm:$0xff] %v2814_v52  ;;  %3320 = vst [vmem:[#allocation57_spill] sm:$0xff] %v2817_v7  ;;  %v2820_v12 = vadd.f32 %v436_v8, %v2667_v26  ;;  %v2823_v0 = vadd.f32 %v549_v11, %v2669_v27  ;;  %v367_v11 = vadd.f32 %v2648_v13, %v2667_v26 }
 0x133   :  { %v438_v19 = vpop.f32.mrf.mxu0  ;;  %v551_v23 = vpop.f32.mrf.mxu1 }
 0x134   :  { %3321 = vst [vmem:[#allocation58_spill] sm:$0xff] %v2820_v12  ;;  %3322 = vst [vmem:[#allocation59_spill] sm:$0xff] %v2823_v0  ;;  %v2826_v22 = vadd.f32 %v438_v19, %v2671_v30  ;;  %v2829_v28 = vadd.f32 %v551_v23, %v2673_v31 }
 0x135   :  { %v440_v29 = vpop.f32.mrf.mxu0  ;;  %v553_v52 = vpop.f32.mrf.mxu1 }
 0x136   :  { %3323 = vst [vmem:[#allocation60_spill] sm:$0xff] %v2826_v22  ;;  %3324 = vst [vmem:[#allocation61_spill] sm:$0xff] %v2829_v28  ;;  %v2832_v43 = vadd.f32 %v440_v29, %v2667_v26  ;;  %v2835_v7 = vadd.f32 %v553_v52, %v2669_v27  ;;  %v369_v29 = vadd.f32 %v2652_v15, %v2671_v30 }
 0x137   :  { %v442_v8 = vpop.f32.mrf.mxu0  ;;  %v555_v12 = vpop.f32.mrf.mxu1  ;;  %v480_v52 = vadd.f32 %v2650_v14, %v2669_v27  ;;  %v371_v22 = vadd.f32 %v2659_v20, %v2667_v26  ;;  %v484_v20 = vadd.f32 %v2661_v21, %v2669_v27 }
 0x138   :  { %3325 = vst [vmem:[#allocation62_spill] sm:$0xff] %v2832_v43  ;;  %3326 = vst [vmem:[#allocation63_spill] sm:$0xff] %v2835_v7  ;;  %v2840_v0 = vadd.f32 %v442_v8, %v2671_v30  ;;  %v2843_v19 = vadd.f32 %v555_v12, %v2673_v31  ;;  %v373_v12 = vadd.f32 %v2663_v24, %v2671_v30 }
 0x139   :  { %v789_v23 = vpop.f32.mrf.mxu0  ;;  %v832_v28 = vpop.f32.mrf.mxu1  ;;  %v486_v30 = vadd.f32 %v2665_v25, %v2673_v31 }
 0x13a   :  { %3327 = vst [vmem:[#allocation64_spill] sm:$0xff] %v2840_v0  ;;  %3328 = vst [vmem:[#allocation65_spill] sm:$0xff] %v2843_v19  ;;  %v841_v43 = vadd.f32 %v789_v23, %v367_v11  ;;  %v843_v8 = vadd.f32 %v832_v28, %v480_v52 }
 0x13b   :  { %v791_v7 = vpop.f32.mrf.mxu0  ;;  %v834_v0 = vpop.f32.mrf.mxu1 }
 0x13c   :  { %v849_v13 = vmul.f32 0.5, %v841_v43  ;;  %v842_v18 = vadd.f32 %v791_v7, %v369_v29  ;;  %v482_v7 = vadd.f32 %v2654_v16, %v2673_v31 }
 0x13d   :  { %v793_v6 = vpop.f32.mrf.mxu0  ;;  %v836_v14 = vpop.f32.mrf.mxu1 }
 0x13e   :  { %2193 = vtanh.f32 %v849_v13  ;;  %v857_v19 = vmul.f32 0.5, %v842_v18  ;;  %v845_v10 = vadd.f32 %v793_v6, %v371_v22  ;;  %v847_v28 = vadd.f32 %v836_v14, %v484_v20 }
 0x13f   :  { %v795_v15 = vpop.f32.mrf.mxu0  ;;  %v838_v24 = vpop.f32.mrf.mxu1  ;;  %v844_v6 = vadd.f32 %v834_v0, %v482_v7 }
 0x140   :  { %2195 = vtanh.f32 %v857_v19  ;;  %v850_v11 = vmul.f32 0.5, %v845_v10  ;;  %v846_v23 = vadd.f32 %v795_v15, %v373_v12  ;;  %v848_v10 = vadd.f32 %v838_v24, %v486_v30 }
 0x141   :  { %2197 = vtanh.f32 %v843_v8  ;;  %v867_v19 = vmul.f32 0.5, %v844_v6 }
 0x142   :  { %2199 = vtanh.f32 %v850_v11  ;;  %v858_v26 = vmul.f32 0.5, %v846_v23  ;;  %v868_v52 = vmul.f32 0.5, %v848_v10 }
 0x144   :  { %2201 = vtanh.f32 %v858_v26 }
 0x145   :  { %2203 = vtanh.f32 %v847_v28 }
 0x146   :  { %2205 = vtanh.f32 %v867_v19 }
 0x147   :  { %2207 = vtanh.f32 %v868_v52 }
 0x14b   :  { %v2194_v18 = vpop.eup %2193 }
 0x14c   :  { %v853_v22 = vadd.f32 1.0, %v2194_v18 }
 0x14d   :  { %v2196_v43 = vpop.eup %2195 }
 0x14e   :  { %v2198_v29 = vpop.eup %2197  ;;  %v855_v21 = vmul.f32 0.5, %v853_v22  ;;  %v861_v27 = vadd.f32 1.0, %v2196_v43 }
 0x14f   :  { %v2200_v13 = vpop.eup %2199 }
 0x150   :  { %v863_v8 = vmul.f32 0.5, %v861_v27  ;;  %v877_v12 = vmul.f32 %v2198_v29, %v855_v21  ;;  %v854_v15 = vadd.f32 1.0, %v2200_v13  ;;  %v3329_v27 = vmov 0  }
 0x151   :  { %v2202_v16 = vpop.eup %2201 }
 0x152   :  { %v875_v11 = vmul.f32 0.0, %v863_v8  ;;  %v856_v23 = vmul.f32 0.5, %v854_v15  ;;  %v862_v25 = vadd.f32 1.0, %v2202_v16  ;;  %v2204_v14 = vpop.eup %2203 }
 0x153   :  { %v2206_v7 = vpop.eup %2205 }
 0x154   :  { %v2859_v0 = vadd.f32 %v877_v12, %v875_v11  ;;  %v864_v31 = vmul.f32 0.5, %v862_v25  ;;  %v878_v26 = vmul.f32 %v2204_v14, %v856_v23  ;;  %v2208_v24 = vpop.eup %2207  ;;  %v871_v30 = vadd.f32 1.0, %v2206_v7 }
 0x155   :  { %v872_v6 = vadd.f32 1.0, %v2208_v24 }
 0x156   :  { %v876_v20 = vmul.f32 0.0, %v864_v31  ;;  %2209 = vtanh.f32 %v2859_v0  ;;  %v873_v18 = vmul.f32 0.5, %v871_v30 }
 0x157   :  { %v874_v22 = vmul.f32 0.5, %v872_v6  ;;  %v3332_v6 = vld [vmem:[#allocation17_spill] sm:$0xff] }
 0x158   :  { %v2862_v28 = vadd.f32 %v878_v26, %v876_v20 }
 0x15a   :  { %2211 = vtanh.f32 %v2862_v28 }
 0x163   :  { %v2210_v10 = vpop.eup %2209 }
 0x164   :  { %v883_v19 = vmul.f32 %v2210_v10, %v873_v18 }
 0x167   :  { %v2212_v43 = vpop.eup %2211 }
 0x168   :  { %v884_v29 = vmul.f32 %v2212_v43, %v874_v22 }
 0x16a   :  { %v885_v21 = vpack.c.bf16 %v884_v29, %v883_v19 }
 0x16c   :  { %2042 = vst [vmem:[%s3272_s4] sm:$0xff] %v885_v21   ;;  %928 = vmatmul.mubr.bf16.vlgmr.msra.gmra.mxu0 %v885_v21  ;;  %971 = vmatmul.mubr.bf16.vlgmr.msra.gmra.mxu1 %v885_v21 }
 0x16d   :  { %1037 = vmatpush1.bf16.msra.mxu0 %v2483_v36  ;;  %1080 = vmatpush1.bf16.msra.mxu1 %v2489_v38 }
 0x16e   :  { %1038 = vmatprep.subr.bf16.mxu0 %v2486_v37  ;;  %1081 = vmatprep.subr.bf16.mxu1 %v2491_v39 }
 0x16f   :  { %1068 = vmatprep.mubr.bf16.mxu0 %v3329_v27  ;;  %1111 = vmatprep.mubr.bf16.mxu1 %v3329_v27 }
 0x171   :  { %1039 = vmatpush1.bf16.msra.mxu0 %v2495_v40  ;;  %1082 = vmatpush1.bf16.msra.mxu1 %v2502_v42 }
 0x172   :  { %1040 = vmatprep.subr.bf16.mxu0 %v2499_v41  ;;  %1083 = vmatprep.subr.bf16.mxu1 %v2514_v46 }
 0x175   :  { %1041 = vmatpush1.bf16.msra.mxu0 %v2510_v44  ;;  %1084 = vmatpush1.bf16.msra.mxu1 %v2517_v47 }
 0x176   :  { %1042 = vmatprep.subr.bf16.mxu0 %v2512_v45  ;;  %1085 = vmatprep.subr.bf16.mxu1 %v2519_v48 }
 0x179   :  { %1043 = vmatpush1.bf16.msra.mxu0 %v2525_v49  ;;  %1086 = vmatpush1.bf16.msra.mxu1 %v2531_v51 }
 0x17a   :  { %1044 = vmatprep.subr.bf16.mxu0 %v2527_v50  ;;  %1087 = vmatprep.subr.bf16.mxu1 %v2540_v54 }
 0x17d   :  { %1045 = vmatpush1.bf16.msra.mxu0 %v2537_v53  ;;  %1088 = vmatpush1.bf16.msra.mxu1 %v2546_v56 }
 0x17e   :  { %1046 = vmatprep.subr.bf16.mxu0 %v2544_v55  ;;  %1089 = vmatprep.subr.bf16.mxu1 %v2548_v57 }
 0x181   :  { %1047 = vmatpush1.bf16.msra.mxu0 %v2554_v58  ;;  %1090 = vmatpush1.bf16.msra.mxu1 %v2560_v60 }
 0x182   :  { %1048 = vmatprep.subr.bf16.mxu0 %v2558_v59  ;;  %1091 = vmatprep.subr.bf16.mxu1 %v2569_v63 }
 0x185   :  { %1049 = vmatpush1.bf16.msra.mxu0 %v2567_v62  ;;  %1092 = vmatpush1.bf16.msra.mxu1 %v2575_v2 }
 0x186   :  { %1050 = vmatprep.subr.bf16.mxu0 %v2573_v1  ;;  %1093 = vmatprep.subr.bf16.mxu1 %v2577_v3 }
 0x189   :  { %1051 = vmatpush1.bf16.msra.mxu0 %v2583_v4  ;;  %1094 = vmatpush1.bf16.msra.mxu1 %v2587_v5 }
 0x18a   :  { %1177 = vmatprep.subr.bf16.mxu0 %v2476_v33  ;;  %1220 = vmatprep.subr.bf16.mxu1 %v2478_v34 }
 0x22c   :  { %v929_v52 = vpop.f32.mrf.mxu0  ;;  %v972_v13 = vpop.f32.mrf.mxu1 }
 0x22d   :  { %v981_v8 = vadd.f32 %v929_v52, %v2676_v32  ;;  %v983_v23 = vadd.f32 %v972_v13, %v2679_v35  ;;  %v3330_v32 = vld [vmem:[#allocation16_spill] sm:$0xff]  ;;  %v3331_v35 = vld [vmem:[#allocation15_spill] sm:$0xff] }
 0x22e   :  { %v931_v12 = vpop.f32.mrf.mxu0  ;;  %v974_v15 = vpop.f32.mrf.mxu1 }
 0x22f   :  { %v989_v16 = vmul.f32 0.5, %v981_v8  ;;  %v982_v11 = vadd.f32 %v931_v12, %v2682_v61  ;;  %v984_v30 = vadd.f32 %v974_v15, %v3331_v35 }
 0x230   :  { %v933_v25 = vpop.f32.mrf.mxu0  ;;  %v976_v20 = vpop.f32.mrf.mxu1 }
 0x231   :  { %2213 = vtanh.f32 %v989_v16  ;;  %v997_v31 = vmul.f32 0.5, %v982_v11  ;;  %v985_v14 = vadd.f32 %v933_v25, %v2688_v9  ;;  %v987_v7 = vadd.f32 %v976_v20, %v3330_v32 }
 0x232   :  { %v935_v33 = vpop.f32.mrf.mxu0  ;;  %v978_v61 = vpop.f32.mrf.mxu1  ;;  %v1007_v43 = vmul.f32 0.5, %v984_v30 }
 0x233   :  { %2215 = vtanh.f32 %v997_v31  ;;  %v990_v34 = vmul.f32 0.5, %v985_v14  ;;  %v986_v26 = vadd.f32 %v935_v33, %v2694_v17  ;;  %v988_v10 = vadd.f32 %v978_v61, %v3332_v6 }
 0x234   :  { %2217 = vtanh.f32 %v983_v23 }
 0x235   :  { %2219 = vtanh.f32 %v990_v34  ;;  %v998_v24 = vmul.f32 0.5, %v986_v26  ;;  %v1008_v17 = vmul.f32 0.5, %v988_v10 }
 0x237   :  { %2221 = vtanh.f32 %v998_v24 }
 0x238   :  { %2223 = vtanh.f32 %v987_v7 }
 0x239   :  { %2225 = vtanh.f32 %v1007_v43 }
 0x23a   :  { %2227 = vtanh.f32 %v1008_v17 }
 0x23e   :  { %v2214_v18 = vpop.eup %2213 }
 0x23f   :  { %v993_v9 = vadd.f32 1.0, %v2214_v18 }
 0x240   :  { %v2216_v22 = vpop.eup %2215 }
 0x241   :  { %v2218_v19 = vpop.eup %2217  ;;  %v995_v29 = vmul.f32 0.5, %v993_v9  ;;  %v1001_v21 = vadd.f32 1.0, %v2216_v22 }
 0x242   :  { %v2220_v52 = vpop.eup %2219 }
 0x243   :  { %v1003_v13 = vmul.f32 0.5, %v1001_v21  ;;  %v1017_v8 = vmul.f32 %v2218_v19, %v995_v29  ;;  %v994_v12 = vadd.f32 1.0, %v2220_v52  ;;  %v3339_v19 = vld [vmem:[#allocation21_spill] sm:$0xff] }
 0x244   :  { %v2222_v16 = vpop.eup %2221  ;;  %v3340_v21 = vld [vmem:[#allocation25_spill] sm:$0xff] }
 0x245   :  { %v1015_v11 = vmul.f32 %v1003_v13, %v2859_v0  ;;  %v996_v23 = vmul.f32 0.5, %v994_v12  ;;  %v1002_v15 = vadd.f32 1.0, %v2222_v16  ;;  %v2224_v25 = vpop.eup %2223 }
 0x246   :  { %v2226_v26 = vpop.eup %2225 }
 0x247   :  { %v2911_v31 = vadd.f32 %v1017_v8, %v1015_v11  ;;  %v1004_v14 = vmul.f32 0.5, %v1002_v15  ;;  %v1018_v20 = vmul.f32 %v2224_v25, %v996_v23  ;;  %v2228_v32 = vpop.eup %2227  ;;  %v1011_v7 = vadd.f32 1.0, %v2226_v26 }
 0x248   :  { %v1012_v0 = vadd.f32 1.0, %v2228_v32 }
 0x249   :  { %v1016_v33 = vmul.f32 %v1004_v14, %v2862_v28  ;;  %2229 = vtanh.f32 %v2911_v31  ;;  %v1013_v61 = vmul.f32 0.5, %v1011_v7  ;;  %v3338_v28 = vld [vmem:[#allocation23_spill] sm:$0xff] }
 0x24a   :  { %v1014_v35 = vmul.f32 0.5, %v1012_v0 }
 0x24b   :  { %v2915_v34 = vadd.f32 %v1018_v20, %v1016_v33 }
 0x24d   :  { %2231 = vtanh.f32 %v2915_v34 }
 0x256   :  { %v2230_v24 = vpop.eup %2229 }
 0x257   :  { %v1023_v6 = vmul.f32 %v2230_v24, %v1013_v61 }
 0x25a   :  { %v2232_v30 = vpop.eup %2231 }
 0x25b   :  { %v1024_v10 = vmul.f32 %v2232_v30, %v1014_v35 }
 0x25d   :  { %v1025_v18 = vpack.c.bf16 %v1024_v10, %v1023_v6 }
 0x25f   :  { %2078 = vst [vmem:[%s3272_s4 + $0x8] sm:$0xff] %v1025_v18   ;;  %1069 = vmatmul.mubr.bf16.vlgmr.msra.gmra.mxu0 %v1025_v18  ;;  %1112 = vmatmul.mubr.bf16.vlgmr.msra.gmra.mxu1 %v1025_v18 }
 0x260   :  { %1178 = vmatpush1.bf16.msra.mxu0 %v2483_v36  ;;  %1221 = vmatpush1.bf16.msra.mxu1 %v2489_v38  ;;  %v2953_v36 = vld [vmem:[#allocation5 + $0xe4] ss:$16 sps:$4 sm:$0xff]  }
 0x261   :  { %1179 = vmatprep.subr.bf16.mxu0 %v2486_v37  ;;  %1222 = vmatprep.subr.bf16.mxu1 %v2491_v39  ;;  %v2956_v37 = vld [vmem:[#allocation5 + $0xec] ss:$16 sps:$4 sm:$0xff]  }
 0x262   :  { %1209 = vmatprep.mubr.bf16.mxu0 %v3329_v27  ;;  %1252 = vmatprep.mubr.bf16.mxu1 %v3329_v27 }
 0x264   :  { %1180 = vmatpush1.bf16.msra.mxu0 %v2495_v40  ;;  %1223 = vmatpush1.bf16.msra.mxu1 %v2502_v42  ;;  %v3333_v40 = vld [vmem:[#allocation18_spill] sm:$0xff] }
 0x265   :  { %1181 = vmatprep.subr.bf16.mxu0 %v2499_v41  ;;  %1224 = vmatprep.subr.bf16.mxu1 %v2514_v46  ;;  %v3334_v46 = vld [vmem:[#allocation20_spill] sm:$0xff] }
 0x268   :  { %1182 = vmatpush1.bf16.msra.mxu0 %v2510_v44  ;;  %1225 = vmatpush1.bf16.msra.mxu1 %v2517_v47 }
 0x269   :  { %1183 = vmatprep.subr.bf16.mxu0 %v2512_v45  ;;  %1226 = vmatprep.subr.bf16.mxu1 %v2519_v48  ;;  %v3335_v48 = vld [vmem:[#allocation19_spill] sm:$0xff] }
 0x26c   :  { %1184 = vmatpush1.bf16.msra.mxu0 %v2525_v49  ;;  %1227 = vmatpush1.bf16.msra.mxu1 %v2531_v51 }
 0x26d   :  { %1185 = vmatprep.subr.bf16.mxu0 %v2527_v50  ;;  %1228 = vmatprep.subr.bf16.mxu1 %v2540_v54 }
 0x270   :  { %1186 = vmatpush1.bf16.msra.mxu0 %v2537_v53  ;;  %1229 = vmatpush1.bf16.msra.mxu1 %v2546_v56  ;;  %v3336_v53 = vld [vmem:[#allocation22_spill] sm:$0xff] }
 0x271   :  { %1187 = vmatprep.subr.bf16.mxu0 %v2544_v55  ;;  %1230 = vmatprep.subr.bf16.mxu1 %v2548_v57 }
 0x274   :  { %1188 = vmatpush1.bf16.msra.mxu0 %v2554_v58  ;;  %1231 = vmatpush1.bf16.msra.mxu1 %v2560_v60  ;;  %v3337_v58 = vld [vmem:[#allocation24_spill] sm:$0xff] }
 0x275   :  { %1189 = vmatprep.subr.bf16.mxu0 %v2558_v59  ;;  %1232 = vmatprep.subr.bf16.mxu1 %v2569_v63 }
 0x278   :  { %1190 = vmatpush1.bf16.msra.mxu0 %v2567_v62  ;;  %1233 = vmatpush1.bf16.msra.mxu1 %v2575_v2 }
 0x279   :  { %1191 = vmatprep.subr.bf16.mxu0 %v2573_v1  ;;  %1234 = vmatprep.subr.bf16.mxu1 %v2577_v3 }
 0x27c   :  { %1192 = vmatpush1.bf16.msra.mxu0 %v2583_v4  ;;  %1235 = vmatpush1.bf16.msra.mxu1 %v2587_v5 }
 0x27d   :  { %1318 = vmatprep.subr.bf16.mxu0 %v2953_v36  ;;  %1361 = vmatprep.subr.bf16.mxu1 %v2956_v37 }
 0x31f   :  { %v1070_v38 = vpop.f32.mrf.mxu0  ;;  %v1113_v39 = vpop.f32.mrf.mxu1 }
 0x320   :  { %v1122_v41 = vadd.f32 %v1070_v38, %v3333_v40  ;;  %v1124_v49 = vadd.f32 %v1113_v39, %v3335_v48  ;;  %v2981_v48 = vld [vmem:[#allocation5 + $0xe8] ss:$16 sps:$4 sm:$0xff]  }
 0x321   :  { %v1072_v42 = vpop.f32.mrf.mxu0  ;;  %v1115_v44 = vpop.f32.mrf.mxu1 }
 0x322   :  { %v1130_v45 = vmul.f32 0.5, %v1122_v41  ;;  %v1123_v47 = vadd.f32 %v1072_v42, %v3334_v46  ;;  %v1125_v29 = vadd.f32 %v1115_v44, %v3339_v19  ;;  %v3028_v19 = vld [vmem:[#allocation5 + $0x60] ss:$16 sps:$4 sm:$0xff]  }
 0x323   :  { %v1074_v50 = vpop.f32.mrf.mxu0  ;;  %v1117_v55 = vpop.f32.mrf.mxu1 }
 0x324   :  { %2233 = vtanh.f32 %v1130_v45  ;;  %v1138_v51 = vmul.f32 0.5, %v1123_v47  ;;  %v1126_v54 = vadd.f32 %v1074_v50, %v3336_v53  ;;  %v1128_v9 = vadd.f32 %v1117_v55, %v3338_v28  ;;  %v2987_v50 = vld [vmem:[#allocation5 + $0xcc] ss:$16 sps:$4 sm:$0xff]   ;;  %v2995_v53 = vld [vmem:[#allocation5 + $0xc8] ss:$16 sps:$4 sm:$0xff]  }
 0x325   :  { %v1076_v56 = vpop.f32.mrf.mxu0  ;;  %v1119_v43 = vpop.f32.mrf.mxu1  ;;  %v1148_v12 = vmul.f32 0.5, %v1125_v29  ;;  %v3001_v55 = vld [vmem:[#allocation5 + $0xac] ss:$16 sps:$4 sm:$0xff]   ;;  %v3016_v28 = vld [vmem:[#allocation5 + $0x80] ss:$16 sps:$4 sm:$0xff]  }
 0x326   :  { %2235 = vtanh.f32 %v1138_v51  ;;  %v1131_v57 = vmul.f32 0.5, %v1126_v54  ;;  %v1127_v59 = vadd.f32 %v1076_v56, %v3337_v58  ;;  %v1129_v17 = vadd.f32 %v1119_v43, %v3340_v21  ;;  %v2992_v51 = vld [vmem:[#allocation5 + $0xc0] ss:$16 sps:$4 sm:$0xff]   ;;  %v2998_v54 = vld [vmem:[#allocation5 + $0xa4] ss:$16 sps:$4 sm:$0xff]  }
 0x327   :  { %2237 = vtanh.f32 %v1124_v49  ;;  %v2984_v49 = vld [vmem:[#allocation5 + $0xc4] ss:$16 sps:$4 sm:$0xff]   ;;  %v3004_v56 = vld [vmem:[#allocation5 + $0xa0] ss:$16 sps:$4 sm:$0xff]   ;;  %v3025_v43 = vld [vmem:[#allocation5 + $0x6c] ss:$16 sps:$4 sm:$0xff]  }
 0x328   :  { %2239 = vtanh.f32 %v1131_v57  ;;  %v1139_v22 = vmul.f32 0.5, %v1127_v59  ;;  %v1149_v15 = vmul.f32 0.5, %v1129_v17  ;;  %v3007_v57 = vld [vmem:[#allocation5 + $0xa8] ss:$16 sps:$4 sm:$0xff]   ;;  %v3010_v58 = vld [vmem:[#allocation5 + $0x84] ss:$16 sps:$4 sm:$0xff]  }
 0x329   :  { %v3013_v59 = vld [vmem:[#allocation5 + $0x8c] ss:$16 sps:$4 sm:$0xff]   ;;  %v3031_v29 = vld [vmem:[#allocation5 + $0x68] ss:$16 sps:$4 sm:$0xff]   ;;  %v3034_v21 = vld [vmem:[#allocation5 + $0x44] ss:$16 sps:$4 sm:$0xff]  }
 0x32a   :  { %2241 = vtanh.f32 %v1139_v22  ;;  %v3022_v22 = vld [vmem:[#allocation5 + $0x64] ss:$16 sps:$4 sm:$0xff]   ;;  %v3037_v17 = vld [vmem:[#allocation5 + $0x4c] ss:$16 sps:$4 sm:$0xff]  }
 0x32b   :  { %2243 = vtanh.f32 %v1128_v9  ;;  %v3019_v9 = vld [vmem:[#allocation5 + $0x88] ss:$16 sps:$4 sm:$0xff]  }
 0x32c   :  { %2245 = vtanh.f32 %v1148_v12  ;;  %v3341_v12 = vld [vmem:[#allocation26_spill] sm:$0xff] }
 0x32d   :  { %2247 = vtanh.f32 %v1149_v15 }
 0x331   :  { %v2234_v52 = vpop.eup %2233 }
 0x332   :  { %v1134_v13 = vadd.f32 1.0, %v2234_v52  ;;  %v3040_v52 = vld [vmem:[#allocation5 + $0x40] ss:$16 sps:$4 sm:$0xff]  }
 0x333   :  { %v2236_v8 = vpop.eup %2235 }
 0x334   :  { %v2238_v16 = vpop.eup %2237  ;;  %v1136_v11 = vmul.f32 0.5, %v1134_v13  ;;  %v1142_v23 = vadd.f32 1.0, %v2236_v8  ;;  %v3044_v13 = vld [vmem:[#allocation5 + $0x24] ss:$16 sps:$4 sm:$0xff]  }
 0x335   :  { %v2240_v25 = vpop.eup %2239 }
 0x336   :  { %v1144_v14 = vmul.f32 0.5, %v1142_v23  ;;  %v1158_v20 = vmul.f32 %v2238_v16, %v1136_v11  ;;  %v1135_v33 = vadd.f32 1.0, %v2240_v25  ;;  %v3344_v25 = vld [vmem:[#allocation30_spill] sm:$0xff] }
 0x337   :  { %v2242_v26 = vpop.eup %2241 }
 0x338   :  { %v1156_v32 = vmul.f32 %v1144_v14, %v2911_v31  ;;  %v1137_v7 = vmul.f32 0.5, %v1135_v33  ;;  %v1143_v0 = vadd.f32 1.0, %v2242_v26  ;;  %v2244_v24 = vpop.eup %2243  ;;  %v3345_v26 = vld [vmem:[#allocation32_spill] sm:$0xff] }
 0x339   :  { %v2246_v18 = vpop.eup %2245 }
 0x33a   :  { %v2968_v61 = vadd.f32 %v1158_v20, %v1156_v32  ;;  %v1145_v35 = vmul.f32 0.5, %v1143_v0  ;;  %v1159_v30 = vmul.f32 %v2244_v24, %v1137_v7  ;;  %v2248_v38 = vpop.eup %2247  ;;  %v1152_v39 = vadd.f32 1.0, %v2246_v18  ;;  %v3346_v7 = vld [vmem:[#allocation31_spill] sm:$0xff]  ;;  %v3348_v18 = vld [vmem:[#allocation33_spill] sm:$0xff] }
 0x33b   :  { %v1153_v31 = vadd.f32 1.0, %v2248_v38 }
 0x33c   :  { %v1157_v6 = vmul.f32 %v1145_v35, %v2915_v34  ;;  %2249 = vtanh.f32 %v2968_v61  ;;  %v1154_v41 = vmul.f32 0.5, %v1152_v39  ;;  %v2978_v34 = vld [vmem:[#allocation5 + $0xe0] ss:$16 sps:$4 sm:$0xff]  }
 0x33d   :  { %v1155_v42 = vmul.f32 0.5, %v1153_v31 }
 0x33e   :  { %v2972_v10 = vadd.f32 %v1159_v30, %v1157_v6  ;;  %v3347_v30 = vld [vmem:[#allocation29_spill] sm:$0xff] }
 0x340   :  { %2251 = vtanh.f32 %v2972_v10 }
 0x349   :  { %v2250_v40 = vpop.eup %2249 }
 0x34a   :  { %v1164_v45 = vmul.f32 %v2250_v40, %v1154_v41 }
 0x34d   :  { %v2252_v44 = vpop.eup %2251 }
 0x34e   :  { %v1165_v46 = vmul.f32 %v2252_v44, %v1155_v42 }
 0x350   :  { %v1166_v47 = vpack.c.bf16 %v1165_v46, %v1164_v45 }
 0x352   :  { %2079 = vst [vmem:[%s3272_s4 + $0x10] sm:$0xff] %v1166_v47   ;;  %1210 = vmatmul.mubr.bf16.vlgmr.msra.gmra.mxu0 %v1166_v47  ;;  %1253 = vmatmul.mubr.bf16.vlgmr.msra.gmra.mxu1 %v1166_v47 }
 0x353   :  { %1319 = vmatpush1.bf16.msra.mxu0 %v2978_v34  ;;  %1362 = vmatpush1.bf16.msra.mxu1 %v2981_v48 }
 0x354   :  { %1320 = vmatprep.subr.bf16.mxu0 %v2984_v49  ;;  %1363 = vmatprep.subr.bf16.mxu1 %v2987_v50 }
 0x355   :  { %1350 = vmatprep.mubr.bf16.mxu0 %v3329_v27  ;;  %1393 = vmatprep.mubr.bf16.mxu1 %v3329_v27 }
 0x357   :  { %1321 = vmatpush1.bf16.msra.mxu0 %v2992_v51  ;;  %1364 = vmatpush1.bf16.msra.mxu1 %v2995_v53 }
 0x358   :  { %1322 = vmatprep.subr.bf16.mxu0 %v2998_v54  ;;  %1365 = vmatprep.subr.bf16.mxu1 %v3001_v55 }
 0x35b   :  { %1323 = vmatpush1.bf16.msra.mxu0 %v3004_v56  ;;  %1366 = vmatpush1.bf16.msra.mxu1 %v3007_v57 }
 0x35c   :  { %1324 = vmatprep.subr.bf16.mxu0 %v3010_v58  ;;  %1367 = vmatprep.subr.bf16.mxu1 %v3013_v59 }
 0x35f   :  { %1325 = vmatpush1.bf16.msra.mxu0 %v3016_v28  ;;  %1368 = vmatpush1.bf16.msra.mxu1 %v3019_v9 }
 0x360   :  { %1326 = vmatprep.subr.bf16.mxu0 %v3022_v22  ;;  %1369 = vmatprep.subr.bf16.mxu1 %v3025_v43 }
 0x363   :  { %1327 = vmatpush1.bf16.msra.mxu0 %v3028_v19  ;;  %1370 = vmatpush1.bf16.msra.mxu1 %v3031_v29 }
 0x364   :  { %1328 = vmatprep.subr.bf16.mxu0 %v3034_v21  ;;  %1371 = vmatprep.subr.bf16.mxu1 %v3037_v17 }
 0x367   :  { %1329 = vmatpush1.bf16.msra.mxu0 %v3040_v52  ;;  %1372 = vmatpush1.bf16.msra.mxu1 %v2560_v60 }
 0x368   :  { %1330 = vmatprep.subr.bf16.mxu0 %v3044_v13  ;;  %1373 = vmatprep.subr.bf16.mxu1 %v2569_v63 }
 0x36b   :  { %1331 = vmatpush1.bf16.msra.mxu0 %v2567_v62  ;;  %1374 = vmatpush1.bf16.msra.mxu1 %v2575_v2  ;;  %v3342_v2 = vld [vmem:[#allocation28_spill] sm:$0xff] }
 0x36c   :  { %1332 = vmatprep.subr.bf16.mxu0 %v2573_v1  ;;  %1375 = vmatprep.subr.bf16.mxu1 %v2577_v3  ;;  %v3343_v1 = vld [vmem:[#allocation27_spill] sm:$0xff] }
 0x36f   :  { %1333 = vmatpush1.bf16.msra.mxu0 %v2583_v4  ;;  %1376 = vmatpush1.bf16.msra.mxu1 %v2587_v5 }
 0x370   :  { %1459 = vmatprep.subr.bf16.mxu0 %v2953_v36  ;;  %1502 = vmatprep.subr.bf16.mxu1 %v2956_v37 }
 0x412   :  { %v1211_v60 = vpop.f32.mrf.mxu0  ;;  %v1254_v8 = vpop.f32.mrf.mxu1 }
 0x413   :  { %v1263_v63 = vadd.f32 %v1211_v60, %v3341_v12  ;;  %v1265_v15 = vadd.f32 %v1254_v8, %v3343_v1 }
 0x414   :  { %v1213_v16 = vpop.f32.mrf.mxu0  ;;  %v1256_v62 = vpop.f32.mrf.mxu1 }
 0x415   :  { %v1271_v11 = vmul.f32 0.5, %v1263_v63  ;;  %v1264_v23 = vadd.f32 %v1213_v16, %v3342_v2  ;;  %v1266_v6 = vadd.f32 %v1256_v62, %v3347_v30  ;;  %v3105_v30 = vld [vmem:[#allocation5 + $0x20] ss:$16 sps:$4 sm:$0xff]  }
 0x416   :  { %v1215_v3 = vpop.f32.mrf.mxu0  ;;  %v1258_v14 = vpop.f32.mrf.mxu1 }
 0x417   :  { %2253 = vtanh.f32 %v1271_v11  ;;  %v1279_v4 = vmul.f32 0.5, %v1264_v23  ;;  %v1267_v5 = vadd.f32 %v1215_v3, %v3344_v25  ;;  %v1269_v0 = vadd.f32 %v1258_v14, %v3346_v7 }
 0x418   :  { %v1217_v20 = vpop.f32.mrf.mxu0  ;;  %v1260_v35 = vpop.f32.mrf.mxu1  ;;  %v1289_v41 = vmul.f32 0.5, %v1266_v6  ;;  %v3108_v6 = vld [vmem:[#allocation5 + $0x28] ss:$16 sps:$4 sm:$0xff]  }
 0x419   :  { %2255 = vtanh.f32 %v1279_v4  ;;  %v1272_v33 = vmul.f32 0.5, %v1267_v5  ;;  %v1268_v32 = vadd.f32 %v1217_v20, %v3345_v26  ;;  %v1270_v38 = vadd.f32 %v1260_v35, %v3348_v18  ;;  %v3102_v35 = vld [vmem:[#allocation5 + $0x2c] ss:$16 sps:$4 sm:$0xff]   ;;  %v3111_v18 = vld [vmem:[#allocation5 + $0x4] ss:$16 sps:$4 sm:$0xff]  }
 0x41a   :  { %2257 = vtanh.f32 %v1265_v15 }
 0x41b   :  { %2259 = vtanh.f32 %v1272_v33  ;;  %v1280_v24 = vmul.f32 0.5, %v1268_v32  ;;  %v1290_v46 = vmul.f32 0.5, %v1270_v38  ;;  %v3114_v38 = vld [vmem:[#allocation5 + $0xc] ss:$16 sps:$4 sm:$0xff]  }
 0x41d   :  { %2261 = vtanh.f32 %v1280_v24 }
 0x41e   :  { %2263 = vtanh.f32 %v1269_v0 }
 0x41f   :  { %2265 = vtanh.f32 %v1289_v41 }
 0x420   :  { %2267 = vtanh.f32 %v1290_v46 }
 0x424   :  { %v2254_v39 = vpop.eup %2253 }
 0x425   :  { %v1275_v31 = vadd.f32 1.0, %v2254_v39  ;;  %v3117_v39 = vld [vmem:[#allocation5] ss:$16 sps:$4 sm:$0xff]  }
 0x426   :  { %v2256_v40 = vpop.eup %2255 }
 0x427   :  { %v2258_v42 = vpop.eup %2257  ;;  %v1277_v44 = vmul.f32 0.5, %v1275_v31  ;;  %v1283_v45 = vadd.f32 1.0, %v2256_v40  ;;  %v3120_v31 = vld [vmem:[#allocation5 + $0x8] ss:$16 sps:$4 sm:$0xff]  }
 0x428   :  { %v2260_v47 = vpop.eup %2259 }
 0x429   :  { %v1285_v60 = vmul.f32 0.5, %v1283_v45  ;;  %v1299_v8 = vmul.f32 %v2258_v42, %v1277_v44  ;;  %v1276_v12 = vadd.f32 1.0, %v2260_v47  ;;  %v3349_v42 = vld [vmem:[#allocation34_spill] sm:$0xff] }
 0x42a   :  { %v2262_v63 = vpop.eup %2261 }
 0x42b   :  { %v1297_v16 = vmul.f32 %v1285_v60, %v2968_v61  ;;  %v1278_v11 = vmul.f32 0.5, %v1276_v12  ;;  %v1284_v62 = vadd.f32 1.0, %v2262_v63  ;;  %v2264_v2 = vpop.eup %2263  ;;  %v3350_v60 = vld [vmem:[#allocation36_spill] sm:$0xff]  ;;  %v3351_v12 = vld [vmem:[#allocation35_spill] sm:$0xff] }
 0x42c   :  { %v2266_v25 = vpop.eup %2265 }
 0x42d   :  { %v3065_v23 = vadd.f32 %v1299_v8, %v1297_v16  ;;  %v1286_v1 = vmul.f32 0.5, %v1284_v62  ;;  %v1300_v15 = vmul.f32 %v2264_v2, %v1278_v11  ;;  %v2268_v5 = vpop.eup %2267  ;;  %v1293_v14 = vadd.f32 1.0, %v2266_v25  ;;  %v3352_v62 = vld [vmem:[#allocation38_spill] sm:$0xff]  ;;  %v3353_v25 = vld [vmem:[#allocation40_spill] sm:$0xff] }
 0x42e   :  { %v1294_v61 = vadd.f32 1.0, %v2268_v5 }
 0x42f   :  { %v1298_v3 = vmul.f32 %v1286_v1, %v2972_v10  ;;  %2269 = vtanh.f32 %v3065_v23  ;;  %v1295_v33 = vmul.f32 0.5, %v1293_v14  ;;  %v3098_v10 = vld [vmem:[#allocation5 + $0x48] ss:$16 sps:$4 sm:$0xff]   ;;  %v3354_v14 = vld [vmem:[#allocation39_spill] sm:$0xff] }
 0x430   :  { %v1296_v26 = vmul.f32 0.5, %v1294_v61 }
 0x431   :  { %v3069_v4 = vadd.f32 %v1300_v15, %v1298_v3 }
 0x433   :  { %2271 = vtanh.f32 %v3069_v4 }
 0x43c   :  { %v2270_v20 = vpop.eup %2269 }
 0x43d   :  { %v1305_v7 = vmul.f32 %v2270_v20, %v1295_v33 }
 0x440   :  { %v2272_v32 = vpop.eup %2271 }
 0x441   :  { %v1306_v0 = vmul.f32 %v2272_v32, %v1296_v26  ;;  %v3355_v26 = vld [vmem:[#allocation37_spill] sm:$0xff] }
 0x443   :  { %v1307_v24 = vpack.c.bf16 %v1306_v0, %v1305_v7  ;;  %v3356_v7 = vld [vmem:[#allocation41_spill] sm:$0xff] }
 0x445   :  { %2080 = vst [vmem:[%s3272_s4 + $0x18] sm:$0xff] %v1307_v24   ;;  %1351 = vmatmul.mubr.bf16.vlgmr.msra.gmra.mxu0 %v1307_v24  ;;  %1394 = vmatmul.mubr.bf16.vlgmr.msra.gmra.mxu1 %v1307_v24 }
 0x446   :  { %1460 = vmatpush1.bf16.msra.mxu0 %v2978_v34  ;;  %1503 = vmatpush1.bf16.msra.mxu1 %v2981_v48 }
 0x447   :  { %1461 = vmatprep.subr.bf16.mxu0 %v2984_v49  ;;  %1504 = vmatprep.subr.bf16.mxu1 %v2987_v50 }
 0x448   :  { %1491 = vmatprep.mubr.bf16.mxu0 %v3329_v27  ;;  %1534 = vmatprep.mubr.bf16.mxu1 %v3329_v27 }
 0x44a   :  { %1462 = vmatpush1.bf16.msra.mxu0 %v2992_v51  ;;  %1505 = vmatpush1.bf16.msra.mxu1 %v2995_v53 }
 0x44b   :  { %1463 = vmatprep.subr.bf16.mxu0 %v2998_v54  ;;  %1506 = vmatprep.subr.bf16.mxu1 %v3001_v55 }
 0x44e   :  { %1464 = vmatpush1.bf16.msra.mxu0 %v3004_v56  ;;  %1507 = vmatpush1.bf16.msra.mxu1 %v3007_v57 }
 0x44f   :  { %1465 = vmatprep.subr.bf16.mxu0 %v3010_v58  ;;  %1508 = vmatprep.subr.bf16.mxu1 %v3013_v59 }
 0x452   :  { %1466 = vmatpush1.bf16.msra.mxu0 %v3016_v28  ;;  %1509 = vmatpush1.bf16.msra.mxu1 %v3019_v9 }
 0x453   :  { %1467 = vmatprep.subr.bf16.mxu0 %v3022_v22  ;;  %1510 = vmatprep.subr.bf16.mxu1 %v3025_v43 }
 0x456   :  { %1468 = vmatpush1.bf16.msra.mxu0 %v3028_v19  ;;  %1511 = vmatpush1.bf16.msra.mxu1 %v3031_v29 }
 0x457   :  { %1469 = vmatprep.subr.bf16.mxu0 %v3034_v21  ;;  %1512 = vmatprep.subr.bf16.mxu1 %v3037_v17 }
 0x45a   :  { %1470 = vmatpush1.bf16.msra.mxu0 %v3040_v52  ;;  %1513 = vmatpush1.bf16.msra.mxu1 %v3098_v10 }
 0x45b   :  { %1471 = vmatprep.subr.bf16.mxu0 %v3044_v13  ;;  %1514 = vmatprep.subr.bf16.mxu1 %v3102_v35 }
 0x45e   :  { %1472 = vmatpush1.bf16.msra.mxu0 %v3105_v30  ;;  %1515 = vmatpush1.bf16.msra.mxu1 %v3108_v6 }
 0x45f   :  { %1473 = vmatprep.subr.bf16.mxu0 %v3111_v18  ;;  %1516 = vmatprep.subr.bf16.mxu1 %v3114_v38 }
 0x462   :  { %1474 = vmatpush1.bf16.msra.mxu0 %v3117_v39  ;;  %1517 = vmatpush1.bf16.msra.mxu1 %v3120_v31 }
 0x463   :  { %1600 = vmatprep.subr.bf16.mxu0 %v2953_v36  ;;  %1643 = vmatprep.subr.bf16.mxu1 %v2956_v37 }
 0x505   :  { %v1352_v40 = vpop.f32.mrf.mxu0  ;;  %v1395_v41 = vpop.f32.mrf.mxu1 }
 0x506   :  { %v1404_v44 = vadd.f32 %v1352_v40, %v3349_v42  ;;  %v1406_v63 = vadd.f32 %v1395_v41, %v3351_v12 }
 0x507   :  { %v1354_v45 = vpop.f32.mrf.mxu0  ;;  %v1397_v46 = vpop.f32.mrf.mxu1 }
 0x508   :  { %v1412_v47 = vmul.f32 0.5, %v1404_v44  ;;  %v1405_v8 = vadd.f32 %v1354_v45, %v3350_v60  ;;  %v1407_v32 = vadd.f32 %v1397_v46, %v3355_v26 }
 0x509   :  { %v1356_v16 = vpop.f32.mrf.mxu0  ;;  %v1399_v1 = vpop.f32.mrf.mxu1 }
 0x50a   :  { %2273 = vtanh.f32 %v1412_v47  ;;  %v1420_v11 = vmul.f32 0.5, %v1405_v8  ;;  %v1408_v2 = vadd.f32 %v1356_v16, %v3352_v62  ;;  %v1410_v61 = vadd.f32 %v1399_v1, %v3354_v14 }
 0x50b   :  { %v1358_v15 = vpop.f32.mrf.mxu0  ;;  %v1401_v33 = vpop.f32.mrf.mxu1  ;;  %v1430_v42 = vmul.f32 0.5, %v1407_v32 }
 0x50c   :  { %2275 = vtanh.f32 %v1420_v11  ;;  %v1413_v3 = vmul.f32 0.5, %v1408_v2  ;;  %v1409_v5 = vadd.f32 %v1358_v15, %v3353_v25  ;;  %v1411_v0 = vadd.f32 %v1401_v33, %v3356_v7 }
 0x50d   :  { %2277 = vtanh.f32 %v1406_v63 }
 0x50e   :  { %2279 = vtanh.f32 %v1413_v3  ;;  %v1421_v20 = vmul.f32 0.5, %v1409_v5  ;;  %v1431_v60 = vmul.f32 0.5, %v1411_v0 }
 0x510   :  { %2281 = vtanh.f32 %v1421_v20 }
 0x511   :  { %2283 = vtanh.f32 %v1410_v61 }
 0x512   :  { %2285 = vtanh.f32 %v1430_v42 }
 0x513   :  { %2287 = vtanh.f32 %v1431_v60 }
 0x517   :  { %v2274_v24 = vpop.eup %2273 }
 0x518   :  { %v1416_v40 = vadd.f32 1.0, %v2274_v24 }
 0x519   :  { %v2276_v41 = vpop.eup %2275 }
 0x51a   :  { %v2278_v44 = vpop.eup %2277  ;;  %v1418_v45 = vmul.f32 0.5, %v1416_v40  ;;  %v1424_v47 = vadd.f32 1.0, %v2276_v41 }
 0x51b   :  { %v2280_v8 = vpop.eup %2279 }
 0x51c   :  { %v1426_v12 = vmul.f32 0.5, %v1424_v47  ;;  %v1440_v63 = vmul.f32 %v2278_v44, %v1418_v45  ;;  %v1417_v16 = vadd.f32 1.0, %v2280_v8  ;;  %v3357_v44 = vld [vmem:[#allocation42_spill] sm:$0xff] }
 0x51d   :  { %v2282_v11 = vpop.eup %2281 }
 0x51e   :  { %v1438_v62 = vmul.f32 %v1426_v12, %v3065_v23  ;;  %v1419_v2 = vmul.f32 0.5, %v1417_v16  ;;  %v1425_v46 = vadd.f32 1.0, %v2282_v11  ;;  %v2284_v1 = vpop.eup %2283  ;;  %v3358_v12 = vld [vmem:[#allocation44_spill] sm:$0xff]  ;;  %v3359_v16 = vld [vmem:[#allocation43_spill] sm:$0xff] }
 0x51f   :  { %v2286_v61 = vpop.eup %2285 }
 0x520   :  { %v3134_v15 = vadd.f32 %v1440_v63, %v1438_v62  ;;  %v1427_v3 = vmul.f32 0.5, %v1425_v46  ;;  %v1441_v25 = vmul.f32 %v2284_v1, %v1419_v2  ;;  %v2288_v20 = vpop.eup %2287  ;;  %v1434_v33 = vadd.f32 1.0, %v2286_v61  ;;  %v3360_v46 = vld [vmem:[#allocation46_spill] sm:$0xff]  ;;  %v3362_v61 = vld [vmem:[#allocation47_spill] sm:$0xff] }
 0x521   :  { %v1435_v23 = vadd.f32 1.0, %v2288_v20 }
 0x522   :  { %v1439_v5 = vmul.f32 %v1427_v3, %v3069_v4  ;;  %2289 = vtanh.f32 %v3134_v15  ;;  %v1436_v32 = vmul.f32 0.5, %v1434_v33 }
 0x523   :  { %v1437_v7 = vmul.f32 0.5, %v1435_v23 }
 0x524   :  { %v3138_v14 = vadd.f32 %v1441_v25, %v1439_v5  ;;  %v3361_v25 = vld [vmem:[#allocation48_spill] sm:$0xff] }
 0x526   :  { %2291 = vtanh.f32 %v3138_v14 }
 0x52f   :  { %v2290_v26 = vpop.eup %2289 }
 0x530   :  { %v1446_v24 = vmul.f32 %v2290_v26, %v1436_v32  ;;  %v3363_v26 = vld [vmem:[#allocation45_spill] sm:$0xff] }
 0x533   :  { %v2292_v0 = vpop.eup %2291 }
 0x534   :  { %v1447_v40 = vmul.f32 %v2292_v0, %v1437_v7  ;;  %v3364_v7 = vld [vmem:[#allocation49_spill] sm:$0xff] }
 0x536   :  { %v1448_v41 = vpack.c.bf16 %v1447_v40, %v1446_v24 }
 0x538   :  { %2081 = vst [vmem:[%s3272_s4 + $0x20] sm:$0xff] %v1448_v41   ;;  %1492 = vmatmul.mubr.bf16.vlgmr.msra.gmra.mxu0 %v1448_v41  ;;  %1535 = vmatmul.mubr.bf16.vlgmr.msra.gmra.mxu1 %v1448_v41 }
 0x539   :  { %1601 = vmatpush1.bf16.msra.mxu0 %v2978_v34  ;;  %1644 = vmatpush1.bf16.msra.mxu1 %v2981_v48 }
 0x53a   :  { %1602 = vmatprep.subr.bf16.mxu0 %v2984_v49  ;;  %1645 = vmatprep.subr.bf16.mxu1 %v2987_v50 }
 0x53b   :  { %1632 = vmatprep.mubr.bf16.mxu0 %v3329_v27  ;;  %1675 = vmatprep.mubr.bf16.mxu1 %v3329_v27 }
 0x53d   :  { %1603 = vmatpush1.bf16.msra.mxu0 %v2992_v51  ;;  %1646 = vmatpush1.bf16.msra.mxu1 %v2995_v53 }
 0x53e   :  { %1604 = vmatprep.subr.bf16.mxu0 %v2998_v54  ;;  %1647 = vmatprep.subr.bf16.mxu1 %v3001_v55 }
 0x541   :  { %1605 = vmatpush1.bf16.msra.mxu0 %v3004_v56  ;;  %1648 = vmatpush1.bf16.msra.mxu1 %v3007_v57 }
 0x542   :  { %1606 = vmatprep.subr.bf16.mxu0 %v3010_v58  ;;  %1649 = vmatprep.subr.bf16.mxu1 %v3013_v59 }
 0x545   :  { %1607 = vmatpush1.bf16.msra.mxu0 %v3016_v28  ;;  %1650 = vmatpush1.bf16.msra.mxu1 %v3019_v9 }
 0x546   :  { %1608 = vmatprep.subr.bf16.mxu0 %v3022_v22  ;;  %1651 = vmatprep.subr.bf16.mxu1 %v3025_v43 }
 0x549   :  { %1609 = vmatpush1.bf16.msra.mxu0 %v3028_v19  ;;  %1652 = vmatpush1.bf16.msra.mxu1 %v3031_v29 }
 0x54a   :  { %1610 = vmatprep.subr.bf16.mxu0 %v3034_v21  ;;  %1653 = vmatprep.subr.bf16.mxu1 %v3037_v17 }
 0x54d   :  { %1611 = vmatpush1.bf16.msra.mxu0 %v3040_v52  ;;  %1654 = vmatpush1.bf16.msra.mxu1 %v3098_v10 }
 0x54e   :  { %1612 = vmatprep.subr.bf16.mxu0 %v3044_v13  ;;  %1655 = vmatprep.subr.bf16.mxu1 %v3102_v35 }
 0x551   :  { %1613 = vmatpush1.bf16.msra.mxu0 %v3105_v30  ;;  %1656 = vmatpush1.bf16.msra.mxu1 %v3108_v6 }
 0x552   :  { %1614 = vmatprep.subr.bf16.mxu0 %v3111_v18  ;;  %1657 = vmatprep.subr.bf16.mxu1 %v3114_v38 }
 0x555   :  { %1615 = vmatpush1.bf16.msra.mxu0 %v3117_v39  ;;  %1658 = vmatpush1.bf16.msra.mxu1 %v3120_v31 }
 0x556   :  { %1741 = vmatprep.subr.bf16.mxu0 %v2953_v36  ;;  %1784 = vmatprep.subr.bf16.mxu1 %v2956_v37 }
 0x5f8   :  { %v1493_v4 = vpop.f32.mrf.mxu0  ;;  %v1536_v42 = vpop.f32.mrf.mxu1 }
 0x5f9   :  { %v1545_v45 = vadd.f32 %v1493_v4, %v3357_v44  ;;  %v1547_v11 = vadd.f32 %v1536_v42, %v3359_v16 }
 0x5fa   :  { %v1495_v47 = vpop.f32.mrf.mxu0  ;;  %v1538_v60 = vpop.f32.mrf.mxu1 }
 0x5fb   :  { %v1553_v8 = vmul.f32 0.5, %v1545_v45  ;;  %v1546_v63 = vadd.f32 %v1495_v47, %v3358_v12  ;;  %v1548_v32 = vadd.f32 %v1538_v60, %v3363_v26 }
 0x5fc   :  { %v1497_v62 = vpop.f32.mrf.mxu0  ;;  %v1540_v3 = vpop.f32.mrf.mxu1 }
 0x5fd   :  { %2293 = vtanh.f32 %v1553_v8  ;;  %v1561_v2 = vmul.f32 0.5, %v1546_v63  ;;  %v1549_v1 = vadd.f32 %v1497_v62, %v3360_v46  ;;  %v1551_v20 = vadd.f32 %v1540_v3, %v3362_v61 }
 0x5fe   :  { %v1499_v36 = vpop.f32.mrf.mxu0  ;;  %v1542_v23 = vpop.f32.mrf.mxu1  ;;  %v1571_v4 = vmul.f32 0.5, %v1548_v32 }
 0x5ff   :  { %2295 = vtanh.f32 %v1561_v2  ;;  %v1554_v37 = vmul.f32 0.5, %v1549_v1  ;;  %v1550_v5 = vadd.f32 %v1499_v36, %v3361_v25  ;;  %v1552_v0 = vadd.f32 %v1542_v23, %v3364_v7 }
 0x600   :  { %2297 = vtanh.f32 %v1547_v11 }
 0x601   :  { %2299 = vtanh.f32 %v1554_v37  ;;  %v1562_v33 = vmul.f32 0.5, %v1550_v5  ;;  %v1572_v47 = vmul.f32 0.5, %v1552_v0 }
 0x603   :  { %2301 = vtanh.f32 %v1562_v33 }
 0x604   :  { %2303 = vtanh.f32 %v1551_v20 }
 0x605   :  { %2305 = vtanh.f32 %v1571_v4 }
 0x606   :  { %2307 = vtanh.f32 %v1572_v47 }
 0x60a   :  { %v2294_v24 = vpop.eup %2293 }
 0x60b   :  { %v1557_v40 = vadd.f32 1.0, %v2294_v24 }
 0x60c   :  { %v2296_v41 = vpop.eup %2295 }
 0x60d   :  { %v2298_v42 = vpop.eup %2297  ;;  %v1559_v44 = vmul.f32 0.5, %v1557_v40  ;;  %v1565_v45 = vadd.f32 1.0, %v2296_v41 }
 0x60e   :  { %v2300_v8 = vpop.eup %2299 }
 0x60f   :  { %v1567_v12 = vmul.f32 0.5, %v1565_v45  ;;  %v1581_v63 = vmul.f32 %v2298_v42, %v1559_v44  ;;  %v1558_v16 = vadd.f32 1.0, %v2300_v8 }
 0x610   :  { %v2302_v11 = vpop.eup %2301 }
 0x611   :  { %v1579_v62 = vmul.f32 %v1567_v12, %v3134_v15  ;;  %v1560_v2 = vmul.f32 0.5, %v1558_v16  ;;  %v1566_v60 = vadd.f32 1.0, %v2302_v11  ;;  %v2304_v46 = vpop.eup %2303 }
 0x612   :  { %v2306_v5 = vpop.eup %2305 }
 0x613   :  { %v3187_v1 = vadd.f32 %v1581_v63, %v1579_v62  ;;  %v1568_v3 = vmul.f32 0.5, %v1566_v60  ;;  %v1582_v36 = vmul.f32 %v2304_v46, %v1560_v2  ;;  %v2308_v61 = vpop.eup %2307  ;;  %v1575_v20 = vadd.f32 1.0, %v2306_v5 }
 0x614   :  { %v1576_v15 = vadd.f32 1.0, %v2308_v61 }
 0x615   :  { %v1580_v37 = vmul.f32 %v1568_v3, %v3138_v14  ;;  %2309 = vtanh.f32 %v3187_v1  ;;  %v1577_v23 = vmul.f32 0.5, %v1575_v20 }
 0x616   :  { %v1578_v26 = vmul.f32 0.5, %v1576_v15 }
 0x617   :  { %v3191_v25 = vadd.f32 %v1582_v36, %v1580_v37 }
 0x619   :  { %2311 = vtanh.f32 %v3191_v25 }
 0x622   :  { %v2310_v33 = vpop.eup %2309 }
 0x623   :  { %v1587_v7 = vmul.f32 %v2310_v33, %v1577_v23 }
 0x626   :  { %v2312_v32 = vpop.eup %2311 }
 0x627   :  { %v1588_v0 = vmul.f32 %v2312_v32, %v1578_v26 }
 0x629   :  { %v1589_v24 = vpack.c.bf16 %v1588_v0, %v1587_v7 }
 0x62b   :  { %2082 = vst [vmem:[%s3272_s4 + $0x28] sm:$0xff] %v1589_v24   ;;  %1633 = vmatmul.mubr.bf16.vlgmr.msra.gmra.mxu0 %v1589_v24  ;;  %1676 = vmatmul.mubr.bf16.vlgmr.msra.gmra.mxu1 %v1589_v24  ;;  %v3373_v24 = vld [vmem:[#allocation58_spill] sm:$0xff] }
 0x62c   :  { %1742 = vmatpush1.bf16.msra.mxu0 %v2978_v34  ;;  %1785 = vmatpush1.bf16.msra.mxu1 %v2981_v48  ;;  %v3365_v48 = vld [vmem:[#allocation50_spill] sm:$0xff] }
 0x62d   :  { %1743 = vmatprep.subr.bf16.mxu0 %v2984_v49  ;;  %1786 = vmatprep.subr.bf16.mxu1 %v2987_v50 }
 0x62e   :  { %1773 = vmatprep.mubr.bf16.mxu0 %v3329_v27  ;;  %1816 = vmatprep.mubr.bf16.mxu1 %v3329_v27 }
 0x630   :  { %1744 = vmatpush1.bf16.msra.mxu0 %v2992_v51  ;;  %1787 = vmatpush1.bf16.msra.mxu1 %v2995_v53 }
 0x631   :  { %1745 = vmatprep.subr.bf16.mxu0 %v2998_v54  ;;  %1788 = vmatprep.subr.bf16.mxu1 %v3001_v55  ;;  %v3366_v54 = vld [vmem:[#allocation52_spill] sm:$0xff] }
 0x634   :  { %1746 = vmatpush1.bf16.msra.mxu0 %v3004_v56  ;;  %1789 = vmatpush1.bf16.msra.mxu1 %v3007_v57  ;;  %v3367_v56 = vld [vmem:[#allocation51_spill] sm:$0xff] }
 0x635   :  { %1747 = vmatprep.subr.bf16.mxu0 %v3010_v58  ;;  %1790 = vmatprep.subr.bf16.mxu1 %v3013_v59 }
 0x638   :  { %1748 = vmatpush1.bf16.msra.mxu0 %v3016_v28  ;;  %1791 = vmatpush1.bf16.msra.mxu1 %v3019_v9  ;;  %v3368_v28 = vld [vmem:[#allocation54_spill] sm:$0xff] }
 0x639   :  { %1749 = vmatprep.subr.bf16.mxu0 %v3022_v22  ;;  %1792 = vmatprep.subr.bf16.mxu1 %v3025_v43 }
 0x63c   :  { %1750 = vmatpush1.bf16.msra.mxu0 %v3028_v19  ;;  %1793 = vmatpush1.bf16.msra.mxu1 %v3031_v29  ;;  %v3369_v29 = vld [vmem:[#allocation56_spill] sm:$0xff] }
 0x63d   :  { %1751 = vmatprep.subr.bf16.mxu0 %v3034_v21  ;;  %1794 = vmatprep.subr.bf16.mxu1 %v3037_v17  ;;  %v3370_v17 = vld [vmem:[#allocation55_spill] sm:$0xff] }
 0x640   :  { %1752 = vmatpush1.bf16.msra.mxu0 %v3040_v52  ;;  %1795 = vmatpush1.bf16.msra.mxu1 %v3098_v10 }
 0x641   :  { %1753 = vmatprep.subr.bf16.mxu0 %v3044_v13  ;;  %1796 = vmatprep.subr.bf16.mxu1 %v3102_v35  ;;  %v3371_v35 = vld [vmem:[#allocation53_spill] sm:$0xff] }
 0x644   :  { %1754 = vmatpush1.bf16.msra.mxu0 %v3105_v30  ;;  %1797 = vmatpush1.bf16.msra.mxu1 %v3108_v6  ;;  %v3372_v6 = vld [vmem:[#allocation57_spill] sm:$0xff] }
 0x645   :  { %1755 = vmatprep.subr.bf16.mxu0 %v3111_v18  ;;  %1798 = vmatprep.subr.bf16.mxu1 %v3114_v38 }
 0x648   :  { %1756 = vmatpush1.bf16.msra.mxu0 %v3117_v39  ;;  %1799 = vmatpush1.bf16.msra.mxu1 %v3120_v31 }
 0x6eb   :  { %v1634_v27 = vpop.f32.mrf.mxu0  ;;  %v1677_v34 = vpop.f32.mrf.mxu1 }
 0x6ec   :  { %v1686_v49 = vadd.f32 %v1634_v27, %v3365_v48  ;;  %v1688_v57 = vadd.f32 %v1677_v34, %v3367_v56 }
 0x6ed   :  { %v1636_v50 = vpop.f32.mrf.mxu0  ;;  %v1679_v51 = vpop.f32.mrf.mxu1 }
 0x6ee   :  { %v1694_v53 = vmul.f32 0.5, %v1686_v49  ;;  %v1687_v55 = vadd.f32 %v1636_v50, %v3366_v54  ;;  %v1689_v30 = vadd.f32 %v1679_v51, %v3371_v35  ;;  %v3374_v50 = vld [vmem:[#allocation60_spill] sm:$0xff]  ;;  %v3380_v35 = vld [vmem:[#allocation65_spill] sm:$0xff] }
 0x6ef   :  { %v1638_v58 = vpop.f32.mrf.mxu0  ;;  %v1681_v22 = vpop.f32.mrf.mxu1 }
 0x6f0   :  { %2313 = vtanh.f32 %v1694_v53  ;;  %v1702_v59 = vmul.f32 0.5, %v1687_v55  ;;  %v1690_v9 = vadd.f32 %v1638_v58, %v3368_v28  ;;  %v1692_v52 = vadd.f32 %v1681_v22, %v3370_v17  ;;  %v3375_v53 = vld [vmem:[#allocation59_spill] sm:$0xff]  ;;  %v3377_v22 = vld [vmem:[#allocation64_spill] sm:$0xff]  ;;  %v3379_v17 = vld [vmem:[#allocation61_spill] sm:$0xff] }
 0x6f1   :  { %v1640_v43 = vpop.f32.mrf.mxu0  ;;  %v1683_v10 = vpop.f32.mrf.mxu1  ;;  %v1712_v14 = vmul.f32 0.5, %v1689_v30 }
 0x6f2   :  { %2315 = vtanh.f32 %v1702_v59  ;;  %v1695_v19 = vmul.f32 0.5, %v1690_v9  ;;  %v1691_v21 = vadd.f32 %v1640_v43, %v3369_v29  ;;  %v1693_v18 = vadd.f32 %v1683_v10, %v3372_v6 }
 0x6f3   :  { %2317 = vtanh.f32 %v1688_v57  ;;  %v3376_v57 = vld [vmem:[#allocation62_spill] sm:$0xff] }
 0x6f4   :  { %2319 = vtanh.f32 %v1695_v19  ;;  %v1703_v13 = vmul.f32 0.5, %v1691_v21  ;;  %v1713_v42 = vmul.f32 0.5, %v1693_v18  ;;  %v3378_v19 = vld [vmem:[#allocation63_spill] sm:$0xff] }
 0x6f6   :  { %2321 = vtanh.f32 %v1703_v13 }
 0x6f7   :  { %2323 = vtanh.f32 %v1692_v52 }
 0x6f8   :  { %2325 = vtanh.f32 %v1712_v14 }
 0x6f9   :  { %2327 = vtanh.f32 %v1713_v42 }
 0x6fd   :  { %v2314_v38 = vpop.eup %2313 }
 0x6fe   :  { %v1698_v39 = vadd.f32 1.0, %v2314_v38 }
 0x6ff   :  { %v2316_v31 = vpop.eup %2315 }
 0x700   :  { %v2318_v40 = vpop.eup %2317  ;;  %v1700_v41 = vmul.f32 0.5, %v1698_v39  ;;  %v1706_v4 = vadd.f32 1.0, %v2316_v31 }
 0x701   :  { %v2320_v44 = vpop.eup %2319 }
 0x702   :  { %v1708_v45 = vmul.f32 0.5, %v1706_v4  ;;  %v1722_v47 = vmul.f32 %v2318_v40, %v1700_v41  ;;  %v1699_v8 = vadd.f32 1.0, %v2320_v44 }
 0x703   :  { %v2322_v12 = vpop.eup %2321 }
 0x704   :  { %v1720_v63 = vmul.f32 %v1708_v45, %v3187_v1  ;;  %v1701_v16 = vmul.f32 0.5, %v1699_v8  ;;  %v1707_v11 = vadd.f32 1.0, %v2322_v12  ;;  %v2324_v62 = vpop.eup %2323 }
 0x705   :  { %v2326_v37 = vpop.eup %2325 }
 0x706   :  { %v1724_v2 = vadd.f32 %v1722_v47, %v1720_v63  ;;  %v1709_v60 = vmul.f32 0.5, %v1707_v11  ;;  %v1723_v46 = vmul.f32 %v2324_v62, %v1701_v16  ;;  %v2328_v5 = vpop.eup %2327  ;;  %v1716_v61 = vadd.f32 1.0, %v2326_v37 }
 0x707   :  { %v1717_v20 = vadd.f32 1.0, %v2328_v5 }
 0x708   :  { %v1721_v3 = vmul.f32 %v1709_v60, %v3191_v25  ;;  %2329 = vtanh.f32 %v1724_v2  ;;  %v1718_v1 = vmul.f32 0.5, %v1716_v61 }
 0x709   :  { %v1719_v33 = vmul.f32 0.5, %v1717_v20 }
 0x70a   :  { %v3239_v36 = vadd.f32 %v1723_v46, %v1721_v3 }
 0x70c   :  { %2331 = vtanh.f32 %v3239_v36 }
 0x715   :  { %v2330_v15 = vpop.eup %2329 }
 0x716   :  { %v1728_v26 = vmul.f32 %v2330_v15, %v1718_v1 }
 0x719   :  { %v2332_v23 = vpop.eup %2331 }
 0x71a   :  { %v1729_v32 = vmul.f32 %v2332_v23, %v1719_v33 }
 0x71c   :  { %v1730_v7 = vpack.c.bf16 %v1729_v32, %v1728_v26 }
 0x71e   :  { %2083 = vst [vmem:[%s3272_s4 + $0x30] sm:$0xff] %v1730_v7   ;;  %1774 = vmatmul.mubr.bf16.vlgmr.msra.gmra.mxu0 %v1730_v7  ;;  %1817 = vmatmul.mubr.bf16.vlgmr.msra.gmra.mxu1 %v1730_v7 }
 0x7de   :  { %v1775_v25 = vpop.f32.mrf.mxu0  ;;  %v1818_v0 = vpop.f32.mrf.mxu1 }
 0x7df   :  { %v1827_v27 = vadd.f32 %v1775_v25, %v3373_v24  ;;  %v1829_v54 = vadd.f32 %v1818_v0, %v3375_v53 }
 0x7e0   :  { %v1777_v34 = vpop.f32.mrf.mxu0  ;;  %v1820_v48 = vpop.f32.mrf.mxu1 }
 0x7e1   :  { %v1835_v49 = vmul.f32 0.5, %v1827_v27  ;;  %v1828_v51 = vadd.f32 %v1777_v34, %v3374_v50  ;;  %v1830_v52 = vadd.f32 %v1820_v48, %v3379_v17 }
 0x7e2   :  { %v1779_v55 = vpop.f32.mrf.mxu0  ;;  %v1822_v59 = vpop.f32.mrf.mxu1 }
 0x7e3   :  { %2333 = vtanh.f32 %v1835_v49  ;;  %v1843_v56 = vmul.f32 0.5, %v1828_v51  ;;  %v1831_v58 = vadd.f32 %v1779_v55, %v3376_v57  ;;  %v1833_v29 = vadd.f32 %v1822_v59, %v3378_v19 }
 0x7e4   :  { %v1781_v28 = vpop.f32.mrf.mxu0  ;;  %v1824_v13 = vpop.f32.mrf.mxu1  ;;  %v1853_v10 = vmul.f32 0.5, %v1830_v52 }
 0x7e5   :  { %2335 = vtanh.f32 %v1843_v56  ;;  %v1836_v9 = vmul.f32 0.5, %v1831_v58  ;;  %v1832_v43 = vadd.f32 %v1781_v28, %v3377_v22  ;;  %v1834_v30 = vadd.f32 %v1824_v13, %v3380_v35 }
 0x7e6   :  { %2337 = vtanh.f32 %v1829_v54 }
 0x7e7   :  { %2339 = vtanh.f32 %v1836_v9  ;;  %v1844_v21 = vmul.f32 0.5, %v1832_v43  ;;  %v1854_v40 = vmul.f32 0.5, %v1834_v30 }
 0x7e9   :  { %2341 = vtanh.f32 %v1844_v21 }
 0x7ea   :  { %2343 = vtanh.f32 %v1833_v29 }
 0x7eb   :  { %2345 = vtanh.f32 %v1853_v10 }
 0x7ec   :  { %2347 = vtanh.f32 %v1854_v40 }
 0x7f0   :  { %v2334_v6 = vpop.eup %2333 }
 0x7f1   :  { %v1839_v18 = vadd.f32 1.0, %v2334_v6 }
 0x7f2   :  { %v2336_v38 = vpop.eup %2335 }
 0x7f3   :  { %v2338_v39 = vpop.eup %2337  ;;  %v1841_v31 = vmul.f32 0.5, %v1839_v18  ;;  %v1847_v14 = vadd.f32 1.0, %v2336_v38 }
 0x7f4   :  { %v2340_v41 = vpop.eup %2339 }
 0x7f5   :  { %v1849_v4 = vmul.f32 0.5, %v1847_v14  ;;  %v1863_v42 = vmul.f32 %v2338_v39, %v1841_v31  ;;  %v1840_v44 = vadd.f32 1.0, %v2340_v41 }
 0x7f6   :  { %v2342_v45 = vpop.eup %2341 }
 0x7f7   :  { %v1861_v47 = vmul.f32 %v1849_v4, %v1724_v2  ;;  %v1842_v8 = vmul.f32 0.5, %v1840_v44  ;;  %v1848_v12 = vadd.f32 1.0, %v2342_v45  ;;  %v2344_v63 = vpop.eup %2343 }
 0x7f8   :  { %v2346_v2 = vpop.eup %2345 }
 0x7f9   :  { %v1865_v16 = vadd.f32 %v1863_v42, %v1861_v47  ;;  %v1850_v11 = vmul.f32 0.5, %v1848_v12  ;;  %v1864_v62 = vmul.f32 %v2344_v63, %v1842_v8  ;;  %v1857_v3 = vadd.f32 1.0, %v2346_v2  ;;  %v2348_v37 = vpop.eup %2347 }
 0x7fa   :  { %v1858_v61 = vadd.f32 1.0, %v2348_v37 }
 0x7fb   :  { %2349 = vtanh.f32 %v1865_v16  ;;  %1891 = vst [vmem:[%s3274_s6] sm:$0xff] %v1865_v16  ;;  %v1862_v60 = vmul.f32 %v1850_v11, %v3239_v36  ;;  %v1859_v5 = vmul.f32 0.5, %v1857_v3 }
 0x7fc   :  { %v1860_v1 = vmul.f32 0.5, %v1858_v61 }
 0x7fd   :  { %v1866_v46 = vadd.f32 %v1864_v62, %v1862_v60 }
 0x7ff   :  { %2351 = vtanh.f32 %v1866_v46  ;;  %1892 = vst [vmem:[%s3274_s6 + $0x8] sm:$0xff] %v1866_v46 }
 0x808   :  { %v2350_v20 = vpop.eup %2349 }
 0x809   :  { %v1869_v15 = vmul.f32 %v2350_v20, %v1859_v5 }
 0x80b   :  { %1889 = vst [vmem:[%s3273_s5] sm:$0xff] %v1869_v15 }
 0x80c   :  { %v2352_v33 = vpop.eup %2351 }
 0x80d   :  { %v1870_v36 = vmul.f32 %v2352_v33, %v1860_v1 }
 0x80f   :  { %v2076_v23 = vpack.c.bf16 %v1870_v36, %v1869_v15  ;;  %1890 = vst [vmem:[%s3273_s5 + $0x8] sm:$0xff] %v1870_v36 }
 0x811   :  { %2084 = vst [vmem:[%s3272_s4 + $0x38] sm:$0xff] %v2076_v23  }
 0x812   :  { %1905 = vsyncmov [#allocation6] }
 0x815   :  { %s1906_s18 = vpop.sfrf %1905 }
 0x816   :  { %p2020_p10 = scmp.ne.s32.totalorder %s1906_s18, 0 }
 0x818   :  { %1910 = shalt.err (%p2020_p10)  }
 0x819   :  { %1912 = vsyncmov [#allocation6 + $0x1] }
 0x81c   :  { %s1913_s19 = vpop.sfrf %1912 }
 0x81d   :  { %p2021_p11 = scmp.ne.s32.totalorder %s1913_s19, 0 }
 0x81f   :  { %1917 = shalt.err (%p2021_p11)  }

</bundles_post_ra>
